<compile_context>
chip_gen: v7x
topology: tpu7x:2x2x1
jax: 0.10.0
libtpu: 0.0.40
codegen_flags: <defaults>
</compile_context>

<pallas_src>
import functools

import jax
import jax.numpy as jnp
import numpy as np
from jax.experimental import pallas as pl
from jax.experimental.pallas import tpu as pltpu


def attn_lepe_kernel(x_ref, wqkv_ref, lepe_w_ref, wp_h_ref, wp_ref, b_ref, o_ref,
                     qkv_sc, acc_sc, xpad_sc, *, H, W, K, num_heads, head_dim):
    N = H * W
    C = num_heads * head_dim
    hd = head_dim
    pad = K // 2

    # x stays channels-first (C, N): no on-chip transpose; token axis is the lane axis.
    x32 = x_ref[...].astype(jnp.float32)                       # (C, N)
    xb = x32.astype(jnp.bfloat16)

    # ---- fused QKV projection: one (3C, C) @ (C, N) MXU matmul --------------------
    # softmax scale is pre-folded into the q rows of wqkv by pack_params.
    qkv_sc[...] = jnp.dot(wqkv_ref[...], xb, preferred_element_type=jnp.float32)

    # ---- LePE depthwise KxK conv, channels-first ----------------------------------
    # Zero-padded token axis in a VMEM scratch: vertically out-of-bounds taps read
    # zeros automatically; only the horizontal row-wrap needs a per-lane mask.
    off0 = pad * (W + 1)
    xpad_sc[...] = jnp.zeros(xpad_sc.shape, jnp.float32)
    xpad_sc[:, off0:off0 + N] = x32

    x_pos = jax.lax.broadcasted_iota(jnp.int32, (1, N), 1) % W
    lepe = jnp.zeros((C, N), jnp.float32)
    for kh in range(K):
        for kw in range(K):
            dy, dx = kh - pad, kw - pad
            start = off0 + dy * W + dx
            src = xpad_sc[:, start:start + N]                   # (C, N) shifted load
            if dx != 0:
                ok = (x_pos + dx >= 0) & (x_pos + dx < W)       # (1, N) column mask
                src = jnp.where(ok, src, 0.0)
            lepe = lepe + src * lepe_w_ref[:, kh * K + kw:kh * K + kw + 1]  # (C,1) tap

    # accumulator starts with the LePE projection; the LePE conv bias is folded
    # (through the projection) into b_ref by pack_params.
    acc_sc[...] = jnp.dot(wp_ref[...], lepe.astype(jnp.bfloat16),
                          preferred_element_type=jnp.float32) + b_ref[...]

    # ---- per-head attention with the output projection folded per head ------------
    # NOTE: attn_drop / proj_drop have p=0.0 (eval semantics) -> identity.
    def head_body(h, carry):
        off = pl.multiple_of(h * hd, hd)
        q = qkv_sc[pl.ds(off, hd), :].astype(jnp.bfloat16)            # (hd, N)
        k = qkv_sc[pl.ds(C + off, hd), :].astype(jnp.bfloat16)        # (hd, N)
        v = qkv_sc[pl.ds(2 * C + off, hd), :].astype(jnp.bfloat16)    # (hd, N)
        # scores: contract head_dim (sublane axis of both operands) -> (N, N)
        s = jax.lax.dot_general(q, k, (((0,), (0,)), ((), ())),
                                preferred_element_type=jnp.float32)
        s = s - jnp.max(s, axis=-1, keepdims=True)
        p = jnp.exp(s)
        p = p * pl.reciprocal(jnp.sum(p, axis=-1, keepdims=True), approx=True)
        # o^T: contract the key axis of v^T (hd, N) and p (N, N) -> (hd, N)
        o_t = jax.lax.dot_general(v, p.astype(jnp.bfloat16), (((1,), (1,)), ((), ())),
                                  preferred_element_type=jnp.float32)
        # fold this head's slice of the output projection: (C, hd) @ (hd, N)
        acc_sc[...] += jnp.dot(wp_h_ref[h], o_t.astype(jnp.bfloat16),
                               preferred_element_type=jnp.float32)
        return carry

    jax.lax.fori_loop(0, num_heads, head_body, 0, unroll=True)

    # channels-first store: (C, N) -> NCHW is a free reshape in the wrapper.
    o_ref[...] = acc_sc[...].astype(o_ref.dtype)


def pack_params(p, num_heads):
    """One-time weight packing (hoisted out of the jitted forward)."""
    qkv_w, proj_w = p["qkv_w"], p["proj_w"]                      # (3C, C), (C, C) torch layout
    C = proj_w.shape[0]
    hd = C // num_heads
    scale = hd ** (-0.5)
    wqkv = qkv_w.at[:C, :].multiply(scale).astype(jnp.bfloat16)   # scale folded into q rows
    wp_heads = proj_w.reshape(C, num_heads, hd).transpose(1, 0, 2).astype(jnp.bfloat16)
    wp_full = proj_w.astype(jnp.bfloat16)
    # effective bias: proj_b + Wp @ lepe_conv_bias   (conv bias folded through proj)
    b_eff = (p["proj_b"].reshape(C, 1)
             + proj_w.astype(jnp.float32) @ p["lepe_b"].reshape(C, 1)).astype(jnp.float32)
    return dict(wqkv=wqkv, lepe_w=p["lepe_w"].astype(jnp.float32),
                wp_heads=wp_heads, wp_full=wp_full, b_eff=b_eff)


@jax.jit
def attention_lepe(x_nchw, wqkv, lepe_w, wp_heads, wp_full, b_eff):
    B, C, H, W = x_nchw.shape
    N = H * W
    num_heads, _, hd = wp_heads.shape
    KK = lepe_w.shape[1]
    K = int(round(KK ** 0.5))
    pad = K // 2

    x_cn = x_nchw.reshape(B, C, N)                               # free NCHW -> (B, C, N)

    kernel = functools.partial(attn_lepe_kernel, H=H, W=W, K=K,
                               num_heads=num_heads, head_dim=hd)

    out = pl.pallas_call(
        kernel,
        out_shape=jax.ShapeDtypeStruct((B, C, N), x_nchw.dtype),
        grid_spec=pltpu.PrefetchScalarGridSpec(
            num_scalar_prefetch=0,
            grid=(B,),
            in_specs=[
                pl.BlockSpec((None, C, N), lambda b: (b, 0, 0)),        # x (C, N)
                pl.BlockSpec((3 * C, C), lambda b: (0, 0)),             # fused qkv weight
                pl.BlockSpec((C, KK), lambda b: (0, 0)),                # lepe taps (C, K*K)
                pl.BlockSpec((num_heads, C, hd), lambda b: (0, 0, 0)),  # proj, per-head slices
                pl.BlockSpec((C, C), lambda b: (0, 0)),                 # proj, full (for LePE)
                pl.BlockSpec((C, 1), lambda b: (0, 0)),                 # effective bias
                # NOTE: on v7x, give the constant weight inputs pipeline_mode=pl.Buffered(1)
                # to free VMEM for bigger attention blocks in the flash-tiled version.
            ],
            out_specs=pl.BlockSpec((None, C, N), lambda b: (b, 0, 0)),
            scratch_shapes=[
                pltpu.VMEM((3 * C, N), jnp.float32),                    # qkv (channels-first)
                pltpu.VMEM((C, N), jnp.float32),                        # output accumulator
                pltpu.VMEM((C, N + 2 * pad * (W + 1)), jnp.float32),    # zero-padded x (LePE)
            ],
        ),
        compiler_params=pltpu.CompilerParams(
            dimension_semantics=("parallel",),
            vmem_limit_bytes=32 * 1024 * 1024,
        ),
    )(x_cn, wqkv, lepe_w, wp_heads, wp_full, b_eff)

    return out.reshape(B, C, H, W)                               # free reshape, no HBM pass


def make_params(key, C, K):
    """PyTorch-layout parameters: qkv (3C,C), proj (C,C)+(C,), lepe dwconv (C,K*K)+(C,)."""
    k1, k2, k3, k4, k5 = jax.random.split(key, 5)
    return dict(
        qkv_w=jax.random.normal(k1, (3 * C, C), jnp.float32) * 0.05,
        proj_w=jax.random.normal(k2, (C, C), jnp.float32) * 0.05,
        proj_b=jax.random.normal(k3, (C,), jnp.float32) * 0.05,
        lepe_w=jax.random.normal(k4, (C, K * K), jnp.float32) * 0.05,  # Conv2d(C,1,K,K) flat
        lepe_b=jax.random.normal(k5, (C,), jnp.float32) * 0.05,
    )


def reference(x_nchw, p, num_heads, K):
    """Pure-JAX f32 reference matching the PyTorch forward."""
    B, C, H, W = x_nchw.shape
    N = H * W
    hd = C // num_heads
    scale = hd ** (-0.5)
    x = jnp.transpose(x_nchw, (0, 2, 3, 1)).reshape(B, N, C)
    qkv = x @ p["qkv_w"].T
    qkv = qkv.reshape(B, N, 3, num_heads, hd).transpose(2, 0, 3, 1, 4)
    q, k, v = qkv[0], qkv[1], qkv[2]
    attn = jnp.einsum("bhnd,bhmd->bhnm", q, k) * scale
    attn = jax.nn.softmax(attn, axis=-1)
    o = jnp.einsum("bhnm,bhmd->bhnd", attn, v).transpose(0, 2, 1, 3).reshape(B, N, C)
    pad = K // 2
    xp = jnp.pad(x.reshape(B, H, W, C), ((0, 0), (pad, pad), (pad, pad), (0, 0)))
    lepe = jnp.zeros((B, H, W, C), jnp.float32)
    for kh in range(K):
        for kw in range(K):
            lepe = lepe + xp[:, kh:kh + H, kw:kw + W, :] * p["lepe_w"][:, kh * K + kw][None, None, None, :]
    lepe = (lepe + p["lepe_b"][None, None, None, :]).reshape(B, N, C)
    out = (o + lepe) @ p["proj_w"].T + p["proj_b"]
    return out.reshape(B, H, W, C).transpose(0, 3, 1, 2)


if __name__ == "__main__":
    B, C, H, W = 2, 32, 8, 8          # dim=32, 8x8 spatial -> N=64 tokens
    num_heads, side_dwconv = 4, 5

    key = jax.random.PRNGKey(0)
    kx, kp = jax.random.split(key)
    x = jax.random.normal(kx, (B, C, H, W), jnp.float32)
    params = make_params(kp, C, side_dwconv)
    packed = pack_params(params, num_heads)   # one-time preprocessing (outside the forward)

    out = attention_lepe(x, packed["wqkv"], packed["lepe_w"], packed["wp_heads"],
                         packed["wp_full"], packed["b_eff"])
    jax.block_until_ready(out)

    ref = reference(x, params, num_heads, side_dwconv)
    assert out.shape == (B, C, H, W)
    # bf16 MXU operands + approx reciprocal -> loosen tolerance vs f32 reference.
    # (use exact reciprocal + f32 p@v if tighter parity with the PyTorch eval path is needed)
    np.testing.assert_allclose(np.asarray(out), np.asarray(ref), rtol=2e-2, atol=5e-3)
    print("KERNEL_OK")
</pallas_src>

<mosaic_0001>
module attributes {stable_mosaic.version = 11 : i64} {
  func.func @attn_lepe_kernel(%arg0: i32, %arg1: memref<1x32x64xf32, #tpu.memory_space<vmem>>, %arg2: memref<96x32xbf16, #tpu.memory_space<vmem>>, %arg3: memref<32x25xf32, #tpu.memory_space<vmem>>, %arg4: memref<4x32x8xbf16, #tpu.memory_space<vmem>>, %arg5: memref<32x32xbf16, #tpu.memory_space<vmem>>, %arg6: memref<32x1xf32, #tpu.memory_space<vmem>>, %arg7: memref<1x32x64xf32, #tpu.memory_space<vmem>>, %arg8: memref<96x64xf32, #tpu.memory_space<vmem>>, %arg9: memref<32x64xf32, #tpu.memory_space<vmem>>, %arg10: memref<32x100xf32, #tpu.memory_space<vmem>>) attributes {dimension_semantics = [#tpu.dimension_semantics<parallel>], iteration_bounds = array<i64: 2>, scalar_prefetch = 0 : i64, scratch_operands = 3 : i64, tpu.core_type = #tpu.core_type<tc>, window_params = [{transform_indices = @transform_0, window_bounds = array<i64: 1, 32, 64>}, {pipeline_mode = #tpu.pipeline_mode<synchronous>, transform_indices = @transform_1, window_bounds = array<i64: 96, 32>}, {pipeline_mode = #tpu.pipeline_mode<synchronous>, transform_indices = @transform_2, window_bounds = array<i64: 32, 25>}, {pipeline_mode = #tpu.pipeline_mode<synchronous>, transform_indices = @transform_3, window_bounds = array<i64: 4, 32, 8>}, {pipeline_mode = #tpu.pipeline_mode<synchronous>, transform_indices = @transform_4, window_bounds = array<i64: 32, 32>}, {pipeline_mode = #tpu.pipeline_mode<synchronous>, transform_indices = @transform_5, window_bounds = array<i64: 32, 1>}, {transform_indices = @transform_6, window_bounds = array<i64: 1, 32, 64>}]} {
    %c0 = arith.constant 0 : index
    %c0_0 = arith.constant 0 : index
    %c0_1 = arith.constant 0 : index
    %0 = vector.load %arg1[%c0, %c0_0, %c0_1] : memref<1x32x64xf32, #tpu.memory_space<vmem>>, vector<1x32x64xf32>
    %1 = vector.shape_cast %0 : vector<1x32x64xf32> to vector<32x64xf32>
    %2 = arith.truncf %1 : vector<32x64xf32> to vector<32x64xbf16>
    %c0_2 = arith.constant 0 : index
    %c0_3 = arith.constant 0 : index
    %3 = vector.load %arg2[%c0_2, %c0_3] : memref<96x32xbf16, #tpu.memory_space<vmem>>, vector<96x32xbf16>
    %cst = arith.constant dense<0.000000e+00> : vector<96x64xf32>
    %4 = tpu.matmul %3, %2, %cst {dimension_numbers = #tpu.dot_dimension_numbers<[1], [0], [0], [1], [0, 0, 1, 1], [], []>} : vector<96x32xbf16>, vector<32x64xbf16>, vector<96x64xf32> -> vector<96x64xf32>
    %c0_4 = arith.constant 0 : index
    %c0_5 = arith.constant 0 : index
    %5 = vector.load %arg8[%c0_4, %c0_5] : memref<96x64xf32, #tpu.memory_space<vmem>>, vector<96x64xf32>
    tpu.vector_store %arg8[%c0_4, %c0_5], %4 {strides = array<i32>} : memref<96x64xf32, #tpu.memory_space<vmem>>, vector<96x64xf32>,
    %cst_6 = arith.constant 0.000000e+00 : f32
    %6 = vector.broadcast %cst_6 : f32 to vector<32x100xf32>
    %c0_7 = arith.constant 0 : index
    %c0_8 = arith.constant 0 : index
    %7 = vector.load %arg10[%c0_7, %c0_8] : memref<32x100xf32, #tpu.memory_space<vmem>>, vector<32x100xf32>
    tpu.vector_store %arg10[%c0_7, %c0_8], %6 {strides = array<i32>} : memref<32x100xf32, #tpu.memory_space<vmem>>, vector<32x100xf32>,
    %c0_9 = arith.constant 0 : index
    %c18 = arith.constant 18 : index
    %8 = vector.load %arg10[%c0_9, %c18] : memref<32x100xf32, #tpu.memory_space<vmem>>, vector<32x64xf32>
    tpu.vector_store %arg10[%c0_9, %c18], %1 {strides = array<i32>} : memref<32x100xf32, #tpu.memory_space<vmem>>, vector<32x64xf32>,
    %9 = tpu.iota {dimensions = array<i32: 1>} : vector<1x64xi32>
    %c8_i32 = arith.constant 8 : i32
    %c0_i32 = arith.constant 0 : i32
    %10 = arith.cmpi eq, %c8_i32, %c0_i32 : i32
    %c1_i32 = arith.constant 1 : i32
    %11 = arith.select %10, %c1_i32, %c8_i32 : i32
    %12 = vector.broadcast %11 : i32 to vector<1x64xi32>
    %13 = arith.remsi %9, %12 : vector<1x64xi32>
    %c0_i32_10 = arith.constant 0 : i32
    %14 = vector.broadcast %c0_i32_10 : i32 to vector<1x64xi32>
    %15 = arith.cmpi ne, %13, %14 : vector<1x64xi32>
    %c0_i32_11 = arith.constant 0 : i32
    %16 = vector.broadcast %c0_i32_11 : i32 to vector<1x64xi32>
    %17 = arith.cmpi slt, %13, %16 : vector<1x64xi32>
    %c0_i32_12 = arith.constant 0 : i32
    %18 = arith.cmpi slt, %11, %c0_i32_12 : i32
    %19 = vector.broadcast %18 : i1 to vector<1x64xi1>
    %20 = vector.broadcast %19 : vector<1x64xi1> to vector<1x64xi1>
    %21 = arith.xori %17, %20 : vector<1x64xi1>
    %22 = arith.andi %21, %15 : vector<1x64xi1>
    %23 = vector.broadcast %11 : i32 to vector<1x64xi32>
    %24 = arith.addi %13, %23 : vector<1x64xi32>
    %25 = arith.select %22, %24, %13 : vector<1x64xi1>, vector<1x64xi32>
    %cst_13 = arith.constant 0.000000e+00 : f32
    %26 = vector.broadcast %cst_13 : f32 to vector<32x64xf32>
    %c0_14 = arith.constant 0 : index
    %c0_15 = arith.constant 0 : index
    %27 = vector.load %arg10[%c0_14, %c0_15] : memref<32x100xf32, #tpu.memory_space<vmem>>, vector<32x64xf32>
    %c-2_i32 = arith.constant -2 : i32
    %28 = vector.broadcast %c-2_i32 : i32 to vector<1x64xi32>
    %29 = arith.addi %25, %28 : vector<1x64xi32>
    %c0_i32_16 = arith.constant 0 : i32
    %30 = vector.broadcast %c0_i32_16 : i32 to vector<1x64xi32>
    %31 = arith.cmpi sge, %29, %30 : vector<1x64xi32>
    %c-2_i32_17 = arith.constant -2 : i32
    %32 = vector.broadcast %c-2_i32_17 : i32 to vector<1x64xi32>
    %33 = arith.addi %25, %32 : vector<1x64xi32>
    %c8_i32_18 = arith.constant 8 : i32
    %34 = vector.broadcast %c8_i32_18 : i32 to vector<1x64xi32>
    %35 = arith.cmpi slt, %33, %34 : vector<1x64xi32>
    %36 = arith.andi %31, %35 : vector<1x64xi1>
    %cst_19 = arith.constant 0.000000e+00 : f32
    %37 = vector.shape_cast %36 : vector<1x64xi1> to vector<1x64xi1>
    %38 = vector.broadcast %37 : vector<1x64xi1> to vector<32x64xi1>
    %39 = vector.broadcast %cst_19 : f32 to vector<32x64xf32>
    %40 = arith.select %38, %27, %39 : vector<32x64xi1>, vector<32x64xf32>
    %c0_20 = arith.constant 0 : index
    %c0_21 = arith.constant 0 : index
    %41 = vector.load %arg3[%c0_20, %c0_21] : memref<32x25xf32, #tpu.memory_space<vmem>>, vector<32x1xf32>
    %42 = vector.broadcast %41 : vector<32x1xf32> to vector<32x64xf32>
    %43 = arith.mulf %40, %42 : vector<32x64xf32>
    %44 = arith.addf %26, %43 : vector<32x64xf32>
    %c0_22 = arith.constant 0 : index
    %c1 = arith.constant 1 : index
    %45 = vector.load %arg10[%c0_22, %c1] : memref<32x100xf32, #tpu.memory_space<vmem>>, vector<32x64xf32>
    %c-1_i32 = arith.constant -1 : i32
    %46 = vector.broadcast %c-1_i32 : i32 to vector<1x64xi32>
    %47 = arith.addi %25, %46 : vector<1x64xi32>
    %c0_i32_23 = arith.constant 0 : i32
    %48 = vector.broadcast %c0_i32_23 : i32 to vector<1x64xi32>
    %49 = arith.cmpi sge, %47, %48 : vector<1x64xi32>
    %c-1_i32_24 = arith.constant -1 : i32
    %50 = vector.broadcast %c-1_i32_24 : i32 to vector<1x64xi32>
    %51 = arith.addi %25, %50 : vector<1x64xi32>
    %c8_i32_25 = arith.constant 8 : i32
    %52 = vector.broadcast %c8_i32_25 : i32 to vector<1x64xi32>
    %53 = arith.cmpi slt, %51, %52 : vector<1x64xi32>
    %54 = arith.andi %49, %53 : vector<1x64xi1>
    %cst_26 = arith.constant 0.000000e+00 : f32
    %55 = vector.shape_cast %54 : vector<1x64xi1> to vector<1x64xi1>
    %56 = vector.broadcast %55 : vector<1x64xi1> to vector<32x64xi1>
    %57 = vector.broadcast %cst_26 : f32 to vector<32x64xf32>
    %58 = arith.select %56, %45, %57 : vector<32x64xi1>, vector<32x64xf32>
    %c0_27 = arith.constant 0 : index
    %c1_28 = arith.constant 1 : index
    %59 = vector.load %arg3[%c0_27, %c1_28] : memref<32x25xf32, #tpu.memory_space<vmem>>, vector<32x1xf32>
    %60 = vector.broadcast %59 : vector<32x1xf32> to vector<32x64xf32>
    %61 = arith.mulf %58, %60 : vector<32x64xf32>
    %62 = arith.addf %44, %61 : vector<32x64xf32>
    %c0_29 = arith.constant 0 : index
    %c2 = arith.constant 2 : index
    %63 = vector.load %arg10[%c0_29, %c2] : memref<32x100xf32, #tpu.memory_space<vmem>>, vector<32x64xf32>
    %c0_30 = arith.constant 0 : index
    %c2_31 = arith.constant 2 : index
    %64 = vector.load %arg3[%c0_30, %c2_31] : memref<32x25xf32, #tpu.memory_space<vmem>>, vector<32x1xf32>
    %65 = vector.broadcast %64 : vector<32x1xf32> to vector<32x64xf32>
    %66 = arith.mulf %63, %65 : vector<32x64xf32>
    %67 = arith.addf %62, %66 : vector<32x64xf32>
    %c0_32 = arith.constant 0 : index
    %c3 = arith.constant 3 : index
    %68 = vector.load %arg10[%c0_32, %c3] : memref<32x100xf32, #tpu.memory_space<vmem>>, vector<32x64xf32>
    %c1_i32_33 = arith.constant 1 : i32
    %69 = vector.broadcast %c1_i32_33 : i32 to vector<1x64xi32>
    %70 = arith.addi %25, %69 : vector<1x64xi32>
    %c0_i32_34 = arith.constant 0 : i32
    %71 = vector.broadcast %c0_i32_34 : i32 to vector<1x64xi32>
    %72 = arith.cmpi sge, %70, %71 : vector<1x64xi32>
    %c1_i32_35 = arith.constant 1 : i32
    %73 = vector.broadcast %c1_i32_35 : i32 to vector<1x64xi32>
    %74 = arith.addi %25, %73 : vector<1x64xi32>
    %c8_i32_36 = arith.constant 8 : i32
    %75 = vector.broadcast %c8_i32_36 : i32 to vector<1x64xi32>
    %76 = arith.cmpi slt, %74, %75 : vector<1x64xi32>
    %77 = arith.andi %72, %76 : vector<1x64xi1>
    %cst_37 = arith.constant 0.000000e+00 : f32
    %78 = vector.shape_cast %77 : vector<1x64xi1> to vector<1x64xi1>
    %79 = vector.broadcast %78 : vector<1x64xi1> to vector<32x64xi1>
    %80 = vector.broadcast %cst_37 : f32 to vector<32x64xf32>
    %81 = arith.select %79, %68, %80 : vector<32x64xi1>, vector<32x64xf32>
    %c0_38 = arith.constant 0 : index
    %c3_39 = arith.constant 3 : index
    %82 = vector.load %arg3[%c0_38, %c3_39] : memref<32x25xf32, #tpu.memory_space<vmem>>, vector<32x1xf32>
    %83 = vector.broadcast %82 : vector<32x1xf32> to vector<32x64xf32>
    %84 = arith.mulf %81, %83 : vector<32x64xf32>
    %85 = arith.addf %67, %84 : vector<32x64xf32>
    %c0_40 = arith.constant 0 : index
    %c4 = arith.constant 4 : index
    %86 = vector.load %arg10[%c0_40, %c4] : memref<32x100xf32, #tpu.memory_space<vmem>>, vector<32x64xf32>
    %c2_i32 = arith.constant 2 : i32
    %87 = vector.broadcast %c2_i32 : i32 to vector<1x64xi32>
    %88 = arith.addi %25, %87 : vector<1x64xi32>
    %c0_i32_41 = arith.constant 0 : i32
    %89 = vector.broadcast %c0_i32_41 : i32 to vector<1x64xi32>
    %90 = arith.cmpi sge, %88, %89 : vector<1x64xi32>
    %c2_i32_42 = arith.constant 2 : i32
    %91 = vector.broadcast %c2_i32_42 : i32 to vector<1x64xi32>
    %92 = arith.addi %25, %91 : vector<1x64xi32>
    %c8_i32_43 = arith.constant 8 : i32
    %93 = vector.broadcast %c8_i32_43 : i32 to vector<1x64xi32>
    %94 = arith.cmpi slt, %92, %93 : vector<1x64xi32>
    %95 = arith.andi %90, %94 : vector<1x64xi1>
    %cst_44 = arith.constant 0.000000e+00 : f32
    %96 = vector.shape_cast %95 : vector<1x64xi1> to vector<1x64xi1>
    %97 = vector.broadcast %96 : vector<1x64xi1> to vector<32x64xi1>
    %98 = vector.broadcast %cst_44 : f32 to vector<32x64xf32>
    %99 = arith.select %97, %86, %98 : vector<32x64xi1>, vector<32x64xf32>
    %c0_45 = arith.constant 0 : index
    %c4_46 = arith.constant 4 : index
    %100 = vector.load %arg3[%c0_45, %c4_46] : memref<32x25xf32, #tpu.memory_space<vmem>>, vector<32x1xf32>
    %101 = vector.broadcast %100 : vector<32x1xf32> to vector<32x64xf32>
    %102 = arith.mulf %99, %101 : vector<32x64xf32>
    %103 = arith.addf %85, %102 : vector<32x64xf32>
    %c0_47 = arith.constant 0 : index
    %c8 = arith.constant 8 : index
    %104 = vector.load %arg10[%c0_47, %c8] : memref<32x100xf32, #tpu.memory_space<vmem>>, vector<32x64xf32>
    %c-2_i32_48 = arith.constant -2 : i32
    %105 = vector.broadcast %c-2_i32_48 : i32 to vector<1x64xi32>
    %106 = arith.addi %25, %105 : vector<1x64xi32>
    %c0_i32_49 = arith.constant 0 : i32
    %107 = vector.broadcast %c0_i32_49 : i32 to vector<1x64xi32>
    %108 = arith.cmpi sge, %106, %107 : vector<1x64xi32>
    %c-2_i32_50 = arith.constant -2 : i32
    %109 = vector.broadcast %c-2_i32_50 : i32 to vector<1x64xi32>
    %110 = arith.addi %25, %109 : vector<1x64xi32>
    %c8_i32_51 = arith.constant 8 : i32
    %111 = vector.broadcast %c8_i32_51 : i32 to vector<1x64xi32>
    %112 = arith.cmpi slt, %110, %111 : vector<1x64xi32>
    %113 = arith.andi %108, %112 : vector<1x64xi1>
    %cst_52 = arith.constant 0.000000e+00 : f32
    %114 = vector.shape_cast %113 : vector<1x64xi1> to vector<1x64xi1>
    %115 = vector.broadcast %114 : vector<1x64xi1> to vector<32x64xi1>
    %116 = vector.broadcast %cst_52 : f32 to vector<32x64xf32>
    %117 = arith.select %115, %104, %116 : vector<32x64xi1>, vector<32x64xf32>
    %c0_53 = arith.constant 0 : index
    %c5 = arith.constant 5 : index
    %118 = vector.load %arg3[%c0_53, %c5] : memref<32x25xf32, #tpu.memory_space<vmem>>, vector<32x1xf32>
    %119 = vector.broadcast %118 : vector<32x1xf32> to vector<32x64xf32>
    %120 = arith.mulf %117, %119 : vector<32x64xf32>
    %121 = arith.addf %103, %120 : vector<32x64xf32>
    %c0_54 = arith.constant 0 : index
    %c9 = arith.constant 9 : index
    %122 = vector.load %arg10[%c0_54, %c9] : memref<32x100xf32, #tpu.memory_space<vmem>>, vector<32x64xf32>
    %c-1_i32_55 = arith.constant -1 : i32
    %123 = vector.broadcast %c-1_i32_55 : i32 to vector<1x64xi32>
    %124 = arith.addi %25, %123 : vector<1x64xi32>
    %c0_i32_56 = arith.constant 0 : i32
    %125 = vector.broadcast %c0_i32_56 : i32 to vector<1x64xi32>
    %126 = arith.cmpi sge, %124, %125 : vector<1x64xi32>
    %c-1_i32_57 = arith.constant -1 : i32
    %127 = vector.broadcast %c-1_i32_57 : i32 to vector<1x64xi32>
    %128 = arith.addi %25, %127 : vector<1x64xi32>
    %c8_i32_58 = arith.constant 8 : i32
    %129 = vector.broadcast %c8_i32_58 : i32 to vector<1x64xi32>
    %130 = arith.cmpi slt, %128, %129 : vector<1x64xi32>
    %131 = arith.andi %126, %130 : vector<1x64xi1>
    %cst_59 = arith.constant 0.000000e+00 : f32
    %132 = vector.shape_cast %131 : vector<1x64xi1> to vector<1x64xi1>
    %133 = vector.broadcast %132 : vector<1x64xi1> to vector<32x64xi1>
    %134 = vector.broadcast %cst_59 : f32 to vector<32x64xf32>
    %135 = arith.select %133, %122, %134 : vector<32x64xi1>, vector<32x64xf32>
    %c0_60 = arith.constant 0 : index
    %c6 = arith.constant 6 : index
    %136 = vector.load %arg3[%c0_60, %c6] : memref<32x25xf32, #tpu.memory_space<vmem>>, vector<32x1xf32>
    %137 = vector.broadcast %136 : vector<32x1xf32> to vector<32x64xf32>
    %138 = arith.mulf %135, %137 : vector<32x64xf32>
    %139 = arith.addf %121, %138 : vector<32x64xf32>
    %c0_61 = arith.constant 0 : index
    %c10 = arith.constant 10 : index
    %140 = vector.load %arg10[%c0_61, %c10] : memref<32x100xf32, #tpu.memory_space<vmem>>, vector<32x64xf32>
    %c0_62 = arith.constant 0 : index
    %c7 = arith.constant 7 : index
    %141 = vector.load %arg3[%c0_62, %c7] : memref<32x25xf32, #tpu.memory_space<vmem>>, vector<32x1xf32>
    %142 = vector.broadcast %141 : vector<32x1xf32> to vector<32x64xf32>
    %143 = arith.mulf %140, %142 : vector<32x64xf32>
    %144 = arith.addf %139, %143 : vector<32x64xf32>
    %c0_63 = arith.constant 0 : index
    %c11 = arith.constant 11 : index
    %145 = vector.load %arg10[%c0_63, %c11] : memref<32x100xf32, #tpu.memory_space<vmem>>, vector<32x64xf32>
    %c1_i32_64 = arith.constant 1 : i32
    %146 = vector.broadcast %c1_i32_64 : i32 to vector<1x64xi32>
    %147 = arith.addi %25, %146 : vector<1x64xi32>
    %c0_i32_65 = arith.constant 0 : i32
    %148 = vector.broadcast %c0_i32_65 : i32 to vector<1x64xi32>
    %149 = arith.cmpi sge, %147, %148 : vector<1x64xi32>
    %c1_i32_66 = arith.constant 1 : i32
    %150 = vector.broadcast %c1_i32_66 : i32 to vector<1x64xi32>
    %151 = arith.addi %25, %150 : vector<1x64xi32>
    %c8_i32_67 = arith.constant 8 : i32
    %152 = vector.broadcast %c8_i32_67 : i32 to vector<1x64xi32>
    %153 = arith.cmpi slt, %151, %152 : vector<1x64xi32>
    %154 = arith.andi %149, %153 : vector<1x64xi1>
    %cst_68 = arith.constant 0.000000e+00 : f32
    %155 = vector.shape_cast %154 : vector<1x64xi1> to vector<1x64xi1>
    %156 = vector.broadcast %155 : vector<1x64xi1> to vector<32x64xi1>
    %157 = vector.broadcast %cst_68 : f32 to vector<32x64xf32>
    %158 = arith.select %156, %145, %157 : vector<32x64xi1>, vector<32x64xf32>
    %c0_69 = arith.constant 0 : index
    %c8_70 = arith.constant 8 : index
    %159 = vector.load %arg3[%c0_69, %c8_70] : memref<32x25xf32, #tpu.memory_space<vmem>>, vector<32x1xf32>
    %160 = vector.broadcast %159 : vector<32x1xf32> to vector<32x64xf32>
    %161 = arith.mulf %158, %160 : vector<32x64xf32>
    %162 = arith.addf %144, %161 : vector<32x64xf32>
    %c0_71 = arith.constant 0 : index
    %c12 = arith.constant 12 : index
    %163 = vector.load %arg10[%c0_71, %c12] : memref<32x100xf32, #tpu.memory_space<vmem>>, vector<32x64xf32>
    %c2_i32_72 = arith.constant 2 : i32
    %164 = vector.broadcast %c2_i32_72 : i32 to vector<1x64xi32>
    %165 = arith.addi %25, %164 : vector<1x64xi32>
    %c0_i32_73 = arith.constant 0 : i32
    %166 = vector.broadcast %c0_i32_73 : i32 to vector<1x64xi32>
    %167 = arith.cmpi sge, %165, %166 : vector<1x64xi32>
    %c2_i32_74 = arith.constant 2 : i32
    %168 = vector.broadcast %c2_i32_74 : i32 to vector<1x64xi32>
    %169 = arith.addi %25, %168 : vector<1x64xi32>
    %c8_i32_75 = arith.constant 8 : i32
    %170 = vector.broadcast %c8_i32_75 : i32 to vector<1x64xi32>
    %171 = arith.cmpi slt, %169, %170 : vector<1x64xi32>
    %172 = arith.andi %167, %171 : vector<1x64xi1>
    %cst_76 = arith.constant 0.000000e+00 : f32
    %173 = vector.shape_cast %172 : vector<1x64xi1> to vector<1x64xi1>
    %174 = vector.broadcast %173 : vector<1x64xi1> to vector<32x64xi1>
    %175 = vector.broadcast %cst_76 : f32 to vector<32x64xf32>
    %176 = arith.select %174, %163, %175 : vector<32x64xi1>, vector<32x64xf32>
    %c0_77 = arith.constant 0 : index
    %c9_78 = arith.constant 9 : index
    %177 = vector.load %arg3[%c0_77, %c9_78] : memref<32x25xf32, #tpu.memory_space<vmem>>, vector<32x1xf32>
    %178 = vector.broadcast %177 : vector<32x1xf32> to vector<32x64xf32>
    %179 = arith.mulf %176, %178 : vector<32x64xf32>
    %180 = arith.addf %162, %179 : vector<32x64xf32>
    %c0_79 = arith.constant 0 : index
    %c16 = arith.constant 16 : index
    %181 = vector.load %arg10[%c0_79, %c16] : memref<32x100xf32, #tpu.memory_space<vmem>>, vector<32x64xf32>
    %c-2_i32_80 = arith.constant -2 : i32
    %182 = vector.broadcast %c-2_i32_80 : i32 to vector<1x64xi32>
    %183 = arith.addi %25, %182 : vector<1x64xi32>
    %c0_i32_81 = arith.constant 0 : i32
    %184 = vector.broadcast %c0_i32_81 : i32 to vector<1x64xi32>
    %185 = arith.cmpi sge, %183, %184 : vector<1x64xi32>
    %c-2_i32_82 = arith.constant -2 : i32
    %186 = vector.broadcast %c-2_i32_82 : i32 to vector<1x64xi32>
    %187 = arith.addi %25, %186 : vector<1x64xi32>
    %c8_i32_83 = arith.constant 8 : i32
    %188 = vector.broadcast %c8_i32_83 : i32 to vector<1x64xi32>
    %189 = arith.cmpi slt, %187, %188 : vector<1x64xi32>
    %190 = arith.andi %185, %189 : vector<1x64xi1>
    %cst_84 = arith.constant 0.000000e+00 : f32
    %191 = vector.shape_cast %190 : vector<1x64xi1> to vector<1x64xi1>
    %192 = vector.broadcast %191 : vector<1x64xi1> to vector<32x64xi1>
    %193 = vector.broadcast %cst_84 : f32 to vector<32x64xf32>
    %194 = arith.select %192, %181, %193 : vector<32x64xi1>, vector<32x64xf32>
    %c0_85 = arith.constant 0 : index
    %c10_86 = arith.constant 10 : index
    %195 = vector.load %arg3[%c0_85, %c10_86] : memref<32x25xf32, #tpu.memory_space<vmem>>, vector<32x1xf32>
    %196 = vector.broadcast %195 : vector<32x1xf32> to vector<32x64xf32>
    %197 = arith.mulf %194, %196 : vector<32x64xf32>
    %198 = arith.addf %180, %197 : vector<32x64xf32>
    %c0_87 = arith.constant 0 : index
    %c17 = arith.constant 17 : index
    %199 = vector.load %arg10[%c0_87, %c17] : memref<32x100xf32, #tpu.memory_space<vmem>>, vector<32x64xf32>
    %c-1_i32_88 = arith.constant -1 : i32
    %200 = vector.broadcast %c-1_i32_88 : i32 to vector<1x64xi32>
    %201 = arith.addi %25, %200 : vector<1x64xi32>
    %c0_i32_89 = arith.constant 0 : i32
    %202 = vector.broadcast %c0_i32_89 : i32 to vector<1x64xi32>
    %203 = arith.cmpi sge, %201, %202 : vector<1x64xi32>
    %c-1_i32_90 = arith.constant -1 : i32
    %204 = vector.broadcast %c-1_i32_90 : i32 to vector<1x64xi32>
    %205 = arith.addi %25, %204 : vector<1x64xi32>
    %c8_i32_91 = arith.constant 8 : i32
    %206 = vector.broadcast %c8_i32_91 : i32 to vector<1x64xi32>
    %207 = arith.cmpi slt, %205, %206 : vector<1x64xi32>
    %208 = arith.andi %203, %207 : vector<1x64xi1>
    %cst_92 = arith.constant 0.000000e+00 : f32
    %209 = vector.shape_cast %208 : vector<1x64xi1> to vector<1x64xi1>
    %210 = vector.broadcast %209 : vector<1x64xi1> to vector<32x64xi1>
    %211 = vector.broadcast %cst_92 : f32 to vector<32x64xf32>
    %212 = arith.select %210, %199, %211 : vector<32x64xi1>, vector<32x64xf32>
    %c0_93 = arith.constant 0 : index
    %c11_94 = arith.constant 11 : index
    %213 = vector.load %arg3[%c0_93, %c11_94] : memref<32x25xf32, #tpu.memory_space<vmem>>, vector<32x1xf32>
    %214 = vector.broadcast %213 : vector<32x1xf32> to vector<32x64xf32>
    %215 = arith.mulf %212, %214 : vector<32x64xf32>
    %216 = arith.addf %198, %215 : vector<32x64xf32>
    %c0_95 = arith.constant 0 : index
    %c18_96 = arith.constant 18 : index
    %217 = vector.load %arg10[%c0_95, %c18_96] : memref<32x100xf32, #tpu.memory_space<vmem>>, vector<32x64xf32>
    %c0_97 = arith.constant 0 : index
    %c12_98 = arith.constant 12 : index
    %218 = vector.load %arg3[%c0_97, %c12_98] : memref<32x25xf32, #tpu.memory_space<vmem>>, vector<32x1xf32>
    %219 = vector.broadcast %218 : vector<32x1xf32> to vector<32x64xf32>
    %220 = arith.mulf %217, %219 : vector<32x64xf32>
    %221 = arith.addf %216, %220 : vector<32x64xf32>
    %c0_99 = arith.constant 0 : index
    %c19 = arith.constant 19 : index
    %222 = vector.load %arg10[%c0_99, %c19] : memref<32x100xf32, #tpu.memory_space<vmem>>, vector<32x64xf32>
    %c1_i32_100 = arith.constant 1 : i32
    %223 = vector.broadcast %c1_i32_100 : i32 to vector<1x64xi32>
    %224 = arith.addi %25, %223 : vector<1x64xi32>
    %c0_i32_101 = arith.constant 0 : i32
    %225 = vector.broadcast %c0_i32_101 : i32 to vector<1x64xi32>
    %226 = arith.cmpi sge, %224, %225 : vector<1x64xi32>
    %c1_i32_102 = arith.constant 1 : i32
    %227 = vector.broadcast %c1_i32_102 : i32 to vector<1x64xi32>
    %228 = arith.addi %25, %227 : vector<1x64xi32>
    %c8_i32_103 = arith.constant 8 : i32
    %229 = vector.broadcast %c8_i32_103 : i32 to vector<1x64xi32>
    %230 = arith.cmpi slt, %228, %229 : vector<1x64xi32>
    %231 = arith.andi %226, %230 : vector<1x64xi1>
    %cst_104 = arith.constant 0.000000e+00 : f32
    %232 = vector.shape_cast %231 : vector<1x64xi1> to vector<1x64xi1>
    %233 = vector.broadcast %232 : vector<1x64xi1> to vector<32x64xi1>
    %234 = vector.broadcast %cst_104 : f32 to vector<32x64xf32>
    %235 = arith.select %233, %222, %234 : vector<32x64xi1>, vector<32x64xf32>
    %c0_105 = arith.constant 0 : index
    %c13 = arith.constant 13 : index
    %236 = vector.load %arg3[%c0_105, %c13] : memref<32x25xf32, #tpu.memory_space<vmem>>, vector<32x1xf32>
    %237 = vector.broadcast %236 : vector<32x1xf32> to vector<32x64xf32>
    %238 = arith.mulf %235, %237 : vector<32x64xf32>
    %239 = arith.addf %221, %238 : vector<32x64xf32>
    %c0_106 = arith.constant 0 : index
    %c20 = arith.constant 20 : index
    %240 = vector.load %arg10[%c0_106, %c20] : memref<32x100xf32, #tpu.memory_space<vmem>>, vector<32x64xf32>
    %c2_i32_107 = arith.constant 2 : i32
    %241 = vector.broadcast %c2_i32_107 : i32 to vector<1x64xi32>
    %242 = arith.addi %25, %241 : vector<1x64xi32>
    %c0_i32_108 = arith.constant 0 : i32
    %243 = vector.broadcast %c0_i32_108 : i32 to vector<1x64xi32>
    %244 = arith.cmpi sge, %242, %243 : vector<1x64xi32>
    %c2_i32_109 = arith.constant 2 : i32
    %245 = vector.broadcast %c2_i32_109 : i32 to vector<1x64xi32>
    %246 = arith.addi %25, %245 : vector<1x64xi32>
    %c8_i32_110 = arith.constant 8 : i32
    %247 = vector.broadcast %c8_i32_110 : i32 to vector<1x64xi32>
    %248 = arith.cmpi slt, %246, %247 : vector<1x64xi32>
    %249 = arith.andi %244, %248 : vector<1x64xi1>
    %cst_111 = arith.constant 0.000000e+00 : f32
    %250 = vector.shape_cast %249 : vector<1x64xi1> to vector<1x64xi1>
    %251 = vector.broadcast %250 : vector<1x64xi1> to vector<32x64xi1>
    %252 = vector.broadcast %cst_111 : f32 to vector<32x64xf32>
    %253 = arith.select %251, %240, %252 : vector<32x64xi1>, vector<32x64xf32>
    %c0_112 = arith.constant 0 : index
    %c14 = arith.constant 14 : index
    %254 = vector.load %arg3[%c0_112, %c14] : memref<32x25xf32, #tpu.memory_space<vmem>>, vector<32x1xf32>
    %255 = vector.broadcast %254 : vector<32x1xf32> to vector<32x64xf32>
    %256 = arith.mulf %253, %255 : vector<32x64xf32>
    %257 = arith.addf %239, %256 : vector<32x64xf32>
    %c0_113 = arith.constant 0 : index
    %c24 = arith.constant 24 : index
    %258 = vector.load %arg10[%c0_113, %c24] : memref<32x100xf32, #tpu.memory_space<vmem>>, vector<32x64xf32>
    %c-2_i32_114 = arith.constant -2 : i32
    %259 = vector.broadcast %c-2_i32_114 : i32 to vector<1x64xi32>
    %260 = arith.addi %25, %259 : vector<1x64xi32>
    %c0_i32_115 = arith.constant 0 : i32
    %261 = vector.broadcast %c0_i32_115 : i32 to vector<1x64xi32>
    %262 = arith.cmpi sge, %260, %261 : vector<1x64xi32>
    %c-2_i32_116 = arith.constant -2 : i32
    %263 = vector.broadcast %c-2_i32_116 : i32 to vector<1x64xi32>
    %264 = arith.addi %25, %263 : vector<1x64xi32>
    %c8_i32_117 = arith.constant 8 : i32
    %265 = vector.broadcast %c8_i32_117 : i32 to vector<1x64xi32>
    %266 = arith.cmpi slt, %264, %265 : vector<1x64xi32>
    %267 = arith.andi %262, %266 : vector<1x64xi1>
    %cst_118 = arith.constant 0.000000e+00 : f32
    %268 = vector.shape_cast %267 : vector<1x64xi1> to vector<1x64xi1>
    %269 = vector.broadcast %268 : vector<1x64xi1> to vector<32x64xi1>
    %270 = vector.broadcast %cst_118 : f32 to vector<32x64xf32>
    %271 = arith.select %269, %258, %270 : vector<32x64xi1>, vector<32x64xf32>
    %c0_119 = arith.constant 0 : index
    %c15 = arith.constant 15 : index
    %272 = vector.load %arg3[%c0_119, %c15] : memref<32x25xf32, #tpu.memory_space<vmem>>, vector<32x1xf32>
    %273 = vector.broadcast %272 : vector<32x1xf32> to vector<32x64xf32>
    %274 = arith.mulf %271, %273 : vector<32x64xf32>
    %275 = arith.addf %257, %274 : vector<32x64xf32>
    %c0_120 = arith.constant 0 : index
    %c25 = arith.constant 25 : index
    %276 = vector.load %arg10[%c0_120, %c25] : memref<32x100xf32, #tpu.memory_space<vmem>>, vector<32x64xf32>
    %c-1_i32_121 = arith.constant -1 : i32
    %277 = vector.broadcast %c-1_i32_121 : i32 to vector<1x64xi32>
    %278 = arith.addi %25, %277 : vector<1x64xi32>
    %c0_i32_122 = arith.constant 0 : i32
    %279 = vector.broadcast %c0_i32_122 : i32 to vector<1x64xi32>
    %280 = arith.cmpi sge, %278, %279 : vector<1x64xi32>
    %c-1_i32_123 = arith.constant -1 : i32
    %281 = vector.broadcast %c-1_i32_123 : i32 to vector<1x64xi32>
    %282 = arith.addi %25, %281 : vector<1x64xi32>
    %c8_i32_124 = arith.constant 8 : i32
    %283 = vector.broadcast %c8_i32_124 : i32 to vector<1x64xi32>
    %284 = arith.cmpi slt, %282, %283 : vector<1x64xi32>
    %285 = arith.andi %280, %284 : vector<1x64xi1>
    %cst_125 = arith.constant 0.000000e+00 : f32
    %286 = vector.shape_cast %285 : vector<1x64xi1> to vector<1x64xi1>
    %287 = vector.broadcast %286 : vector<1x64xi1> to vector<32x64xi1>
    %288 = vector.broadcast %cst_125 : f32 to vector<32x64xf32>
    %289 = arith.select %287, %276, %288 : vector<32x64xi1>, vector<32x64xf32>
    %c0_126 = arith.constant 0 : index
    %c16_127 = arith.constant 16 : index
    %290 = vector.load %arg3[%c0_126, %c16_127] : memref<32x25xf32, #tpu.memory_space<vmem>>, vector<32x1xf32>
    %291 = vector.broadcast %290 : vector<32x1xf32> to vector<32x64xf32>
    %292 = arith.mulf %289, %291 : vector<32x64xf32>
    %293 = arith.addf %275, %292 : vector<32x64xf32>
    %c0_128 = arith.constant 0 : index
    %c26 = arith.constant 26 : index
    %294 = vector.load %arg10[%c0_128, %c26] : memref<32x100xf32, #tpu.memory_space<vmem>>, vector<32x64xf32>
    %c0_129 = arith.constant 0 : index
    %c17_130 = arith.constant 17 : index
    %295 = vector.load %arg3[%c0_129, %c17_130] : memref<32x25xf32, #tpu.memory_space<vmem>>, vector<32x1xf32>
    %296 = vector.broadcast %295 : vector<32x1xf32> to vector<32x64xf32>
    %297 = arith.mulf %294, %296 : vector<32x64xf32>
    %298 = arith.addf %293, %297 : vector<32x64xf32>
    %c0_131 = arith.constant 0 : index
    %c27 = arith.constant 27 : index
    %299 = vector.load %arg10[%c0_131, %c27] : memref<32x100xf32, #tpu.memory_space<vmem>>, vector<32x64xf32>
    %c1_i32_132 = arith.constant 1 : i32
    %300 = vector.broadcast %c1_i32_132 : i32 to vector<1x64xi32>
    %301 = arith.addi %25, %300 : vector<1x64xi32>
    %c0_i32_133 = arith.constant 0 : i32
    %302 = vector.broadcast %c0_i32_133 : i32 to vector<1x64xi32>
    %303 = arith.cmpi sge, %301, %302 : vector<1x64xi32>
    %c1_i32_134 = arith.constant 1 : i32
    %304 = vector.broadcast %c1_i32_134 : i32 to vector<1x64xi32>
    %305 = arith.addi %25, %304 : vector<1x64xi32>
    %c8_i32_135 = arith.constant 8 : i32
    %306 = vector.broadcast %c8_i32_135 : i32 to vector<1x64xi32>
    %307 = arith.cmpi slt, %305, %306 : vector<1x64xi32>
    %308 = arith.andi %303, %307 : vector<1x64xi1>
    %cst_136 = arith.constant 0.000000e+00 : f32
    %309 = vector.shape_cast %308 : vector<1x64xi1> to vector<1x64xi1>
    %310 = vector.broadcast %309 : vector<1x64xi1> to vector<32x64xi1>
    %311 = vector.broadcast %cst_136 : f32 to vector<32x64xf32>
    %312 = arith.select %310, %299, %311 : vector<32x64xi1>, vector<32x64xf32>
    %c0_137 = arith.constant 0 : index
    %c18_138 = arith.constant 18 : index
    %313 = vector.load %arg3[%c0_137, %c18_138] : memref<32x25xf32, #tpu.memory_space<vmem>>, vector<32x1xf32>
    %314 = vector.broadcast %313 : vector<32x1xf32> to vector<32x64xf32>
    %315 = arith.mulf %312, %314 : vector<32x64xf32>
    %316 = arith.addf %298, %315 : vector<32x64xf32>
    %c0_139 = arith.constant 0 : index
    %c28 = arith.constant 28 : index
    %317 = vector.load %arg10[%c0_139, %c28] : memref<32x100xf32, #tpu.memory_space<vmem>>, vector<32x64xf32>
    %c2_i32_140 = arith.constant 2 : i32
    %318 = vector.broadcast %c2_i32_140 : i32 to vector<1x64xi32>
    %319 = arith.addi %25, %318 : vector<1x64xi32>
    %c0_i32_141 = arith.constant 0 : i32
    %320 = vector.broadcast %c0_i32_141 : i32 to vector<1x64xi32>
    %321 = arith.cmpi sge, %319, %320 : vector<1x64xi32>
    %c2_i32_142 = arith.constant 2 : i32
    %322 = vector.broadcast %c2_i32_142 : i32 to vector<1x64xi32>
    %323 = arith.addi %25, %322 : vector<1x64xi32>
    %c8_i32_143 = arith.constant 8 : i32
    %324 = vector.broadcast %c8_i32_143 : i32 to vector<1x64xi32>
    %325 = arith.cmpi slt, %323, %324 : vector<1x64xi32>
    %326 = arith.andi %321, %325 : vector<1x64xi1>
    %cst_144 = arith.constant 0.000000e+00 : f32
    %327 = vector.shape_cast %326 : vector<1x64xi1> to vector<1x64xi1>
    %328 = vector.broadcast %327 : vector<1x64xi1> to vector<32x64xi1>
    %329 = vector.broadcast %cst_144 : f32 to vector<32x64xf32>
    %330 = arith.select %328, %317, %329 : vector<32x64xi1>, vector<32x64xf32>
    %c0_145 = arith.constant 0 : index
    %c19_146 = arith.constant 19 : index
    %331 = vector.load %arg3[%c0_145, %c19_146] : memref<32x25xf32, #tpu.memory_space<vmem>>, vector<32x1xf32>
    %332 = vector.broadcast %331 : vector<32x1xf32> to vector<32x64xf32>
    %333 = arith.mulf %330, %332 : vector<32x64xf32>
    %334 = arith.addf %316, %333 : vector<32x64xf32>
    %c0_147 = arith.constant 0 : index
    %c32 = arith.constant 32 : index
    %335 = vector.load %arg10[%c0_147, %c32] : memref<32x100xf32, #tpu.memory_space<vmem>>, vector<32x64xf32>
    %c-2_i32_148 = arith.constant -2 : i32
    %336 = vector.broadcast %c-2_i32_148 : i32 to vector<1x64xi32>
    %337 = arith.addi %25, %336 : vector<1x64xi32>
    %c0_i32_149 = arith.constant 0 : i32
    %338 = vector.broadcast %c0_i32_149 : i32 to vector<1x64xi32>
    %339 = arith.cmpi sge, %337, %338 : vector<1x64xi32>
    %c-2_i32_150 = arith.constant -2 : i32
    %340 = vector.broadcast %c-2_i32_150 : i32 to vector<1x64xi32>
    %341 = arith.addi %25, %340 : vector<1x64xi32>
    %c8_i32_151 = arith.constant 8 : i32
    %342 = vector.broadcast %c8_i32_151 : i32 to vector<1x64xi32>
    %343 = arith.cmpi slt, %341, %342 : vector<1x64xi32>
    %344 = arith.andi %339, %343 : vector<1x64xi1>
    %cst_152 = arith.constant 0.000000e+00 : f32
    %345 = vector.shape_cast %344 : vector<1x64xi1> to vector<1x64xi1>
    %346 = vector.broadcast %345 : vector<1x64xi1> to vector<32x64xi1>
    %347 = vector.broadcast %cst_152 : f32 to vector<32x64xf32>
    %348 = arith.select %346, %335, %347 : vector<32x64xi1>, vector<32x64xf32>
    %c0_153 = arith.constant 0 : index
    %c20_154 = arith.constant 20 : index
    %349 = vector.load %arg3[%c0_153, %c20_154] : memref<32x25xf32, #tpu.memory_space<vmem>>, vector<32x1xf32>
    %350 = vector.broadcast %349 : vector<32x1xf32> to vector<32x64xf32>
    %351 = arith.mulf %348, %350 : vector<32x64xf32>
    %352 = arith.addf %334, %351 : vector<32x64xf32>
    %c0_155 = arith.constant 0 : index
    %c33 = arith.constant 33 : index
    %353 = vector.load %arg10[%c0_155, %c33] : memref<32x100xf32, #tpu.memory_space<vmem>>, vector<32x64xf32>
    %c-1_i32_156 = arith.constant -1 : i32
    %354 = vector.broadcast %c-1_i32_156 : i32 to vector<1x64xi32>
    %355 = arith.addi %25, %354 : vector<1x64xi32>
    %c0_i32_157 = arith.constant 0 : i32
    %356 = vector.broadcast %c0_i32_157 : i32 to vector<1x64xi32>
    %357 = arith.cmpi sge, %355, %356 : vector<1x64xi32>
    %c-1_i32_158 = arith.constant -1 : i32
    %358 = vector.broadcast %c-1_i32_158 : i32 to vector<1x64xi32>
    %359 = arith.addi %25, %358 : vector<1x64xi32>
    %c8_i32_159 = arith.constant 8 : i32
    %360 = vector.broadcast %c8_i32_159 : i32 to vector<1x64xi32>
    %361 = arith.cmpi slt, %359, %360 : vector<1x64xi32>
    %362 = arith.andi %357, %361 : vector<1x64xi1>
    %cst_160 = arith.constant 0.000000e+00 : f32
    %363 = vector.shape_cast %362 : vector<1x64xi1> to vector<1x64xi1>
    %364 = vector.broadcast %363 : vector<1x64xi1> to vector<32x64xi1>
    %365 = vector.broadcast %cst_160 : f32 to vector<32x64xf32>
    %366 = arith.select %364, %353, %365 : vector<32x64xi1>, vector<32x64xf32>
    %c0_161 = arith.constant 0 : index
    %c21 = arith.constant 21 : index
    %367 = vector.load %arg3[%c0_161, %c21] : memref<32x25xf32, #tpu.memory_space<vmem>>, vector<32x1xf32>
    %368 = vector.broadcast %367 : vector<32x1xf32> to vector<32x64xf32>
    %369 = arith.mulf %366, %368 : vector<32x64xf32>
    %370 = arith.addf %352, %369 : vector<32x64xf32>
    %c0_162 = arith.constant 0 : index
    %c34 = arith.constant 34 : index
    %371 = vector.load %arg10[%c0_162, %c34] : memref<32x100xf32, #tpu.memory_space<vmem>>, vector<32x64xf32>
    %c0_163 = arith.constant 0 : index
    %c22 = arith.constant 22 : index
    %372 = vector.load %arg3[%c0_163, %c22] : memref<32x25xf32, #tpu.memory_space<vmem>>, vector<32x1xf32>
    %373 = vector.broadcast %372 : vector<32x1xf32> to vector<32x64xf32>
    %374 = arith.mulf %371, %373 : vector<32x64xf32>
    %375 = arith.addf %370, %374 : vector<32x64xf32>
    %c0_164 = arith.constant 0 : index
    %c35 = arith.constant 35 : index
    %376 = vector.load %arg10[%c0_164, %c35] : memref<32x100xf32, #tpu.memory_space<vmem>>, vector<32x64xf32>
    %c1_i32_165 = arith.constant 1 : i32
    %377 = vector.broadcast %c1_i32_165 : i32 to vector<1x64xi32>
    %378 = arith.addi %25, %377 : vector<1x64xi32>
    %c0_i32_166 = arith.constant 0 : i32
    %379 = vector.broadcast %c0_i32_166 : i32 to vector<1x64xi32>
    %380 = arith.cmpi sge, %378, %379 : vector<1x64xi32>
    %c1_i32_167 = arith.constant 1 : i32
    %381 = vector.broadcast %c1_i32_167 : i32 to vector<1x64xi32>
    %382 = arith.addi %25, %381 : vector<1x64xi32>
    %c8_i32_168 = arith.constant 8 : i32
    %383 = vector.broadcast %c8_i32_168 : i32 to vector<1x64xi32>
    %384 = arith.cmpi slt, %382, %383 : vector<1x64xi32>
    %385 = arith.andi %380, %384 : vector<1x64xi1>
    %cst_169 = arith.constant 0.000000e+00 : f32
    %386 = vector.shape_cast %385 : vector<1x64xi1> to vector<1x64xi1>
    %387 = vector.broadcast %386 : vector<1x64xi1> to vector<32x64xi1>
    %388 = vector.broadcast %cst_169 : f32 to vector<32x64xf32>
    %389 = arith.select %387, %376, %388 : vector<32x64xi1>, vector<32x64xf32>
    %c0_170 = arith.constant 0 : index
    %c23 = arith.constant 23 : index
    %390 = vector.load %arg3[%c0_170, %c23] : memref<32x25xf32, #tpu.memory_space<vmem>>, vector<32x1xf32>
    %391 = vector.broadcast %390 : vector<32x1xf32> to vector<32x64xf32>
    %392 = arith.mulf %389, %391 : vector<32x64xf32>
    %393 = arith.addf %375, %392 : vector<32x64xf32>
    %c0_171 = arith.constant 0 : index
    %c36 = arith.constant 36 : index
    %394 = vector.load %arg10[%c0_171, %c36] : memref<32x100xf32, #tpu.memory_space<vmem>>, vector<32x64xf32>
    %c2_i32_172 = arith.constant 2 : i32
    %395 = vector.broadcast %c2_i32_172 : i32 to vector<1x64xi32>
    %396 = arith.addi %25, %395 : vector<1x64xi32>
    %c0_i32_173 = arith.constant 0 : i32
    %397 = vector.broadcast %c0_i32_173 : i32 to vector<1x64xi32>
    %398 = arith.cmpi sge, %396, %397 : vector<1x64xi32>
    %c2_i32_174 = arith.constant 2 : i32
    %399 = vector.broadcast %c2_i32_174 : i32 to vector<1x64xi32>
    %400 = arith.addi %25, %399 : vector<1x64xi32>
    %c8_i32_175 = arith.constant 8 : i32
    %401 = vector.broadcast %c8_i32_175 : i32 to vector<1x64xi32>
    %402 = arith.cmpi slt, %400, %401 : vector<1x64xi32>
    %403 = arith.andi %398, %402 : vector<1x64xi1>
    %cst_176 = arith.constant 0.000000e+00 : f32
    %404 = vector.shape_cast %403 : vector<1x64xi1> to vector<1x64xi1>
    %405 = vector.broadcast %404 : vector<1x64xi1> to vector<32x64xi1>
    %406 = vector.broadcast %cst_176 : f32 to vector<32x64xf32>
    %407 = arith.select %405, %394, %406 : vector<32x64xi1>, vector<32x64xf32>
    %c0_177 = arith.constant 0 : index
    %c24_178 = arith.constant 24 : index
    %408 = vector.load %arg3[%c0_177, %c24_178] : memref<32x25xf32, #tpu.memory_space<vmem>>, vector<32x1xf32>
    %409 = vector.broadcast %408 : vector<32x1xf32> to vector<32x64xf32>
    %410 = arith.mulf %407, %409 : vector<32x64xf32>
    %411 = arith.addf %393, %410 : vector<32x64xf32>
    %c0_179 = arith.constant 0 : index
    %c0_180 = arith.constant 0 : index
    %412 = vector.load %arg5[%c0_179, %c0_180] : memref<32x32xbf16, #tpu.memory_space<vmem>>, vector<32x32xbf16>
    %413 = arith.truncf %411 : vector<32x64xf32> to vector<32x64xbf16>
    %cst_181 = arith.constant dense<0.000000e+00> : vector<32x64xf32>
    %414 = tpu.matmul %412, %413, %cst_181 {dimension_numbers = #tpu.dot_dimension_numbers<[1], [0], [0], [1], [0, 0, 1, 1], [], []>} : vector<32x32xbf16>, vector<32x64xbf16>, vector<32x64xf32> -> vector<32x64xf32>
    %c0_182 = arith.constant 0 : index
    %c0_183 = arith.constant 0 : index
    %415 = vector.load %arg6[%c0_182, %c0_183] : memref<32x1xf32, #tpu.memory_space<vmem>>, vector<32x1xf32>
    %416 = vector.broadcast %415 : vector<32x1xf32> to vector<32x64xf32>
    %417 = arith.addf %414, %416 : vector<32x64xf32>
    %c0_184 = arith.constant 0 : index
    %c0_185 = arith.constant 0 : index
    %418 = vector.load %arg9[%c0_184, %c0_185] : memref<32x64xf32, #tpu.memory_space<vmem>>, vector<32x64xf32>
    tpu.vector_store %arg9[%c0_184, %c0_185], %417 {strides = array<i32>} : memref<32x64xf32, #tpu.memory_space<vmem>>, vector<32x64xf32>,
    %c0_i32_186 = arith.constant 0 : i32
    %c8_i32_187 = arith.constant 8 : i32
    %419 = arith.muli %c0_i32_186, %c8_i32_187 : i32
    %420 = tpu.assume_multiple %419, 8 : i32
    %421 = arith.index_cast %420 : i32 to index
    %c0_188 = arith.constant 0 : index
    %422 = vector.load %arg8[%421, %c0_188] : memref<96x64xf32, #tpu.memory_space<vmem>>, vector<8x64xf32>
    %423 = arith.truncf %422 : vector<8x64xf32> to vector<8x64xbf16>
    %c32_i32 = arith.constant 32 : i32
    %424 = arith.addi %c32_i32, %420 : i32
    %425 = arith.index_cast %424 : i32 to index
    %c0_189 = arith.constant 0 : index
    %426 = vector.load %arg8[%425, %c0_189] : memref<96x64xf32, #tpu.memory_space<vmem>>, vector<8x64xf32>
    %427 = arith.truncf %426 : vector<8x64xf32> to vector<8x64xbf16>
    %c64_i32 = arith.constant 64 : i32
    %428 = arith.addi %c64_i32, %420 : i32
    %429 = arith.index_cast %428 : i32 to index
    %c0_190 = arith.constant 0 : index
    %430 = vector.load %arg8[%429, %c0_190] : memref<96x64xf32, #tpu.memory_space<vmem>>, vector<8x64xf32>
    %431 = arith.truncf %430 : vector<8x64xf32> to vector<8x64xbf16>
    %cst_191 = arith.constant dense<0.000000e+00> : vector<64x64xf32>
    %432 = tpu.matmul %423, %427, %cst_191 {dimension_numbers = #tpu.dot_dimension_numbers<[0], [0], [1], [1], [0, 1, 1, 1], [], []>} : vector<8x64xbf16>, vector<8x64xbf16>, vector<64x64xf32> -> vector<64x64xf32>
    %cst_192 = arith.constant dense<0xFF800000> : vector<64xf32>
    %433 = vector.multi_reduction <maximumf>, %432, %cst_192 [1] : vector<64x64xf32> to vector<64xf32>
    %434 = vector.shape_cast %433 : vector<64xf32> to vector<64x1xf32>
    %435 = vector.broadcast %434 : vector<64x1xf32> to vector<64x64xf32>
    %436 = arith.subf %432, %435 : vector<64x64xf32>
    %437 = math.exp %436 : vector<64x64xf32>
    %cst_193 = arith.constant dense<0.000000e+00> : vector<64xf32>
    %438 = vector.multi_reduction <add>, %437, %cst_193 [1] : vector<64x64xf32> to vector<64xf32>
    %439 = vector.shape_cast %438 : vector<64xf32> to vector<64x1xf32>
    %440 = tpu.reciprocal %439 {approx = true} : vector<64x1xf32> -> vector<64x1xf32>
    %441 = vector.broadcast %440 : vector<64x1xf32> to vector<64x64xf32>
    %442 = arith.mulf %437, %441 : vector<64x64xf32>
    %443 = arith.truncf %442 : vector<64x64xf32> to vector<64x64xbf16>
    %cst_194 = arith.constant dense<0.000000e+00> : vector<8x64xf32>
    %444 = tpu.matmul %431, %443, %cst_194 {dimension_numbers = #tpu.dot_dimension_numbers<[1], [1], [0], [0], [0, 0, 1, 0], [], []>} : vector<8x64xbf16>, vector<64x64xbf16>, vector<8x64xf32> -> vector<8x64xf32>
    %c0_195 = arith.constant 0 : index
    %c0_196 = arith.constant 0 : index
    %445 = vector.load %arg9[%c0_195, %c0_196] : memref<32x64xf32, #tpu.memory_space<vmem>>, vector<32x64xf32>
    %446 = arith.index_cast %c0_i32_186 : i32 to index
    %c0_197 = arith.constant 0 : index
    %c0_198 = arith.constant 0 : index
    %447 = vector.load %arg4[%446, %c0_197, %c0_198] : memref<4x32x8xbf16, #tpu.memory_space<vmem>>, vector<1x32x8xbf16>
    %448 = vector.shape_cast %447 : vector<1x32x8xbf16> to vector<32x8xbf16>
    %449 = arith.truncf %444 : vector<8x64xf32> to vector<8x64xbf16>
    %cst_199 = arith.constant dense<0.000000e+00> : vector<32x64xf32>
    %450 = tpu.matmul %448, %449, %cst_199 {dimension_numbers = #tpu.dot_dimension_numbers<[1], [0], [0], [1], [0, 0, 1, 1], [], []>} : vector<32x8xbf16>, vector<8x64xbf16>, vector<32x64xf32> -> vector<32x64xf32>
    %451 = arith.addf %445, %450 : vector<32x64xf32>
    %c0_200 = arith.constant 0 : index
    %c0_201 = arith.constant 0 : index
    %452 = vector.load %arg9[%c0_200, %c0_201] : memref<32x64xf32, #tpu.memory_space<vmem>>, vector<32x64xf32>
    tpu.vector_store %arg9[%c0_200, %c0_201], %451 {strides = array<i32>} : memref<32x64xf32, #tpu.memory_space<vmem>>, vector<32x64xf32>,
    %c1_i32_202 = arith.constant 1 : i32
    %c8_i32_203 = arith.constant 8 : i32
    %453 = arith.muli %c1_i32_202, %c8_i32_203 : i32
    %454 = tpu.assume_multiple %453, 8 : i32
    %455 = arith.index_cast %454 : i32 to index
    %c0_204 = arith.constant 0 : index
    %456 = vector.load %arg8[%455, %c0_204] : memref<96x64xf32, #tpu.memory_space<vmem>>, vector<8x64xf32>
    %457 = arith.truncf %456 : vector<8x64xf32> to vector<8x64xbf16>
    %c32_i32_205 = arith.constant 32 : i32
    %458 = arith.addi %c32_i32_205, %454 : i32
    %459 = arith.index_cast %458 : i32 to index
    %c0_206 = arith.constant 0 : index
    %460 = vector.load %arg8[%459, %c0_206] : memref<96x64xf32, #tpu.memory_space<vmem>>, vector<8x64xf32>
    %461 = arith.truncf %460 : vector<8x64xf32> to vector<8x64xbf16>
    %c64_i32_207 = arith.constant 64 : i32
    %462 = arith.addi %c64_i32_207, %454 : i32
    %463 = arith.index_cast %462 : i32 to index
    %c0_208 = arith.constant 0 : index
    %464 = vector.load %arg8[%463, %c0_208] : memref<96x64xf32, #tpu.memory_space<vmem>>, vector<8x64xf32>
    %465 = arith.truncf %464 : vector<8x64xf32> to vector<8x64xbf16>
    %cst_209 = arith.constant dense<0.000000e+00> : vector<64x64xf32>
    %466 = tpu.matmul %457, %461, %cst_209 {dimension_numbers = #tpu.dot_dimension_numbers<[0], [0], [1], [1], [0, 1, 1, 1], [], []>} : vector<8x64xbf16>, vector<8x64xbf16>, vector<64x64xf32> -> vector<64x64xf32>
    %cst_210 = arith.constant dense<0xFF800000> : vector<64xf32>
    %467 = vector.multi_reduction <maximumf>, %466, %cst_210 [1] : vector<64x64xf32> to vector<64xf32>
    %468 = vector.shape_cast %467 : vector<64xf32> to vector<64x1xf32>
    %469 = vector.broadcast %468 : vector<64x1xf32> to vector<64x64xf32>
    %470 = arith.subf %466, %469 : vector<64x64xf32>
    %471 = math.exp %470 : vector<64x64xf32>
    %cst_211 = arith.constant dense<0.000000e+00> : vector<64xf32>
    %472 = vector.multi_reduction <add>, %471, %cst_211 [1] : vector<64x64xf32> to vector<64xf32>
    %473 = vector.shape_cast %472 : vector<64xf32> to vector<64x1xf32>
    %474 = tpu.reciprocal %473 {approx = true} : vector<64x1xf32> -> vector<64x1xf32>
    %475 = vector.broadcast %474 : vector<64x1xf32> to vector<64x64xf32>
    %476 = arith.mulf %471, %475 : vector<64x64xf32>
    %477 = arith.truncf %476 : vector<64x64xf32> to vector<64x64xbf16>
    %cst_212 = arith.constant dense<0.000000e+00> : vector<8x64xf32>
    %478 = tpu.matmul %465, %477, %cst_212 {dimension_numbers = #tpu.dot_dimension_numbers<[1], [1], [0], [0], [0, 0, 1, 0], [], []>} : vector<8x64xbf16>, vector<64x64xbf16>, vector<8x64xf32> -> vector<8x64xf32>
    %c0_213 = arith.constant 0 : index
    %c0_214 = arith.constant 0 : index
    %479 = vector.load %arg9[%c0_213, %c0_214] : memref<32x64xf32, #tpu.memory_space<vmem>>, vector<32x64xf32>
    %480 = arith.index_cast %c1_i32_202 : i32 to index
    %c0_215 = arith.constant 0 : index
    %c0_216 = arith.constant 0 : index
    %481 = vector.load %arg4[%480, %c0_215, %c0_216] : memref<4x32x8xbf16, #tpu.memory_space<vmem>>, vector<1x32x8xbf16>
    %482 = vector.shape_cast %481 : vector<1x32x8xbf16> to vector<32x8xbf16>
    %483 = arith.truncf %478 : vector<8x64xf32> to vector<8x64xbf16>
    %cst_217 = arith.constant dense<0.000000e+00> : vector<32x64xf32>
    %484 = tpu.matmul %482, %483, %cst_217 {dimension_numbers = #tpu.dot_dimension_numbers<[1], [0], [0], [1], [0, 0, 1, 1], [], []>} : vector<32x8xbf16>, vector<8x64xbf16>, vector<32x64xf32> -> vector<32x64xf32>
    %485 = arith.addf %479, %484 : vector<32x64xf32>
    %c0_218 = arith.constant 0 : index
    %c0_219 = arith.constant 0 : index
    %486 = vector.load %arg9[%c0_218, %c0_219] : memref<32x64xf32, #tpu.memory_space<vmem>>, vector<32x64xf32>
    tpu.vector_store %arg9[%c0_218, %c0_219], %485 {strides = array<i32>} : memref<32x64xf32, #tpu.memory_space<vmem>>, vector<32x64xf32>,
    %c2_i32_220 = arith.constant 2 : i32
    %c8_i32_221 = arith.constant 8 : i32
    %487 = arith.muli %c2_i32_220, %c8_i32_221 : i32
    %488 = tpu.assume_multiple %487, 8 : i32
    %489 = arith.index_cast %488 : i32 to index
    %c0_222 = arith.constant 0 : index
    %490 = vector.load %arg8[%489, %c0_222] : memref<96x64xf32, #tpu.memory_space<vmem>>, vector<8x64xf32>
    %491 = arith.truncf %490 : vector<8x64xf32> to vector<8x64xbf16>
    %c32_i32_223 = arith.constant 32 : i32
    %492 = arith.addi %c32_i32_223, %488 : i32
    %493 = arith.index_cast %492 : i32 to index
    %c0_224 = arith.constant 0 : index
    %494 = vector.load %arg8[%493, %c0_224] : memref<96x64xf32, #tpu.memory_space<vmem>>, vector<8x64xf32>
    %495 = arith.truncf %494 : vector<8x64xf32> to vector<8x64xbf16>
    %c64_i32_225 = arith.constant 64 : i32
    %496 = arith.addi %c64_i32_225, %488 : i32
    %497 = arith.index_cast %496 : i32 to index
    %c0_226 = arith.constant 0 : index
    %498 = vector.load %arg8[%497, %c0_226] : memref<96x64xf32, #tpu.memory_space<vmem>>, vector<8x64xf32>
    %499 = arith.truncf %498 : vector<8x64xf32> to vector<8x64xbf16>
    %cst_227 = arith.constant dense<0.000000e+00> : vector<64x64xf32>
    %500 = tpu.matmul %491, %495, %cst_227 {dimension_numbers = #tpu.dot_dimension_numbers<[0], [0], [1], [1], [0, 1, 1, 1], [], []>} : vector<8x64xbf16>, vector<8x64xbf16>, vector<64x64xf32> -> vector<64x64xf32>
    %cst_228 = arith.constant dense<0xFF800000> : vector<64xf32>
    %501 = vector.multi_reduction <maximumf>, %500, %cst_228 [1] : vector<64x64xf32> to vector<64xf32>
    %502 = vector.shape_cast %501 : vector<64xf32> to vector<64x1xf32>
    %503 = vector.broadcast %502 : vector<64x1xf32> to vector<64x64xf32>
    %504 = arith.subf %500, %503 : vector<64x64xf32>
    %505 = math.exp %504 : vector<64x64xf32>
    %cst_229 = arith.constant dense<0.000000e+00> : vector<64xf32>
    %506 = vector.multi_reduction <add>, %505, %cst_229 [1] : vector<64x64xf32> to vector<64xf32>
    %507 = vector.shape_cast %506 : vector<64xf32> to vector<64x1xf32>
    %508 = tpu.reciprocal %507 {approx = true} : vector<64x1xf32> -> vector<64x1xf32>
    %509 = vector.broadcast %508 : vector<64x1xf32> to vector<64x64xf32>
    %510 = arith.mulf %505, %509 : vector<64x64xf32>
    %511 = arith.truncf %510 : vector<64x64xf32> to vector<64x64xbf16>
    %cst_230 = arith.constant dense<0.000000e+00> : vector<8x64xf32>
    %512 = tpu.matmul %499, %511, %cst_230 {dimension_numbers = #tpu.dot_dimension_numbers<[1], [1], [0], [0], [0, 0, 1, 0], [], []>} : vector<8x64xbf16>, vector<64x64xbf16>, vector<8x64xf32> -> vector<8x64xf32>
    %c0_231 = arith.constant 0 : index
    %c0_232 = arith.constant 0 : index
    %513 = vector.load %arg9[%c0_231, %c0_232] : memref<32x64xf32, #tpu.memory_space<vmem>>, vector<32x64xf32>
    %514 = arith.index_cast %c2_i32_220 : i32 to index
    %c0_233 = arith.constant 0 : index
    %c0_234 = arith.constant 0 : index
    %515 = vector.load %arg4[%514, %c0_233, %c0_234] : memref<4x32x8xbf16, #tpu.memory_space<vmem>>, vector<1x32x8xbf16>
    %516 = vector.shape_cast %515 : vector<1x32x8xbf16> to vector<32x8xbf16>
    %517 = arith.truncf %512 : vector<8x64xf32> to vector<8x64xbf16>
    %cst_235 = arith.constant dense<0.000000e+00> : vector<32x64xf32>
    %518 = tpu.matmul %516, %517, %cst_235 {dimension_numbers = #tpu.dot_dimension_numbers<[1], [0], [0], [1], [0, 0, 1, 1], [], []>} : vector<32x8xbf16>, vector<8x64xbf16>, vector<32x64xf32> -> vector<32x64xf32>
    %519 = arith.addf %513, %518 : vector<32x64xf32>
    %c0_236 = arith.constant 0 : index
    %c0_237 = arith.constant 0 : index
    %520 = vector.load %arg9[%c0_236, %c0_237] : memref<32x64xf32, #tpu.memory_space<vmem>>, vector<32x64xf32>
    tpu.vector_store %arg9[%c0_236, %c0_237], %519 {strides = array<i32>} : memref<32x64xf32, #tpu.memory_space<vmem>>, vector<32x64xf32>,
    %c3_i32 = arith.constant 3 : i32
    %c8_i32_238 = arith.constant 8 : i32
    %521 = arith.muli %c3_i32, %c8_i32_238 : i32
    %522 = tpu.assume_multiple %521, 8 : i32
    %523 = arith.index_cast %522 : i32 to index
    %c0_239 = arith.constant 0 : index
    %524 = vector.load %arg8[%523, %c0_239] : memref<96x64xf32, #tpu.memory_space<vmem>>, vector<8x64xf32>
    %525 = arith.truncf %524 : vector<8x64xf32> to vector<8x64xbf16>
    %c32_i32_240 = arith.constant 32 : i32
    %526 = arith.addi %c32_i32_240, %522 : i32
    %527 = arith.index_cast %526 : i32 to index
    %c0_241 = arith.constant 0 : index
    %528 = vector.load %arg8[%527, %c0_241] : memref<96x64xf32, #tpu.memory_space<vmem>>, vector<8x64xf32>
    %529 = arith.truncf %528 : vector<8x64xf32> to vector<8x64xbf16>
    %c64_i32_242 = arith.constant 64 : i32
    %530 = arith.addi %c64_i32_242, %522 : i32
    %531 = arith.index_cast %530 : i32 to index
    %c0_243 = arith.constant 0 : index
    %532 = vector.load %arg8[%531, %c0_243] : memref<96x64xf32, #tpu.memory_space<vmem>>, vector<8x64xf32>
    %533 = arith.truncf %532 : vector<8x64xf32> to vector<8x64xbf16>
    %cst_244 = arith.constant dense<0.000000e+00> : vector<64x64xf32>
    %534 = tpu.matmul %525, %529, %cst_244 {dimension_numbers = #tpu.dot_dimension_numbers<[0], [0], [1], [1], [0, 1, 1, 1], [], []>} : vector<8x64xbf16>, vector<8x64xbf16>, vector<64x64xf32> -> vector<64x64xf32>
    %cst_245 = arith.constant dense<0xFF800000> : vector<64xf32>
    %535 = vector.multi_reduction <maximumf>, %534, %cst_245 [1] : vector<64x64xf32> to vector<64xf32>
    %536 = vector.shape_cast %535 : vector<64xf32> to vector<64x1xf32>
    %537 = vector.broadcast %536 : vector<64x1xf32> to vector<64x64xf32>
    %538 = arith.subf %534, %537 : vector<64x64xf32>
    %539 = math.exp %538 : vector<64x64xf32>
    %cst_246 = arith.constant dense<0.000000e+00> : vector<64xf32>
    %540 = vector.multi_reduction <add>, %539, %cst_246 [1] : vector<64x64xf32> to vector<64xf32>
    %541 = vector.shape_cast %540 : vector<64xf32> to vector<64x1xf32>
    %542 = tpu.reciprocal %541 {approx = true} : vector<64x1xf32> -> vector<64x1xf32>
    %543 = vector.broadcast %542 : vector<64x1xf32> to vector<64x64xf32>
    %544 = arith.mulf %539, %543 : vector<64x64xf32>
    %545 = arith.truncf %544 : vector<64x64xf32> to vector<64x64xbf16>
    %cst_247 = arith.constant dense<0.000000e+00> : vector<8x64xf32>
    %546 = tpu.matmul %533, %545, %cst_247 {dimension_numbers = #tpu.dot_dimension_numbers<[1], [1], [0], [0], [0, 0, 1, 0], [], []>} : vector<8x64xbf16>, vector<64x64xbf16>, vector<8x64xf32> -> vector<8x64xf32>
    %c0_248 = arith.constant 0 : index
    %c0_249 = arith.constant 0 : index
    %547 = vector.load %arg9[%c0_248, %c0_249] : memref<32x64xf32, #tpu.memory_space<vmem>>, vector<32x64xf32>
    %548 = arith.index_cast %c3_i32 : i32 to index
    %c0_250 = arith.constant 0 : index
    %c0_251 = arith.constant 0 : index
    %549 = vector.load %arg4[%548, %c0_250, %c0_251] : memref<4x32x8xbf16, #tpu.memory_space<vmem>>, vector<1x32x8xbf16>
    %550 = vector.shape_cast %549 : vector<1x32x8xbf16> to vector<32x8xbf16>
    %551 = arith.truncf %546 : vector<8x64xf32> to vector<8x64xbf16>
    %cst_252 = arith.constant dense<0.000000e+00> : vector<32x64xf32>
    %552 = tpu.matmul %550, %551, %cst_252 {dimension_numbers = #tpu.dot_dimension_numbers<[1], [0], [0], [1], [0, 0, 1, 1], [], []>} : vector<32x8xbf16>, vector<8x64xbf16>, vector<32x64xf32> -> vector<32x64xf32>
    %553 = arith.addf %547, %552 : vector<32x64xf32>
    %c0_253 = arith.constant 0 : index
    %c0_254 = arith.constant 0 : index
    %554 = vector.load %arg9[%c0_253, %c0_254] : memref<32x64xf32, #tpu.memory_space<vmem>>, vector<32x64xf32>
    tpu.vector_store %arg9[%c0_253, %c0_254], %553 {strides = array<i32>} : memref<32x64xf32, #tpu.memory_space<vmem>>, vector<32x64xf32>,
    %c4_i32 = arith.constant 4 : i32
    %c0_255 = arith.constant 0 : index
    %c0_256 = arith.constant 0 : index
    %555 = vector.load %arg9[%c0_255, %c0_256] : memref<32x64xf32, #tpu.memory_space<vmem>>, vector<32x64xf32>
    %c0_257 = arith.constant 0 : index
    %c0_258 = arith.constant 0 : index
    %c0_259 = arith.constant 0 : index
    %556 = vector.load %arg7[%c0_257, %c0_258, %c0_259] : memref<1x32x64xf32, #tpu.memory_space<vmem>>, vector<1x32x64xf32>
    %557 = vector.shape_cast %556 : vector<1x32x64xf32> to vector<32x64xf32>
    %558 = vector.shape_cast %555 : vector<32x64xf32> to vector<1x32x64xf32>
    tpu.vector_store %arg7[%c0_257, %c0_258, %c0_259], %558 {strides = array<i32>} : memref<1x32x64xf32, #tpu.memory_space<vmem>>, vector<1x32x64xf32>,
    return
  }
  func.func @transform_0(%arg0: i32) -> (i32, i32, i32) {
    %c0_i32 = arith.constant 0 : i32
    %c0_i32_0 = arith.constant 0 : i32
    %c0_i32_1 = arith.constant 0 : i32
    return %arg0, %c0_i32, %c0_i32_0 : i32, i32, i32
  }
  func.func @transform_1(%arg0: i32) -> (i32, i32) {
    %c0_i32 = arith.constant 0 : i32
    %c0_i32_0 = arith.constant 0 : i32
    %c0_i32_1 = arith.constant 0 : i32
    return %c0_i32, %c0_i32_0 : i32, i32
  }
  func.func @transform_2(%arg0: i32) -> (i32, i32) {
    %c0_i32 = arith.constant 0 : i32
    %c0_i32_0 = arith.constant 0 : i32
    %c0_i32_1 = arith.constant 0 : i32
    return %c0_i32, %c0_i32_0 : i32, i32
  }
  func.func @transform_3(%arg0: i32) -> (i32, i32, i32) {
    %c0_i32 = arith.constant 0 : i32
    %c0_i32_0 = arith.constant 0 : i32
    %c0_i32_1 = arith.constant 0 : i32
    %c0_i32_2 = arith.constant 0 : i32
    return %c0_i32, %c0_i32_0, %c0_i32_1 : i32, i32, i32
  }
  func.func @transform_4(%arg0: i32) -> (i32, i32) {
    %c0_i32 = arith.constant 0 : i32
    %c0_i32_0 = arith.constant 0 : i32
    %c0_i32_1 = arith.constant 0 : i32
    return %c0_i32, %c0_i32_0 : i32, i32
  }
  func.func @transform_5(%arg0: i32) -> (i32, i32) {
    %c0_i32 = arith.constant 0 : i32
    %c0_i32_0 = arith.constant 0 : i32
    %c0_i32_1 = arith.constant 0 : i32
    return %c0_i32, %c0_i32_0 : i32, i32
  }
  func.func @transform_6(%arg0: i32) -> (i32, i32, i32) {
    %c0_i32 = arith.constant 0 : i32
    %c0_i32_0 = arith.constant 0 : i32
    %c0_i32_1 = arith.constant 0 : i32
    return %arg0, %c0_i32, %c0_i32_0 : i32, i32, i32
  }
}

</mosaic_0001>

<bundles_post_ra>
// kernel: attention_lepe.1
= control target key start
LH: loop header
LB: loop body
LE: loop exit
PB: predicated region body
PF: predicated region fallthrough
CT: control target
= control target key end

     0   :  { %s3673_s21 = smov 0   ;;  %s5169_s0 = inlined_call_operand.vmem [shape: f32[2,32,64], index: 0, kind: input, shape index: {}]   ;;  %s5170_s1 = inlined_call_operand.vmem [shape: bf16[96,32], index: 1, kind: input, shape index: {}]   ;;  %s5171_s2 = inlined_call_operand.vmem [shape: f32[32,25], index: 2, kind: input, shape index: {}]   ;;  %s5172_s3 = inlined_call_operand.vmem [shape: bf16[4,32,8], index: 3, kind: input, shape index: {}]   ;;  %s5173_s4 = inlined_call_operand.vmem [shape: bf16[32,32], index: 4, kind: input, shape index: {}]   ;;  %s5174_s5 = inlined_call_operand.vmem [shape: f32[32,1], index: 5, kind: input, shape index: {}]   ;;  %s5175_s6 = inlined_call_operand.vmem [shape: f32[2,32,64], index: 6, kind: output, shape index: {}]  }
   0x1 LB: > { %s3012_s22 = sadd.s32 4294967295, %s3584_s21   ;;  %p3016_p0 = scmp.ge.s32.totalorder %s3584_s21, 1  ;;  %s3584_s21 = sphi %s3673_s21, %s16_s21  }
   0x2   : > { %p212_p1 = scmp.lt.s32.totalorder %s3584_s21, 3 }
   0x4   : > { %p213_p2 = pnand %p3016_p0, %p212_p1 }
   0x6   : > { %216 = sbr.rel (%p213_p2) target bundleno = 3259 (0xcbb), region = 44 }
   0xd   : > { %p242_p3 = scmp.lt.s32.totalorder %s3012_s22, 1  ;;  %v3586_v0 = vmov 2   ;;  %vm414_vm0 = vcmask 818176   ;;  %v5178_v1 = vmov 0.0   ;;  %s3588_s27 = smov 18   ;;  %v3703_v7 = vld [vmem:[%s5171_s2 + $0x8] sm:$0xff] }
   0xe   : > { %3358 = vset.pattern.permute.xlu1 %v3586_v0  ;;  %3357 = vset.pattern.permute.xlu0 %v3586_v0  ;;  %417 = vst.msk [vmem:[#allocation4 + $0x10] sm:$0xff] %vm414_vm0, %v5178_v1  ;;  %415 = vst.msk [vmem:[#allocation4] sm:$0xff] %vm414_vm0, %v5178_v1  ;;  %v3708_v8 = vld [vmem:[%s5171_s2] sm:$0xff]  ;;  %v3714_v9 = vld [vmem:[%s5171_s2 + $0x10] sm:$0xff]  ;;  %v3589_v11 = vmov 7   ;;  %v3590_v12 = vmov 12  }
   0xf   : > { %s5302_s22 = smov (!%p242_p3, %s3012_s22), 1  ;;  %416 = vst.msk [vmem:[#allocation4 + $0x8] sm:$0xff] %vm414_vm0, %v5178_v1  ;;  %418 = vst.msk [vmem:[#allocation4 + $0x18] sm:$0xff] %vm414_vm0, %v5178_v1  ;;  %v3719_v10 = vld [vmem:[%s5171_s2 + $0x18] sm:$0xff]  ;;  %v3591_v13 = vmov 17   ;;  %v3592_v14 = vmov 22  }
  0x10   : > { %s3087_s23 = sshll.u32 %s5302_s22, 5  ;;  %v5176_v15 = vmov 0   ;;  %v3594_v16 = vmov 1   ;;  %v3595_v17 = vmov 3   ;;  %v3596_v18 = vmov 4   ;;  %s3599_s12 = smov 127  }
  0x11   : > { %s246_s26 = scalar_lea.vmem %s5169_s0, %s3087_s23  ;;  %v3597_v19 = vmov 5   ;;  %v3598_v20 = vmov 6   ;;  %vm435_vm1 = vcmask 670864   ;;  %s3600_s13 = smov 125   ;;  %v3604_v38 = vmov 8   ;;  %v3429_v51 = vld [vmem:[%s5170_s1] sm:$0xff]  }
  0x12   : > { %v255_v2 = vld [vmem:[%s246_s26 + $0x10] sm:$0xff]  ;;  %v256_v3 = vld [vmem:[%s246_s26 + $0x18] sm:$0xff]  ;;  %v3693_v4 = vld [vmem:[%s246_s26] sm:$0xff]  ;;  %s3601_s14 = smov 124   ;;  %s3602_s15 = smov 120   ;;  %v3606_v47 = vmov 9  }
  0x13   : > { %427 = vrot.lane.b32.xlu1 %v255_v2, %s3588_s27  ;;  %v3695_v5 = vpack.c.bf16 %v256_v3, %v255_v2  ;;  %423 = vrot.lane.b32.xlu0 %v3693_v4, %s3588_s27  ;;  %v3698_v6 = vld [vmem:[%s246_s26 + $0x8] sm:$0xff]  ;;  %s3603_s16 = smov 126   ;;  %s3605_s17 = smov 119   ;;  %vm301_vm2 = vcmask 261120   ;;  %v3609_v58 = vmov 10   ;;  %v3610_v61 = vmov 11  }
  0x14   : > { %v257_v44 = vpack.c.bf16 %v3698_v6, %v3693_v4  ;;  %v3430_v52 = vld [vmem:[%s5170_s1 + $0x8] sm:$0xff]   ;;  %3157 = vmatprep.mubr.msk.bf16.mxu0 %vm301_vm2, %v3429_v51  ;;  %s3607_s25 = smov 117   ;;  %s3608_s26 = smov 116   ;;  %vm401_vm3 = vcmask 523264   ;;  %vm1620_vm8 = vcmask 1043456   ;;  %vm1607_vm9 = vcmask 64512  }
  0x15   : > { %s3612_s28 = smov 118   ;;  %s3614_s29 = smov 111   ;;  %vm3637_vm10 = vmmov 0  }
  0x16   : > { %3153 = vmatprep.subr.bf16.mxu0 %v257_v44  ;;  %s3616_s30 = smov 109   ;;  %s3617_s7 = smov 108  }
  0x17   : > { %429 = vrot.lane.b32.xlu1 %v256_v3, %s3588_s27  ;;  %425 = vrot.lane.b32.xlu0 %v3698_v6, %s3588_s27  ;;  %s3611_s27 = smov 112   ;;  %s3620_s8 = smov 104  }
  0x18   : > { %3154 = vmatpush3.bf16.msra.mxu0 %v257_v44  ;;  %s3621_s9 = smov 110   ;;  %s3630_s18 = smov 102  }
  0x19   : > { %3155 = vmatprep.subr.bf16.mxu0 %v3695_v5  ;;  %s3632_s19 = smov 95   ;;  %s3634_s20 = smov 93  }
  0x1a   : > { %s3635_s24 = smov 94  }
  0x1b   : > { %555 = vperm.xlu1 %3358, %v3703_v7   ;;  %551 = vperm.xlu0 %3357, %v3708_v8  }
  0x1c   : > { %3156 = vmatpush3.bf16.msra.mxu0 %v3695_v5 }
  0x1d   : > { %3187 = vmatprep.subr.bf16.mxu0 %v5178_v1 }
  0x1f   : > { %559 = vperm.xlu1 %3358, %v3714_v9   ;;  %563 = vperm.xlu0 %3357, %v3719_v10  }
  0x20   : > { %3158 = vmatmul.mubr.msk.bf16.vlgmr.msra.gmra.mrb[0].mxu0 %vm301_vm2, %v3430_v52 }
  0x23   : > { %3359 = vset.pattern.permute.xlu1 %v3589_v11  ;;  %3360 = vset.pattern.permute.xlu0 %v3589_v11  ;;  %v3613_v11 = vmov 13  }
  0x24   : > { %763 = vperm.xlu1 %3359, %v3708_v8   ;;  %767 = vperm.xlu0 %3360, %v3703_v7  }
  0x28   : > { %771 = vperm.xlu1 %3359, %v3714_v9   ;;  %3361 = vset.pattern.permute.xlu0 %v3590_v12 }
  0x29   : > { %963 = vperm.xlu0 %3361, %v3708_v8  }
  0x2c   : > { %775 = vperm.xlu1 %3359, %v3719_v10  }
  0x2d   : > { %975 = vperm.xlu0 %3361, %v3719_v10  }
  0x30   : > { %3362 = vset.pattern.permute.xlu1 %v3590_v12 }
  0x31   : > { %967 = vperm.xlu1 %3362, %v3703_v7   ;;  %3364 = vset.pattern.permute.xlu0 %v3591_v13 }
  0x32   : > { %1167 = vperm.xlu0 %3364, %v3703_v7  }
  0x35   : > { %971 = vperm.xlu1 %3362, %v3714_v9  }
  0x36   : > { %3365 = vset.pattern.permute.xlu0 %v3592_v14 }
  0x37   : > { %1363 = vperm.xlu0 %3365, %v3708_v8  }
  0x39   : > { %3363 = vset.pattern.permute.xlu1 %v3591_v13 }
  0x3a   : > { %1163 = vperm.xlu1 %3363, %v3708_v8  }
  0x3b   : > { %1375 = vperm.xlu0 %3365, %v3719_v10  }
  0x3e   : > { %1171 = vperm.xlu1 %3363, %v3714_v9  }
  0x3f   : > { %3368 = vset.pattern.permute.xlu0 %v5176_v15 }
  0x40   : > { %479 = vperm.xlu0 %3368, %v3703_v7  }
  0x42   : > { %1175 = vperm.xlu1 %3363, %v3719_v10  }
  0x44   : > { %484 = vperm.xlu0 %3368, %v3714_v9  }
  0x46   : > { %3366 = vset.pattern.permute.xlu1 %v3592_v14 }
  0x47   : > { %1367 = vperm.xlu1 %3366, %v3703_v7  }
  0x48   : > { %3371 = vset.pattern.permute.xlu0 %v3594_v16 }
  0x49   : > { %535 = vperm.xlu0 %3371, %v3714_v9  }
  0x4b   : > { %1371 = vperm.xlu1 %3366, %v3714_v9  }
  0x4d   : > { %3374 = vset.pattern.permute.xlu0 %v3595_v17 }
  0x4e   : > { %617 = vperm.xlu0 %3374, %v3703_v7  }
  0x4f   : > { %3367 = vset.pattern.permute.xlu1 %v5176_v15 }
  0x50   : > { %474 = vperm.xlu1 %3367, %v3708_v8  }
  0x52   : > { %625 = vperm.xlu0 %3374, %v3719_v10  }
  0x54   : > { %3369 = vset.pattern.permute.xlu1 %v3594_v16 }
  0x55   : > { %527 = vperm.xlu1 %3369, %v3708_v8  }
  0x56   : > { %3377 = vset.pattern.permute.xlu0 %v3596_v18 }
  0x57   : > { %659 = vperm.xlu0 %3377, %v3708_v8  }
  0x59   : > { %531 = vperm.xlu1 %3369, %v3703_v7  }
  0x5b   : > { %667 = vperm.xlu0 %3377, %v3714_v9  }
  0x5d   : > { %3370 = vset.pattern.permute.xlu1 %v5176_v15 }
  0x5e   : > { %489 = vperm.xlu1 %3370, %v3719_v10  }
  0x5f   : > { %3381 = vset.pattern.permute.xlu0 %v3597_v19 }
  0x60   : > { %707 = vperm.xlu0 %3381, %v3714_v9  }
  0x62   : > { %3372 = vset.pattern.permute.xlu1 %v3594_v16 }
  0x63   : > { %539 = vperm.xlu1 %3372, %v3719_v10  }
  0x64   : > { %3382 = vset.pattern.permute.xlu0 %v3598_v20 }
  0x67   : > { %3373 = vset.pattern.permute.xlu1 %v3595_v17 }
  0x68   : > { %613 = vperm.xlu1 %3373, %v3708_v8  }
  0x6c   : > { %3375 = vset.pattern.permute.xlu1 %v3596_v18 }
  0x6d   : > { %663 = vperm.xlu1 %3375, %v3703_v7  }
  0x71   : > { %3376 = vset.pattern.permute.xlu1 %v3595_v17 }
  0x72   : > { %621 = vperm.xlu1 %3376, %v3714_v9  }
  0x76   : > { %3378 = vset.pattern.permute.xlu1 %v3597_v19 }
  0x77   : > { %699 = vperm.xlu1 %3378, %v3708_v8  }
  0x7b   : > { %703 = vperm.xlu1 %3378, %v3703_v7  }
  0x7f   : > { %3379 = vset.pattern.permute.xlu1 %v3596_v18 }
  0x80   : > { %671 = vperm.xlu1 %3379, %v3719_v10  }
  0x84   : > { %3380 = vset.pattern.permute.xlu1 %v3598_v20 }
  0x85   : > { %739 = vperm.xlu1 %3380, %v3708_v8   ;;  %v428_v21 = vpop.permute.xlu1 %427  ;;  %v424_v22 = vpop.permute.xlu0 %423 }
  0x86   : > { %438 = vst.msk [vmem:[#allocation4 + $0x10] sm:$0xff] %vm435_vm1, %v428_v21  ;;  %436 = vst.msk [vmem:[#allocation4] sm:$0xff] %vm435_vm1, %v424_v22  ;;  %v5184_v22 = vmov 14  }
  0x89   : > { %v426_v23 = vpop.permute.xlu0 %425  ;;  %v430_v24 = vpop.permute.xlu1 %429  ;;  %3383 = vset.pattern.permute.xlu1 %v3597_v19 }
  0x8a   : > { %437 = vst.msk [vmem:[#allocation4 + $0x8] sm:$0xff] %vm435_vm1, %v426_v23  ;;  %439 = vst.msk [vmem:[#allocation4 + $0x18] sm:$0xff] %vm435_vm1, %v430_v24 }
  0x8d   : > { %v3764_v25 = vld [vmem:[#allocation4 + $0x10] sm:$0xff]  ;;  %v3766_v26 = vld [vmem:[#allocation4] sm:$0xff] }
  0x8e   : > { %514 = vrot.lane.b32.xlu0 %v3764_v25, %s3599_s12  ;;  %510 = vrot.lane.b32.xlu1 %v3766_v26, %s3599_s12 }
  0x91   : > { %v3770_v27 = vld [vmem:[#allocation4 + $0x8] sm:$0xff]  ;;  %v3775_v28 = vld [vmem:[#allocation4 + $0x18] sm:$0xff] }
  0x92   : > { %596 = vrot.lane.b32.xlu0 %v3766_v26, %s3600_s13  ;;  %512 = vrot.lane.b32.xlu1 %v3770_v27, %s3599_s12 }
  0x96   : > { %642 = vrot.lane.b32.xlu0 %v3766_v26, %s3601_s14  ;;  %516 = vrot.lane.b32.xlu1 %v3775_v28, %s3599_s12 }
  0x9a   : > { %v556_v29 = vpop.permute.xlu1 %555  ;;  %743 = vperm.xlu0 %3382, %v3703_v7   ;;  %598 = vrot.lane.b32.xlu1 %v3770_v27, %s3600_s13  ;;  %v552_v31 = vpop.permute.xlu0 %551 }
  0x9b   : > { %v566_v33 = vmul.f32 %v552_v31, %v3766_v26  ;;  %v567_v35 = vmul.f32 %v556_v29, %v3770_v27 }
  0x9e   : > { %v560_v30 = vpop.permute.xlu1 %559  ;;  %602 = vrot.lane.b32.xlu0 %v3775_v28, %s3600_s13  ;;  %711 = vperm.xlu1 %3383, %v3719_v10   ;;  %v564_v40 = vpop.permute.xlu0 %563 }
  0x9f   : > { %v568_v36 = vmul.f32 %v560_v30, %v3764_v25  ;;  %v569_v48 = vmul.f32 %v564_v40, %v3775_v28  ;;  %v5182_v40 = vmov 16  }
  0xa2   : > { %684 = vrot.lane.b32.xlu0 %v3770_v27, %s3602_s15  ;;  %644 = vrot.lane.b32.xlu1 %v3770_v27, %s3601_s14 }
  0xa3   : > { %v3790_v32 = vpop.permute.xlu1 %763  ;;  %3384 = vset.pattern.permute.xlu1 %v3598_v20  ;;  %v3818_v42 = vpop.permute.xlu0 %767 }
  0xa4   : > { %v778_v17 = vmul.f32 %v3790_v32, %v3766_v26  ;;  %v779_v19 = vmul.f32 %v3818_v42, %v3770_v27 }
  0xa6   : > { %751 = vperm.xlu0 %3382, %v3719_v10   ;;  %574 = vrot.lane.b32.xlu1 %v566_v33, %s3603_s16 }
  0xa7   : > { %v3795_v34 = vpop.permute.xlu1 %771 }
  0xa8   : > { %v3826_v45 = vpop.permute.xlu0 %963  ;;  %v780_v5 = vmul.f32 %v3795_v34, %v3764_v25  ;;  %v5185_v34 = vmov 15  }
  0xaa   : > { %578 = vrot.lane.b32.xlu0 %v568_v36, %s3603_s16  ;;  %576 = vrot.lane.b32.xlu1 %v567_v35, %s3603_s16 }
  0xab   : > { %v3801_v37 = vpop.permute.xlu1 %775  ;;  %3388 = vset.pattern.permute.xlu0 %v3604_v38 }
  0xac   : > { %v3836_v50 = vpop.permute.xlu0 %975  ;;  %v781_v42 = vmul.f32 %v3801_v37, %v3775_v28 }
  0xae   : > { %646 = vrot.lane.b32.xlu0 %v3764_v25, %s3601_s14  ;;  %600 = vrot.lane.b32.xlu1 %v3764_v25, %s3600_s13 }
  0xb0   : > { %v3807_v39 = vpop.permute.xlu1 %967 }
  0xb1   : > { %v3857_v54 = vpop.permute.xlu0 %1167 }
  0xb2   : > { %722 = vrot.lane.b32.xlu0 %v3766_v26, %s3605_s17  ;;  %682 = vrot.lane.b32.xlu1 %v3766_v26, %s3602_s15 }
  0xb4   : > { %v3813_v41 = vpop.permute.xlu1 %971 }
  0xb6   : > { %688 = vrot.lane.b32.xlu0 %v3775_v28, %s3602_s15  ;;  %747 = vperm.xlu1 %3384, %v3714_v9   ;;  %v3864_v56 = vpop.permute.xlu0 %1363 }
  0xb7   : > { %5197 = vst [vmem:[#allocation6_spill] sm:$0xff] %v3864_v56 }
  0xb9   : > { %v3820_v43 = vpop.permute.xlu1 %1163 }
  0xba   : > { %831 = vperm.xlu0 %3388, %v3719_v10   ;;  %3385 = vset.pattern.permute.xlu1 %v3604_v38  ;;  %v3876_v60 = vpop.permute.xlu0 %1375 }
  0xbb   : > { %819 = vperm.xlu1 %3385, %v3708_v8  }
  0xbd   : > { %v3828_v46 = vpop.permute.xlu1 %1171 }
  0xbe   : > { %3389 = vset.pattern.permute.xlu0 %v3606_v47 }
  0xbf   : > { %859 = vperm.xlu0 %3389, %v3708_v8   ;;  %823 = vperm.xlu1 %3385, %v3703_v7   ;;  %v3882_v63 = vpop.permute.xlu0 %479 }
  0xc0   : > { %5199 = vst [vmem:[#allocation8_spill] sm:$0xff] %v3882_v63 }
  0xc1   : > { %v3833_v49 = vpop.permute.xlu1 %1175 }
  0xc3   : > { %726 = vrot.lane.b32.xlu0 %v3764_v25, %s3605_s17  ;;  %580 = vrot.lane.b32.xlu1 %v569_v48, %s3603_s16  ;;  %v3892_v2 = vpop.permute.xlu0 %484  ;;  %s3626_s16 = smov 100  }
  0xc4   : > { %3386 = vset.pattern.permute.xlu1 %v3606_v47  ;;  %5200 = vst [vmem:[#allocation9_spill] sm:$0xff] %v3892_v2  ;;  %v978_v2 = vmul.f32 %v3826_v45, %v3766_v26 }
  0xc6   : > { %v3850_v53 = vpop.permute.xlu1 %1367 }
  0xc7   : > { %802 = vrot.lane.b32.xlu0 %v3766_v26, %s3607_s25  ;;  %648 = vrot.lane.b32.xlu1 %v3775_v28, %s3601_s14  ;;  %s3623_s14 = smov 103  }
  0xc8   : > { %v3899_v4 = vpop.permute.xlu0 %535 }
  0xc9   : > { %5201 = vst [vmem:[#allocation10_spill] sm:$0xff] %v3899_v4  ;;  %v5190_v4 = vmov 20  }
  0xca   : > { %v3859_v55 = vpop.permute.xlu1 %1371 }
  0xcb   : > { %5196 = vst [vmem:[#allocation5_spill] sm:$0xff] %v3859_v55  ;;  %867 = vperm.xlu0 %3389, %v3714_v9   ;;  %724 = vrot.lane.b32.xlu1 %v3770_v27, %s3605_s17 }
  0xcd   : > { %v3909_v12 = vpop.permute.xlu0 %617 }
  0xce   : > { %5202 = vst [vmem:[#allocation11_spill] sm:$0xff] %v3909_v12  ;;  %v5242_v12 = vmov 20  }
  0xcf   : > { %842 = vrot.lane.b32.xlu0 %v3766_v26, %s3608_s26  ;;  %863 = vperm.xlu1 %3386, %v3703_v7   ;;  %v3869_v57 = vpop.permute.xlu1 %474 }
  0xd0   : > { %3393 = vset.pattern.permute.xlu0 %v3609_v58 }
  0xd1   : > { %v3918_v14 = vpop.permute.xlu0 %625 }
  0xd3   : > { %907 = vperm.xlu0 %3393, %v3714_v9   ;;  %686 = vrot.lane.b32.xlu1 %v3764_v25, %s3602_s15  ;;  %s3625_s15 = smov 101  }
  0xd4   : > { %v3874_v59 = vpop.permute.xlu1 %527  ;;  %3387 = vset.pattern.permute.xlu1 %v3604_v38 }
  0xd6   : > { %v3932_v20 = vpop.permute.xlu0 %659 }
  0xd7   : > { %3394 = vset.pattern.permute.xlu0 %v3610_v61  ;;  %827 = vperm.xlu1 %3387, %v3714_v9  }
  0xd8   : > { %943 = vperm.xlu0 %3394, %v3703_v7   ;;  %v3880_v62 = vpop.permute.xlu1 %531 }
  0xd9   : > { %5198 = vst [vmem:[#allocation7_spill] sm:$0xff] %v3880_v62 }
  0xda   : > { %v3939_v23 = vpop.permute.xlu0 %667 }
  0xdb   : > { %3390 = vset.pattern.permute.xlu1 %v3609_v58  ;;  %5206 = vst [vmem:[#allocation15_spill] sm:$0xff] %v3939_v23 }
  0xdc   : > { %808 = vrot.lane.b32.xlu0 %v3775_v28, %s3607_s25  ;;  %899 = vperm.xlu1 %3390, %v3708_v8  }
  0xdd   : > { %v3887_v0 = vpop.permute.xlu1 %489 }
  0xdf   : > { %v3949_v29 = vpop.permute.xlu0 %707 }
  0xe0   : > { %884 = vrot.lane.b32.xlu0 %v3770_v27, %s3611_s27  ;;  %903 = vperm.xlu1 %3390, %v3703_v7   ;;  %5207 = vst [vmem:[#allocation16_spill] sm:$0xff] %v3949_v29  ;;  %v5186_v29 = vmov 19  }
  0xe2   : > { %v3894_v3 = vpop.permute.xlu1 %539 }
  0xe4   : > { %951 = vperm.xlu0 %3394, %v3719_v10   ;;  %728 = vrot.lane.b32.xlu1 %v3775_v28, %s3605_s17  ;;  %s3629_s17 = smov 96  }
  0xe5   : > { %3391 = vset.pattern.permute.xlu1 %v3606_v47 }
  0xe7   : > { %v3903_v6 = vpop.permute.xlu1 %613 }
  0xe8   : > { %790 = vrot.lane.b32.xlu0 %v780_v5, %s3612_s28  ;;  %804 = vrot.lane.b32.xlu1 %v3770_v27, %s3607_s25 }
  0xe9   : > { %3400 = vset.pattern.permute.xlu0 %v3613_v11 }
  0xec   : > { %846 = vrot.lane.b32.xlu0 %v3764_v25, %s3608_s26  ;;  %871 = vperm.xlu1 %3391, %v3719_v10   ;;  %v3914_v13 = vpop.permute.xlu1 %663 }
  0xed   : > { %5203 = vst [vmem:[#allocation12_spill] sm:$0xff] %v3914_v13 }
  0xf0   : > { %922 = vrot.lane.b32.xlu0 %v3766_v26, %s3614_s29  ;;  %3392 = vset.pattern.permute.xlu1 %v3610_v61 }
  0xf1   : > { %939 = vperm.xlu1 %3392, %v3708_v8   ;;  %v3921_v16 = vpop.permute.xlu1 %621 }
  0xf2   : > { %5204 = vst [vmem:[#allocation13_spill] sm:$0xff] %v3921_v16  ;;  %v5222_v16 = vmov 16  }
  0xf4   : > { %888 = vrot.lane.b32.xlu0 %v3775_v28, %s3611_s27 }
  0xf5   : > { %786 = vrot.lane.b32.xlu1 %v778_v17, %s3612_s28  ;;  %v5180_v17 = vmov 18  }
  0xf6   : > { %v3928_v18 = vpop.permute.xlu1 %699  ;;  %3395 = vset.pattern.permute.xlu1 %v3609_v58  ;;  %v980_v58 = vmul.f32 %v3813_v41, %v3764_v25  ;;  %v3431_v41 = vld [vmem:[%s5170_s1 + $0x10] sm:$0xff]  }
  0xf7   : > { %3161 = vmatprep.mubr.msk.bf16.mxu0 %vm301_vm2, %v3431_v41 }
  0xf8   : > { %1031 = vperm.xlu0 %3400, %v3719_v10  }
  0xf9   : > { %788 = vrot.lane.b32.xlu1 %v779_v19, %s3612_s28 }
  0xfa   : > { %v3936_v21 = vpop.permute.xlu1 %703 }
  0xfb   : > { %5205 = vst [vmem:[#allocation14_spill] sm:$0xff] %v3936_v21 }
  0xfc   : > { %3401 = vset.pattern.permute.xlu0 %v5184_v22 }
  0xfd   : > { %1059 = vperm.xlu0 %3401, %v3708_v8   ;;  %844 = vrot.lane.b32.xlu1 %v3770_v27, %s3608_s26 }
  0xff   : > { %v3944_v24 = vpop.permute.xlu1 %671 }
 0x100   : > { %v3959_v32 = vpop.permute.xlu0 %514 }
 0x101   : > { %926 = vrot.lane.b32.xlu0 %v3764_v25, %s3614_s29  ;;  %911 = vperm.xlu1 %3395, %v3719_v10   ;;  %5208 = vst [vmem:[#allocation17_spill] sm:$0xff] %v3959_v32  ;;  %v5225_v32 = vmov 15  }
 0x104   : > { %v3951_v30 = vpop.permute.xlu1 %739  ;;  %v3970_v35 = vpop.permute.xlu0 %596 }
 0x105   : > { %1002 = vrot.lane.b32.xlu0 %v3766_v26, %s3616_s30  ;;  %806 = vrot.lane.b32.xlu1 %v3764_v25, %s3607_s25  ;;  %s3636_s25 = smov 92  }
 0x106   : > { %3396 = vset.pattern.permute.xlu1 %v3610_v61 }
 0x108   : > { %v3957_v31 = vpop.permute.xlu1 %510  ;;  %v3977_v38 = vpop.permute.xlu0 %642 }
 0x109   : > { %1067 = vperm.xlu0 %3401, %v3714_v9   ;;  %882 = vrot.lane.b32.xlu1 %v3766_v26, %s3611_s27 }
 0x10c   : > { %v3964_v33 = vpop.permute.xlu1 %512 }
 0x10d   : > { %5209 = vst [vmem:[#allocation18_spill] sm:$0xff] %v3964_v33  ;;  %1042 = vrot.lane.b32.xlu0 %v3766_v26, %s3617_s7  ;;  %947 = vperm.xlu1 %3396, %v3714_v9   ;;  %v5247_v33 = vmov 21  }
 0x10e   : > { %3405 = vset.pattern.permute.xlu0 %v5185_v34 }
 0x110   : > { %v3975_v36 = vpop.permute.xlu1 %516 }
 0x111   : > { %1107 = vperm.xlu0 %3405, %v3714_v9   ;;  %3397 = vset.pattern.permute.xlu1 %v3613_v11 }
 0x112   : > { %1019 = vperm.xlu1 %3397, %v3708_v8  }
 0x114   : > { %v3984_v44 = vpop.permute.xlu1 %598 }
 0x115   : > { %3406 = vset.pattern.permute.xlu0 %v5182_v40  ;;  %5210 = vst [vmem:[#allocation19_spill] sm:$0xff] %v3984_v44 }
 0x116   : > { %1143 = vperm.xlu0 %3406, %v3703_v7   ;;  %1023 = vperm.xlu1 %3397, %v3703_v7  }
 0x119   : > { %v3986_v47 = vpop.permute.xlu0 %743 }
 0x11a   : > { %5211 = vst [vmem:[#allocation20_spill] sm:$0xff] %v3986_v47  ;;  %1008 = vrot.lane.b32.xlu0 %v3775_v28, %s3616_s30  ;;  %792 = vrot.lane.b32.xlu1 %v781_v42, %s3612_s28 }
 0x11b   : > { %3398 = vset.pattern.permute.xlu1 %v5184_v22 }
 0x11d   : > { %v3992_v48 = vpop.permute.xlu1 %711  ;;  %v3994_v51 = vpop.permute.xlu0 %602 }
 0x11e   : > { %848 = vrot.lane.b32.xlu1 %v3775_v28, %s3608_s26  ;;  %1084 = vrot.lane.b32.xlu0 %v3770_v27, %s3620_s8  ;;  %s251_s26 = scalar_lea.vmem %s5175_s6, %s3087_s23 }
 0x121   : > { %v4000_v37 = vpop.permute.xlu1 %644  ;;  %v4002_v52 = vpop.permute.xlu0 %684 }
 0x122   : > { %5212 = vst [vmem:[#allocation21_spill] sm:$0xff] %v4000_v37  ;;  %5213 = vst [vmem:[#allocation22_spill] sm:$0xff] %v4002_v52  ;;  %924 = vrot.lane.b32.xlu1 %v3770_v27, %s3614_s29  ;;  %1151 = vperm.xlu0 %3406, %v3719_v10   ;;  %v5194_v52 = vmov 24  }
 0x125   : > { %v4009_v61 = vpop.permute.xlu1 %574  ;;  %v4011_v5 = vpop.permute.xlu0 %751 }
 0x126   : > { %1063 = vperm.xlu1 %3398, %v3703_v7   ;;  %990 = vrot.lane.b32.xlu0 %v980_v58, %s3621_s9  ;;  %v3432_v58 = vld [vmem:[%s5170_s1 + $0x18] sm:$0xff]  }
 0x127   : > { %3412 = vset.pattern.permute.xlu0 %v5180_v17  ;;  %3162 = vmatmul.mubr.msk.bf16.gmra.mrb[4].mxu0 %vm301_vm2, %v3432_v58 }
 0x129   : > { %v4016_v19 = vpop.permute.xlu1 %576  ;;  %v4018_v42 = vpop.permute.xlu0 %578 }
 0x12a   : > { %5214 = vst [vmem:[#allocation23_spill] sm:$0xff] %v4016_v19  ;;  %5215 = vst [vmem:[#allocation24_spill] sm:$0xff] %v4018_v42  ;;  %886 = vrot.lane.b32.xlu1 %v3764_v25, %s3611_s27  ;;  %1046 = vrot.lane.b32.xlu0 %v3764_v25, %s3617_s7 }
 0x12b   : > { %3399 = vset.pattern.permute.xlu1 %v3613_v11 }
 0x12d   : > { %v4032_v15 = vpop.permute.xlu1 %600  ;;  %v4034_v1 = vpop.permute.xlu0 %646 }
 0x12e   : > { %5216 = vst [vmem:[#allocation25_spill] sm:$0xff] %v4032_v15  ;;  %5217 = vst [vmem:[#allocation26_spill] sm:$0xff] %v4034_v1  ;;  %1027 = vperm.xlu1 %3399, %v3714_v9   ;;  %1122 = vrot.lane.b32.xlu0 %v3766_v26, %s3623_s14 }
 0x131   : > { %v4040_v17 = vpop.permute.xlu1 %682  ;;  %v4042_v11 = vpop.permute.xlu0 %722 }
 0x132   : > { %3402 = vset.pattern.permute.xlu1 %v5185_v34  ;;  %1088 = vrot.lane.b32.xlu0 %v3775_v28, %s3620_s8  ;;  %v5219_v34 = vmov 14  }
 0x133   : > { %1099 = vperm.xlu1 %3402, %v3708_v8  }
 0x135   : > { %v4048_v41 = vpop.permute.xlu1 %747  ;;  %v4050_v58 = vpop.permute.xlu0 %688 }
 0x136   : > { %5218 = vst [vmem:[#allocation27_spill] sm:$0xff] %v4048_v41  ;;  %1231 = vperm.xlu0 %3412, %v3719_v10  }
 0x137   : > { %1103 = vperm.xlu1 %3402, %v3703_v7  }
 0x139   : > { %v4054_v40 = vpop.permute.xlu0 %831 }
 0x13a   : > { %v4056_v22 = vpop.permute.xlu1 %819  ;;  %3413 = vset.pattern.permute.xlu0 %v5186_v29 }
 0x13b   : > { %928 = vrot.lane.b32.xlu1 %v3775_v28, %s3614_s29  ;;  %1259 = vperm.xlu0 %3413, %v3708_v8  }
 0x13c   : > { %3403 = vset.pattern.permute.xlu1 %v5219_v34 }
 0x13e   : > { %v4063_v41 = vpop.permute.xlu1 %823  ;;  %v4065_v23 = vpop.permute.xlu0 %859 }
 0x13f   : > { %5220 = vst [vmem:[#allocation28_spill] sm:$0xff] %v4063_v41  ;;  %1004 = vrot.lane.b32.xlu1 %v3770_v27, %s3616_s30  ;;  %1126 = vrot.lane.b32.xlu0 %v3764_v25, %s3623_s14  ;;  %v979_v41 = vmul.f32 %v3807_v39, %v3770_v27 }
 0x142   : > { %v4071_v1 = vpop.permute.xlu1 %580  ;;  %v4073_v29 = vpop.permute.xlu0 %726 }
 0x143   : > { %5221 = vst [vmem:[#allocation29_spill] sm:$0xff] %v4073_v29  ;;  %1071 = vperm.xlu1 %3403, %v3719_v10   ;;  %1202 = vrot.lane.b32.xlu0 %v3766_v26, %s3625_s15 }
 0x146   : > { %v4078_v34 = vpop.permute.xlu1 %648  ;;  %v4080_v42 = vpop.permute.xlu0 %802 }
 0x147   : > { %3404 = vset.pattern.permute.xlu1 %v5222_v16  ;;  %1267 = vperm.xlu0 %3413, %v3714_v9  }
 0x148   : > { %1139 = vperm.xlu1 %3404, %v3708_v8  }
 0x14a   : > { %v4087_v29 = vpop.permute.xlu1 %724  ;;  %v4091_v15 = vpop.permute.xlu0 %867 }
 0x14b   : > { %5223 = vst [vmem:[#allocation30_spill] sm:$0xff] %v4087_v29  ;;  %1242 = vrot.lane.b32.xlu0 %v3766_v26, %s3626_s16  ;;  %5224 = vst [vmem:[#allocation31_spill] sm:$0xff] %v4091_v15  ;;  %v5188_v15 = vmov 21  }
 0x14c   : > { %986 = vrot.lane.b32.xlu1 %v978_v2, %s3621_s9  ;;  %3417 = vset.pattern.permute.xlu0 %v5190_v4  ;;  %v1180_v4 = vmul.f32 %v3828_v46, %v3764_v25 }
 0x14d   : > { %3407 = vset.pattern.permute.xlu1 %v5225_v32 }
 0x14e   : > { %v4098_v47 = vpop.permute.xlu1 %863  ;;  %v4102_v45 = vpop.permute.xlu0 %842 }
 0x14f   : > { %5226 = vst [vmem:[#allocation32_spill] sm:$0xff] %v4098_v47  ;;  %1307 = vperm.xlu0 %3417, %v3714_v9  }
 0x150   : > { %988 = vrot.lane.b32.xlu1 %v979_v41, %s3621_s9 }
 0x152   : > { %v4104_v21 = vpop.permute.xlu1 %686  ;;  %v4112_v39 = vpop.permute.xlu0 %907 }
 0x153   : > { %5227 = vst [vmem:[#allocation33_spill] sm:$0xff] %v4104_v21  ;;  %3418 = vset.pattern.permute.xlu0 %v5188_v15  ;;  %5229 = vst [vmem:[#allocation35_spill] sm:$0xff] %v4112_v39 }
 0x154   : > { %1044 = vrot.lane.b32.xlu1 %v3770_v27, %s3617_s7  ;;  %1343 = vperm.xlu0 %3418, %v3703_v7  }
 0x156   : > { %v4110_v2 = vpop.permute.xlu1 %827 }
 0x157   : > { %5228 = vst [vmem:[#allocation34_spill] sm:$0xff] %v4110_v2  ;;  %v4124_v41 = vpop.permute.xlu0 %943 }
 0x158   : > { %1111 = vperm.xlu1 %3407, %v3719_v10   ;;  %1208 = vrot.lane.b32.xlu0 %v3775_v28, %s3625_s15  ;;  %5230 = vst [vmem:[#allocation36_spill] sm:$0xff] %v4124_v41  ;;  %v5233_v41 = vmov 18  }
 0x15b   : > { %v4117_v32 = vpop.permute.xlu1 %899  ;;  %v4135_v2 = vpop.permute.xlu0 %808 }
 0x15c   : > { %1006 = vrot.lane.b32.xlu1 %v3764_v25, %s3616_s30  ;;  %1284 = vrot.lane.b32.xlu0 %v3770_v27, %s3629_s17 }
 0x15d   : > { %3408 = vset.pattern.permute.xlu1 %v5222_v16  ;;  %v5192_v16 = vmov 23  }
 0x15f   : > { %v4126_v15 = vpop.permute.xlu1 %903  ;;  %v4146_v46 = vpop.permute.xlu0 %884 }
 0x160   : > { %5231 = vst [vmem:[#allocation37_spill] sm:$0xff] %v4126_v15  ;;  %1082 = vrot.lane.b32.xlu1 %v3766_v26, %s3620_s8  ;;  %1351 = vperm.xlu0 %3418, %v3719_v10   ;;  %5234 = vst [vmem:[#allocation39_spill] sm:$0xff] %v4146_v46  ;;  %v5236_v46 = vmov 19  }
 0x163   : > { %v4133_v39 = vpop.permute.xlu1 %728 }
 0x164   : > { %1147 = vperm.xlu1 %3408, %v3714_v9   ;;  %1190 = vrot.lane.b32.xlu0 %v1180_v4, %s3630_s18  ;;  %v981_v4 = vmul.f32 %v3836_v50, %v3775_v28 }
 0x165   : > { %3424 = vset.pattern.permute.xlu0 %v5192_v16  ;;  %v4155_v16 = vpop.permute.xlu0 %951 }
 0x166   : > { %5235 = vst [vmem:[#allocation40_spill] sm:$0xff] %v4155_v16 }
 0x167   : > { %v4140_v21 = vpop.permute.xlu1 %804 }
 0x168   : > { %5232 = vst [vmem:[#allocation38_spill] sm:$0xff] %v4140_v21  ;;  %3409 = vset.pattern.permute.xlu1 %v5233_v41  ;;  %1246 = vrot.lane.b32.xlu0 %v3764_v25, %s3626_s16 }
 0x169   : > { %1219 = vperm.xlu1 %3409, %v3708_v8   ;;  %v4168_v29 = vpop.permute.xlu0 %790 }
 0x16a   : > { %5237 = vst [vmem:[#allocation41_spill] sm:$0xff] %v4168_v29 }
 0x16b   : > { %v4148_v15 = vpop.permute.xlu1 %871 }
 0x16c   : > { %1322 = vrot.lane.b32.xlu0 %v3766_v26, %s3632_s19 }
 0x16d   : > { %1223 = vperm.xlu1 %3409, %v3703_v7  }
 0x170   : > { %v4157_v47 = vpop.permute.xlu1 %939  ;;  %1288 = vrot.lane.b32.xlu0 %v3775_v28, %s3629_s17 }
 0x171   : > { %992 = vrot.lane.b32.xlu1 %v981_v4, %s3621_s9  ;;  %v4176_v4 = vpop.permute.xlu0 %846 }
 0x172   : > { %3410 = vset.pattern.permute.xlu1 %v5236_v46  ;;  %5239 = vst [vmem:[#allocation43_spill] sm:$0xff] %v4176_v4  ;;  %v1379_v4 = vmul.f32 %v3850_v53, %v3770_v27 }
 0x174   : > { %v4163_v21 = vpop.permute.xlu1 %786  ;;  %1431 = vperm.xlu0 %3424, %v3719_v10  }
 0x175   : > { %1048 = vrot.lane.b32.xlu1 %v3775_v28, %s3617_s7 }
 0x178   : > { %v4170_v50 = vpop.permute.xlu1 %788  ;;  %3425 = vset.pattern.permute.xlu0 %v5194_v52  ;;  %v4188_v52 = vpop.permute.xlu0 %922 }
 0x179   : > { %5238 = vst [vmem:[#allocation42_spill] sm:$0xff] %v4170_v50  ;;  %1124 = vrot.lane.b32.xlu1 %v3770_v27, %s3623_s14  ;;  %1459 = vperm.xlu0 %3425, %v3708_v8  }
 0x17c   : > { %v4178_v13 = vpop.permute.xlu1 %844 }
 0x17d   : > { %5240 = vst [vmem:[#allocation44_spill] sm:$0xff] %v4178_v13  ;;  %1263 = vperm.xlu1 %3410, %v3703_v7   ;;  %1402 = vrot.lane.b32.xlu0 %v3766_v26, %s3634_s20  ;;  %v4197_v13 = vpop.permute.xlu0 %888 }
 0x180   : > { %v4183_v29 = vpop.permute.xlu1 %911 }
 0x181   : > { %1086 = vrot.lane.b32.xlu1 %v3764_v25, %s3620_s8  ;;  %1467 = vperm.xlu0 %3425, %v3714_v9  }
 0x182   : > { %3411 = vset.pattern.permute.xlu1 %v5233_v41  ;;  %v4209_v41 = vpop.permute.xlu0 %1031 }
 0x183   : > { %5244 = vst [vmem:[#allocation47_spill] sm:$0xff] %v4209_v41 }
 0x184   : > { %v4193_v50 = vpop.permute.xlu1 %806 }
 0x185   : > { %5241 = vst [vmem:[#allocation45_spill] sm:$0xff] %v4193_v50  ;;  %1227 = vperm.xlu1 %3411, %v3714_v9   ;;  %1388 = vrot.lane.b32.xlu0 %v1379_v4, %s3635_s24  ;;  %v1381_v4 = vmul.f32 %v3876_v60, %v3775_v28 }
 0x186   : > { %v4220_v19 = vpop.permute.xlu0 %1059 }
 0x188   : > { %v4199_v37 = vpop.permute.xlu1 %882 }
 0x189   : > { %3414 = vset.pattern.permute.xlu1 %v5242_v12  ;;  %1444 = vrot.lane.b32.xlu0 %v3770_v27, %s3636_s25 }
 0x18a   : > { %1299 = vperm.xlu1 %3414, %v3708_v8  }
 0x18c   : > { %v4205_v53 = vpop.permute.xlu1 %947 }
 0x18d   : > { %5243 = vst [vmem:[#allocation46_spill] sm:$0xff] %v4205_v53  ;;  %1408 = vrot.lane.b32.xlu0 %v3775_v28, %s3634_s20  ;;  %v440_v53 = vlaneseq }
 0x18e   : > { %1303 = vperm.xlu1 %3414, %v3703_v7  }
 0x18f   : > { %v441_v7 = vand.u32 127, %v440_v53 }
 0x191   : > { %v4214_v50 = vpop.permute.xlu1 %1019  ;;  %1392 = vrot.lane.b32.xlu0 %v1381_v4, %s3635_s24  ;;  %v4230_v4 = vpop.permute.xlu0 %926  ;;  %v446_v55 = vand.u32 7, %v441_v7 }
 0x192   : > { %1128 = vrot.lane.b32.xlu1 %v3775_v28, %s3623_s14  ;;  %5246 = vst [vmem:[#allocation49_spill] sm:$0xff] %v4230_v4 }
 0x193   : > { %3415 = vset.pattern.permute.xlu1 %v5236_v46  ;;  %v3159_v46 = vpop.f32.mrb[0].mxu0  ;;  %v4237_v62 = vadd.s32 4294967295, %v446_v55  ;;  %v4242_v41 = vadd.s32 4294967294, %v446_v55 }
 0x194   : > { %404 = vst.msk [vmem:[#allocation2 + $0x10] sm:$0xff] %vm401_vm3, %v3159_v46  ;;  %v354_v63 = vpop.f32.mrb[1].mxu0  ;;  %v1178_v46 = vmul.f32 %v3820_v43, %v3766_v26 }
 0x195   : > { %v4222_v44 = vpop.permute.xlu1 %1023  ;;  %1448 = vrot.lane.b32.xlu0 %v3775_v28, %s3636_s25  ;;  %402 = vst.msk [vmem:[#allocation2] sm:$0xff] %vm401_vm3, %v354_v63  ;;  %v3160_v53 = vpop.f32.mrb[2].mxu0  ;;  %vm501_vm4 = vcmp.ge.s32.totalorder %v4237_v62, 0  ;;  %vm459_vm5 = vcmp.ge.s32.totalorder %v4242_v41, 0 }
 0x196   : > { %5245 = vst [vmem:[#allocation48_spill] sm:$0xff] %v4222_v44  ;;  %1204 = vrot.lane.b32.xlu1 %v3770_v27, %s3625_s15  ;;  %405 = vst.msk [vmem:[#allocation2 + $0x18] sm:$0xff] %vm401_vm3, %v3160_v53  ;;  %v357_v4 = vpop.f32.mrb[3].mxu0  ;;  %v4244_v7 = vpop.permute.xlu0 %1002  ;;  %v4257_v53 = vadd.s32 1, %v446_v55 }
 0x197   : > { %403 = vst.msk [vmem:[#allocation2 + $0x8] sm:$0xff] %vm401_vm3, %v357_v4  ;;  %v1179_v4 = vmul.f32 %v3857_v54, %v3770_v27 }
 0x198   : > { %vm592_vm6 = vcmp.lt.s32.totalorder %v4257_v53, 8 }
 0x199   : > { %v4228_v60 = vpop.permute.xlu1 %792 }
 0x19a   : > { %1271 = vperm.xlu1 %3415, %v3719_v10   ;;  %v4265_v56 = vpop.permute.xlu0 %1067 }
 0x19b   : > { %5249 = vst [vmem:[#allocation51_spill] sm:$0xff] %v4265_v56 }
 0x19d   : > { %v4234_v44 = vpop.permute.xlu1 %848 }
 0x19e   : > { %3416 = vset.pattern.permute.xlu1 %v5247_v33 }
 0x19f   : > { %1339 = vperm.xlu1 %3416, %v3708_v8   ;;  %v522_v8 = vsel %vm501_vm4, %v3957_v31, 0.0  ;;  %v464_v31 = vsel %vm459_vm5, %v3766_v26, 0.0 }
 0x1a1   : > { %v4249_v63 = vpop.permute.xlu1 %924 }
 0x1a2   : > { %5248 = vst [vmem:[#allocation50_spill] sm:$0xff] %v4249_v63  ;;  %v542_v63 = vmul.f32 %v3874_v59, %v522_v8  ;;  %v608_v59 = vsel %vm592_vm6, %v3970_v35, 0.0  ;;  %v694_v35 = vsel %vm459_vm5, %v4040_v17, 0.0 }
 0x1a3   : > { %1186 = vrot.lane.b32.xlu1 %v1178_v46, %s3630_s18  ;;  %v492_v46 = vmul.f32 %v3869_v57, %v464_v31 }
 0x1a4   : > { %3419 = vset.pattern.permute.xlu1 %v5242_v12  ;;  %v4273_v12 = vadd.s32 2, %v446_v55  ;;  %v628_v55 = vmul.f32 %v3903_v6, %v608_v59 }
 0x1a5   : > { %v4262_v43 = vpop.permute.xlu1 %1063  ;;  %v546_v54 = vadd.f32 %v542_v63, %v492_v46 }
 0x1a6   : > { %vm638_vm7 = vcmp.lt.s32.totalorder %v4273_v12, 8 }
 0x1a7   : > { %1188 = vrot.lane.b32.xlu1 %v1179_v4, %s3630_s18  ;;  %v586_v8 = vadd.f32 %v4009_v61, %v546_v54  ;;  %v1043_v4 = vpop.permute.xlu0 %1042  ;;  %v654_v63 = vsel %vm638_vm7, %v3977_v38, 0.0  ;;  %v714_v61 = vmul.f32 %v3928_v18, %v694_v35  ;;  %v734_v38 = vsel %vm501_vm4, %v4042_v11, 0.0 }
 0x1a8   : > { %v674_v46 = vmul.f32 %v3932_v20, %v654_v63  ;;  %v754_v18 = vmul.f32 %v3951_v30, %v734_v38  ;;  %v854_v30 = vsel %vm638_vm7, %v4102_v45, 0.0  ;;  %v934_v38 = vsel %vm501_vm4, %v4188_v52, 0.0 }
 0x1a9   : > { %v4275_v16 = vpop.permute.xlu1 %886  ;;  %v632_v31 = vadd.f32 %v628_v55, %v586_v8  ;;  %v1054_v52 = vsel %vm638_vm7, %v1043_v4, 0.0  ;;  %v467_v4 = vsel %vm459_vm5, %v3775_v28, 0.0 }
 0x1ab   : > { %1244 = vrot.lane.b32.xlu1 %v3770_v27, %s3626_s16  ;;  %v4296_v54 = vpop.permute.xlu0 %1107  ;;  %v678_v6 = vadd.f32 %v674_v46, %v632_v31  ;;  %v894_v31 = vsel %vm459_vm5, %v4199_v37, 0.0  ;;  %v5250_v46 = vmov 23   ;;  %v3574_v37 = vld [vmem:[%s5171_s2 + $0x8] sm:$0xff] }
 0x1ad   : > { %v4284_v57 = vpop.permute.xlu1 %1027 }
 0x1af   : > { %1311 = vperm.xlu1 %3419, %v3719_v10   ;;  %v718_v10 = vadd.f32 %v714_v61, %v678_v6  ;;  %v4311_v20 = vpop.permute.xlu0 %1143 }
 0x1b1   : > { %v758_v59 = vadd.f32 %v754_v18, %v718_v10  ;;  %v1181_v10 = vmul.f32 %v3833_v49, %v3775_v28 }
 0x1b2   : > { %v4298_v56 = vpop.permute.xlu1 %1099 }
 0x1b3   : > { %1206 = vrot.lane.b32.xlu1 %v3764_v25, %s3625_s15  ;;  %v798_v11 = vadd.f32 %v4163_v21, %v758_v59  ;;  %v4321_v63 = vpop.permute.xlu0 %1008  ;;  %v874_v21 = vmul.f32 %v4065_v23, %v854_v30  ;;  %v5251_v59 = vmov 24   ;;  %v525_v30 = vsel %vm501_vm4, %v3975_v36, 0.0 }
 0x1b4   : > { %3420 = vset.pattern.permute.xlu1 %v5247_v33  ;;  %v814_v33 = vsel %vm592_vm6, %v4080_v42, 0.0 }
 0x1b5   : > { %v834_v55 = vmul.f32 %v4056_v22, %v814_v33  ;;  %v914_v22 = vmul.f32 %v4117_v32, %v894_v31  ;;  %v954_v32 = vmul.f32 %v4157_v47, %v934_v38  ;;  %v657_v38 = vsel %vm638_vm7, %v4078_v34, 0.0 }
 0x1b6   : > { %v4306_v17 = vpop.permute.xlu1 %1103 }
 0x1b7   : > { %1282 = vrot.lane.b32.xlu1 %v3766_v26, %s3629_s17  ;;  %v838_v42 = vadd.f32 %v834_v55, %v798_v11  ;;  %v4339_v45 = vpop.permute.xlu0 %1084  ;;  %v1014_v55 = vsel %vm592_vm6, %v4244_v7, 0.0 }
 0x1b8   : > { %v1034_v47 = vmul.f32 %v4214_v50, %v1014_v55  ;;  %v495_v50 = vmul.f32 %v3887_v0, %v467_v4  ;;  %v677_v0 = vmul.f32 %v3944_v24, %v657_v38  ;;  %v1017_v38 = vsel %vm592_vm6, %v4321_v63, 0.0  ;;  %v5256_v63 = vld [vmem:[#allocation7_spill] sm:$0xff] }
 0x1b9   : > { %v878_v6 = vadd.f32 %v874_v21, %v838_v42  ;;  %v1074_v42 = vmul.f32 %v4220_v19, %v1054_v52  ;;  %v545_v21 = vmul.f32 %v3894_v3, %v525_v30  ;;  %v611_v3 = vsel %vm592_vm6, %v3994_v51, 0.0 }
 0x1ba   : > { %v4313_v8 = vpop.permute.xlu1 %928  ;;  %v697_v51 = vsel %vm459_vm5, %v4050_v58, 0.0  ;;  %v817_v30 = vsel %vm592_vm6, %v4135_v2, 0.0 }
 0x1bb   : > { %1347 = vperm.xlu1 %3420, %v3714_v9   ;;  %v3573_v9 = vld [vmem:[%s5171_s2] sm:$0xff]  ;;  %v918_v23 = vadd.f32 %v914_v22, %v878_v6  ;;  %v4354_v33 = vpop.permute.xlu0 %1151  ;;  %v549_v6 = vadd.f32 %v545_v21, %v495_v50 }
 0x1bd   : > { %v958_v11 = vadd.f32 %v954_v32, %v918_v23  ;;  %v631_v32 = vmul.f32 %v3918_v14, %v611_v3 }
 0x1be   : > { %v4323_v35 = vpop.permute.xlu1 %1004 }
 0x1bf   : > { %3421 = vset.pattern.permute.xlu1 %v5250_v46  ;;  %v4374_v22 = vpop.permute.xlu0 %990 }
 0x1c0   : > { %1419 = vperm.xlu1 %3421, %v3573_v9  }
 0x1c2   : > { %v4337_v61 = vpop.permute.xlu1 %1071 }
 0x1c3   : > { %v4390_v23 = vpop.permute.xlu0 %1046 }
 0x1c4   : > { %1423 = vperm.xlu1 %3421, %v3574_v37  }
 0x1c7   : > { %v4349_v18 = vpop.permute.xlu1 %1139  ;;  %v4407_v24 = vpop.permute.xlu0 %1122 }
 0x1c8   : > { %1192 = vrot.lane.b32.xlu1 %v1181_v10, %s3630_s18  ;;  %v589_v10 = vadd.f32 %v4071_v1, %v549_v6  ;;  %v737_v1 = vsel %vm501_vm4, %v4133_v39, 0.0  ;;  %v5253_v6 = vld [vmem:[#allocation6_spill] sm:$0xff] }
 0x1c9   : > { %3422 = vset.pattern.permute.xlu1 %v5251_v59  ;;  %v757_v52 = vmul.f32 %v4011_v5, %v737_v1  ;;  %v1378_v3 = vmul.f32 %v5253_v6, %v3766_v26  ;;  %v5262_v6 = vld [vmem:[#allocation21_spill] sm:$0xff] }
 0x1ca   : > { %v635_v55 = vadd.f32 %v631_v32, %v589_v10  ;;  %v5254_v32 = vld [vmem:[#allocation47_spill] sm:$0xff] }
 0x1cb   : > { %v987_v49 = vpop.permute.xlu1 %986 }
 0x1cc   : > { %v998_v31 = vadd.f32 %v987_v49, %v958_v11  ;;  %1248 = vrot.lane.b32.xlu1 %v3775_v28, %s3626_s16  ;;  %v681_v34 = vadd.f32 %v677_v0, %v635_v55  ;;  %v1037_v0 = vmul.f32 %v5254_v32, %v1017_v38  ;;  %v5263_v32 = vld [vmem:[#allocation12_spill] sm:$0xff] }
 0x1ce   : > { %v1038_v9 = vadd.f32 %v1034_v47, %v998_v31  ;;  %v857_v47 = vsel %vm638_vm7, %v4234_v44, 0.0  ;;  %v937_v44 = vsel %vm501_vm4, %v4313_v8, 0.0  ;;  %v3576_v8 = vld [vmem:[%s5171_s2 + $0x18] sm:$0xff] }
 0x1cf   : > { %v4369_v7 = vpop.permute.xlu1 %988 }
 0x1d0   : > { %v4376_v36 = vadd.f32 %v1074_v42, %v1038_v9  ;;  %1324 = vrot.lane.b32.xlu1 %v3770_v27, %s3632_s19 }
 0x1d3   : > { %v4381_v19 = vpop.permute.xlu1 %1044 }
 0x1d4   : > { %1463 = vperm.xlu1 %3422, %v3574_v37   ;;  %v3575_v37 = vld [vmem:[%s5171_s2 + $0x10] sm:$0xff] }
 0x1d7   : > { %v4394_v11 = vpop.permute.xlu1 %1111 }
 0x1d8   : > { %1286 = vrot.lane.b32.xlu1 %v3764_v25, %s3629_s17 }
 0x1d9   : > { %3423 = vset.pattern.permute.xlu1 %v5250_v46  ;;  %v717_v46 = vmul.f32 %v3992_v48, %v697_v51  ;;  %v4425_v48 = vpop.permute.xlu0 %1088  ;;  %v5255_v51 = vld [vmem:[#allocation18_spill] sm:$0xff] }
 0x1da   : > { %v523_v1 = vsel %vm501_vm4, %v5255_v51, 0.0  ;;  %v5264_v51 = vld [vmem:[#allocation22_spill] sm:$0xff] }
 0x1db   : > { %v4405_v14 = vpop.permute.xlu1 %1006  ;;  %v721_v49 = vadd.f32 %v717_v46, %v681_v34 }
 0x1dc   : > { %1427 = vperm.xlu1 %3423, %v3575_v37  }
 0x1dd   : > { %v761_v39 = vadd.f32 %v757_v52, %v721_v49  ;;  %v4434_v9 = vpop.permute.xlu0 %1231  ;;  %v543_v52 = vmul.f32 %v5256_v63, %v523_v1  ;;  %v695_v1 = vsel %vm459_vm5, %v5264_v51, 0.0 }
 0x1df   : > { %v4414_v58 = vpop.permute.xlu1 %1082  ;;  %v801_v5 = vadd.f32 %v4228_v60, %v761_v39  ;;  %v465_v39 = vsel %vm459_vm5, %v3770_v27, 0.0 }
 0x1e0   : > { %1326 = vrot.lane.b32.xlu1 %v3764_v25, %s3632_s19  ;;  %v837_v25 = vmul.f32 %v4054_v40, %v817_v30 }
 0x1e1   : > { %3426 = vset.pattern.permute.xlu1 %v5251_v59  ;;  %v877_v59 = vmul.f32 %v4148_v15, %v857_v47  ;;  %v5252_v15 = vld [vmem:[#allocation40_spill] sm:$0xff] }
 0x1e2   : > { %v841_v42 = vadd.f32 %v837_v25, %v801_v5  ;;  %v957_v21 = vmul.f32 %v5252_v15, %v937_v44  ;;  %v5257_v47 = vld [vmem:[#allocation8_spill] sm:$0xff]  ;;  %v5258_v44 = vld [vmem:[#allocation5_spill] sm:$0xff] }
 0x1e3   : > { %v4428_v31 = vpop.permute.xlu1 %1147  ;;  %v493_v5 = vmul.f32 %v5257_v47, %v465_v39 }
 0x1e4   : > { %1328 = vrot.lane.b32.xlu1 %v3775_v28, %s3632_s19  ;;  %v881_v60 = vadd.f32 %v877_v59, %v841_v42  ;;  %v897_v28 = vsel %vm459_vm5, %v4197_v13, 0.0  ;;  %v4458_v13 = vpop.permute.xlu0 %1259  ;;  %v4481_v42 = vld [vmem:[#allocation4 + $0x10] sm:$0xff] }
 0x1e5   : > { %v917_v40 = vmul.f32 %v4183_v29, %v897_v28  ;;  %v5259_v28 = vld [vmem:[#allocation19_spill] sm:$0xff] }
 0x1e7   : > { %v921_v50 = vadd.f32 %v917_v40, %v881_v60  ;;  %v1380_v60 = vmul.f32 %v4481_v42, %v5258_v44  ;;  %v5260_v40 = vld [vmem:[#allocation23_spill] sm:$0xff] }
 0x1e8   : > { %v4439_v2 = vpop.permute.xlu1 %1219  ;;  %1404 = vrot.lane.b32.xlu1 %v3770_v27, %s3634_s20  ;;  %v4465_v37 = vpop.permute.xlu0 %1126  ;;  %v609_v27 = vsel %vm592_vm6, %v5259_v28, 0.0 }
 0x1e9   : > { %v961_v29 = vadd.f32 %v957_v21, %v921_v50 }
 0x1ec   : > { %v4448_v4 = vpop.permute.xlu1 %1223  ;;  %1471 = vperm.xlu1 %3426, %v3576_v8   ;;  %v5261_v8 = vld [vmem:[#allocation11_spill] sm:$0xff] }
 0x1ed   : > { %v629_v50 = vmul.f32 %v5261_v8, %v609_v27  ;;  %v3433_v27 = vld [vmem:[%s5173_s4] sm:$0xff]   ;;  %v5268_v8 = vld [vmem:[#allocation38_spill] sm:$0xff] }
 0x1ee   : > { %3173 = vmatprep.mubr.msk.bf16.mxu1 %vm301_vm2, %v3433_v27 }
 0x1f0   : > { %v993_v10 = vpop.permute.xlu1 %992  ;;  %1386 = vrot.lane.b32.xlu1 %v1378_v3, %s3635_s24  ;;  %v655_v3 = vsel %vm638_vm7, %v5262_v6, 0.0  ;;  %v5269_v6 = vld [vmem:[#allocation44_spill] sm:$0xff] }
 0x1f1   : > { %v1001_v55 = vadd.f32 %v993_v10, %v961_v29 }
 0x1f3   : > { %v1041_v34 = vadd.f32 %v1037_v0, %v1001_v55  ;;  %v675_v0 = vmul.f32 %v5263_v32, %v655_v3  ;;  %v855_v3 = vsel %vm638_vm7, %v5269_v6, 0.0 }
 0x1f4   : > { %v1049_v46 = vpop.permute.xlu1 %1048  ;;  %1442 = vrot.lane.b32.xlu1 %v3766_v26, %s3636_s25  ;;  %v547_v26 = vadd.f32 %v543_v52, %v493_v5  ;;  %v5267_v5 = vld [vmem:[#allocation20_spill] sm:$0xff] }
 0x1f5   : > { %v1057_v49 = vsel %vm638_vm7, %v1049_v46, 0.0 }
 0x1f6   : > { %v1077_v30 = vmul.f32 %v4337_v61, %v1057_v49  ;;  %v4490_v61 = vpop.permute.xlu0 %1202  ;;  %v587_v15 = vadd.f32 %v5260_v40, %v547_v26 }
 0x1f8   : > { %v4477_v25 = vadd.f32 %v1077_v30, %v1041_v34  ;;  %v4479_v59 = vpop.permute.xlu1 %1124  ;;  %1406 = vrot.lane.b32.xlu1 %v4481_v42, %s3634_s20  ;;  %v633_v38 = vadd.f32 %v629_v50, %v587_v15  ;;  %v5265_v34 = vld [vmem:[#allocation30_spill] sm:$0xff]  ;;  %v815_v50 = vsel %vm592_vm6, %v5268_v8, 0.0 }
 0x1f9   : > { %v735_v46 = vsel %vm501_vm4, %v5265_v34, 0.0  ;;  %v5266_v30 = vld [vmem:[#allocation14_spill] sm:$0xff] }
 0x1fa   : > { %v4500_v29 = vpop.permute.xlu0 %1267  ;;  %v3163_v55 = vpop.f32.mrb[4].mxu0  ;;  %v679_v52 = vadd.f32 %v675_v0, %v633_v38  ;;  %v715_v47 = vmul.f32 %v5266_v30, %v695_v1  ;;  %v755_v26 = vmul.f32 %v5267_v5, %v735_v46  ;;  %v5270_v38 = vld [vmem:[#allocation42_spill] sm:$0xff]  ;;  %v5272_v1 = vld [vmem:[#allocation32_spill] sm:$0xff] }
 0x1fb   : > { %408 = vst.msk [vmem:[#allocation2 + $0x30] sm:$0xff] %vm401_vm3, %v3163_v55  ;;  %v370_v63 = vpop.f32.mrb[5].mxu0  ;;  %v5271_v55 = vld [vmem:[#allocation28_spill] sm:$0xff]  ;;  %v875_v34 = vmul.f32 %v5272_v1, %v855_v3  ;;  %v5274_v30 = vld [vmem:[#allocation50_spill] sm:$0xff]  ;;  %v1094_v3 = vsel %vm459_vm5, %v4414_v58, 0.0 }
 0x1fc   : > { %v4493_v21 = vpop.permute.xlu1 %1263  ;;  %1390 = vrot.lane.b32.xlu1 %v1380_v60, %s3635_s24  ;;  %406 = vst.msk [vmem:[#allocation2 + $0x20] sm:$0xff] %vm401_vm3, %v370_v63  ;;  %v3164_v49 = vpop.f32.mrb[6].mxu0  ;;  %v719_v28 = vadd.f32 %v715_v47, %v679_v52  ;;  %v835_v51 = vmul.f32 %v5271_v55, %v815_v50  ;;  %v5273_v52 = vld [vmem:[#allocation39_spill] sm:$0xff]  ;;  %v935_v47 = vsel %vm501_vm4, %v5274_v30, 0.0  ;;  %v1055_v55 = vsel %vm638_vm7, %v4381_v19, 0.0  ;;  %v1581_v30 = vld [vmem:[#allocation2] sm:$0xff] }
 0x1fd   : > { %409 = vst.msk [vmem:[#allocation2 + $0x38] sm:$0xff] %vm401_vm3, %v3164_v49  ;;  %v373_v44 = vpop.f32.mrb[7].mxu0  ;;  %v895_v49 = vsel %vm459_vm5, %v5273_v52, 0.0  ;;  %v5277_v52 = vld [vmem:[#allocation48_spill] sm:$0xff]  ;;  %v1075_v58 = vmul.f32 %v4262_v43, %v1055_v55  ;;  %v1134_v19 = vsel %vm501_vm4, %v4407_v24, 0.0  ;;  %v1095_v43 = vsel %vm459_vm5, %v4339_v45, 0.0 }
 0x1fe   : > { %v4520_v60 = vpop.permute.xlu0 %1242  ;;  %407 = vst.msk [vmem:[#allocation2 + $0x28] sm:$0xff] %vm401_vm3, %v373_v44  ;;  %v759_v40 = vadd.f32 %v755_v26, %v719_v28  ;;  %v5275_v28 = vld [vmem:[#allocation37_spill] sm:$0xff] }
 0x1ff   : > { %v915_v27 = vmul.f32 %v5275_v28, %v895_v49  ;;  %v1154_v28 = vmul.f32 %v4349_v18, %v1134_v19 }
 0x200   : > { %v4502_v10 = vpop.permute.xlu1 %1086  ;;  %1446 = vrot.lane.b32.xlu1 %v4481_v42, %s3636_s25  ;;  %v799_v32 = vadd.f32 %v5270_v38, %v759_v40  ;;  %v5276_v40 = vld [vmem:[#allocation36_spill] sm:$0xff] }
 0x201   : > { %v955_v8 = vmul.f32 %v5276_v40, %v935_v47  ;;  %v1582_v40 = vpack.c.bf16 %v1581_v30, %v1581_v30 }
 0x202   : > { %v4536_v0 = vpop.permute.xlu0 %1307  ;;  %v839_v63 = vadd.f32 %v835_v51, %v799_v32  ;;  %v1015_v32 = vsel %vm592_vm6, %v4323_v35, 0.0 }
 0x203   : > { %v1035_v49 = vmul.f32 %v5277_v52, %v1015_v32  ;;  %v1585_v53 = vld [vmem:[#allocation2 + $0x20] sm:$0xff] }
 0x204   : > { %v4515_v39 = vpop.permute.xlu1 %1227  ;;  %v879_v5 = vadd.f32 %v875_v34, %v839_v63  ;;  %v1114_v34 = vmul.f32 %v4298_v56, %v1094_v3  ;;  %v1135_v56 = vsel %vm501_vm4, %v4479_v59, 0.0 }
 0x206   : > { %v4550_v44 = vpop.permute.xlu0 %1343  ;;  %v919_v50 = vadd.f32 %v915_v27, %v879_v5  ;;  %v1118_v35 = vadd.f32 %v1114_v34, %v4376_v36  ;;  %v1115_v36 = vmul.f32 %v4306_v17, %v1095_v43 }
 0x208   : > { %v959_v38 = vadd.f32 %v955_v8, %v919_v50  ;;  %v1155_v8 = vmul.f32 %v4311_v20, %v1135_v56  ;;  %v1158_v24 = vadd.f32 %v1154_v28, %v1118_v35  ;;  %v1214_v20 = vsel %vm592_vm6, %v4490_v61, 0.0  ;;  %v5278_v61 = vld [vmem:[#allocation17_spill] sm:$0xff] }
 0x209   : > { %v4526_v15 = vpop.permute.xlu1 %1299  ;;  %v1234_v52 = vmul.f32 %v4439_v2, %v1214_v20  ;;  %v524_v2 = vsel %vm501_vm4, %v5278_v61, 0.0  ;;  %v5282_v20 = vld [vmem:[#allocation13_spill] sm:$0xff]  ;;  %v5286_v61 = vld [vmem:[#allocation15_spill] sm:$0xff] }
 0x20a   : > { %v4565_v51 = vpop.permute.xlu0 %1208  ;;  %v999_v1 = vadd.f32 %v4369_v7, %v959_v38 }
 0x20c   : > { %v1039_v47 = vadd.f32 %v1035_v49, %v999_v1 }
 0x20d   : > { %v4540_v46 = vpop.permute.xlu1 %1303 }
 0x20e   : > { %v4577_v5 = vpop.permute.xlu0 %1284  ;;  %v1079_v27 = vadd.f32 %v1075_v58, %v1039_v47  ;;  %v1254_v58 = vsel %vm638_vm7, %v4520_v60, 0.0 }
 0x20f   : > { %v1274_v47 = vmul.f32 %v4458_v13, %v1254_v58  ;;  %v5279_v13 = vld [vmem:[#allocation10_spill] sm:$0xff]  ;;  %v5283_v58 = vld [vmem:[#allocation24_spill] sm:$0xff] }
 0x210   : > { %v1119_v38 = vadd.f32 %v1115_v36, %v1079_v27 }
 0x211   : > { %v4548_v26 = vpop.permute.xlu1 %1128 }
 0x212   : > { %v4588_v32 = vpop.permute.xlu0 %1351  ;;  %v1159_v59 = vadd.f32 %v1155_v8, %v1119_v38  ;;  %v544_v8 = vmul.f32 %v5279_v13, %v524_v2  ;;  %v5281_v38 = vld [vmem:[#allocation9_spill] sm:$0xff] }
 0x215   : > { %v4554_v6 = vpop.permute.xlu1 %1204 }
 0x216   : > { %v4592_v1 = vpop.permute.xlu0 %1190 }
 0x219   : > { %v4569_v63 = vpop.permute.xlu1 %1271 }
 0x21a   : > { %v4598_v17 = vpop.permute.xlu0 %1246 }
 0x21e   : > { %v1340_v7 = vpop.permute.xlu1 %1339  ;;  %v1323_v35 = vpop.permute.xlu0 %1322 }
 0x222   : > { %v1187_v50 = vpop.permute.xlu1 %1186 }
 0x223   : > { %v1198_v3 = vadd.f32 %v1187_v50, %v1158_v24  ;;  %1591 = vxpose.xlu1.c.b16.start.end [1/1] (short) (narrow) %v1582_v40, 64  ;;  %v1334_v40 = vsel %vm501_vm4, %v1323_v35, 0.0  ;;  %v466_v50 = vsel %vm459_vm5, %v4481_v42, 0.0 }
 0x224   : > { %v1354_v43 = vmul.f32 %v1340_v7, %v1334_v40  ;;  %v5287_v40 = vld [vmem:[#allocation16_spill] sm:$0xff] }
 0x225   : > { %v1238_v30 = vadd.f32 %v1234_v52, %v1198_v3 }
 0x226   : > { %v1189_v55 = vpop.permute.xlu1 %1188 }
 0x227   : > { %v4590_v18 = vadd.f32 %v1189_v55, %v1159_v59  ;;  %v1278_v28 = vadd.f32 %v1274_v47, %v1238_v30  ;;  %v494_v59 = vmul.f32 %v5281_v38, %v466_v50  ;;  %v5284_v47 = vld [vmem:[#allocation26_spill] sm:$0xff] }
 0x228   : > { %v656_v35 = vsel %vm638_vm7, %v5284_v47, 0.0 }
 0x229   : > { %v548_v7 = vadd.f32 %v544_v8, %v494_v59  ;;  %v676_v2 = vmul.f32 %v5286_v61, %v656_v35  ;;  %v5288_v8 = vld [vmem:[#allocation29_spill] sm:$0xff] }
 0x22a   : > { %v4594_v34 = vpop.permute.xlu1 %1244  ;;  %v736_v50 = vsel %vm501_vm4, %v5288_v8, 0.0  ;;  %v5294_v8 = vld [vmem:[#allocation31_spill] sm:$0xff] }
 0x22b   : > { %v588_v30 = vadd.f32 %v5283_v58, %v548_v7 }
 0x22e   : > { %v4596_v45 = vpop.permute.xlu1 %1311 }
 0x232   : > { %v4604_v49 = vpop.permute.xlu1 %1206 }
 0x236   : > { %v1283_v19 = vpop.permute.xlu1 %1282 }
 0x237   : > { %v1294_v56 = vsel %vm459_vm5, %v1283_v19, 0.0  ;;  %v5285_v19 = vld [vmem:[#allocation33_spill] sm:$0xff] }
 0x238   : > { %v1314_v27 = vmul.f32 %v4526_v15, %v1294_v56  ;;  %v5280_v15 = vld [vmem:[#allocation25_spill] sm:$0xff]  ;;  %v696_v42 = vsel %vm459_vm5, %v5285_v19, 0.0 }
 0x239   : > { %v610_v3 = vsel %vm592_vm6, %v5280_v15, 0.0  ;;  %v5292_v19 = vld [vmem:[#allocation41_spill] sm:$0xff] }
 0x23a   : > { %v1318_v60 = vadd.f32 %v1314_v27, %v1278_v28  ;;  %v4618_v36 = vpop.permute.xlu1 %1347  ;;  %v630_v52 = vmul.f32 %v5282_v20, %v610_v3  ;;  %v4642_v27 = vpop.permute.xlu0 %1288  ;;  %v5289_v3 = vld [vmem:[#allocation45_spill] sm:$0xff]  ;;  %v5290_v20 = vld [vmem:[#allocation27_spill] sm:$0xff] }
 0x23b   : > { %v816_v38 = vsel %vm592_vm6, %v5289_v3, 0.0 }
 0x23c   : > { %v4621_v24 = vadd.f32 %v1354_v43, %v1318_v60  ;;  %v634_v28 = vadd.f32 %v630_v52, %v588_v30  ;;  %v716_v43 = vmul.f32 %v5287_v40, %v696_v42  ;;  %v756_v52 = vmul.f32 %v5290_v20, %v736_v50  ;;  %v5291_v30 = vld [vmem:[#allocation34_spill] sm:$0xff] }
 0x23d   : > { %v836_v47 = vmul.f32 %v5291_v30, %v816_v38  ;;  %v5296_v30 = vld [vmem:[#allocation49_spill] sm:$0xff] }
 0x23e   : > { %v680_v13 = vadd.f32 %v676_v2, %v634_v28  ;;  %v4654_v59 = vpop.permute.xlu0 %1431  ;;  %v5293_v28 = vld [vmem:[#allocation43_spill] sm:$0xff]  ;;  %v896_v2 = vsel %vm459_vm5, %v4275_v16, 0.0  ;;  %v5297_v16 = vld [vmem:[#allocation46_spill] sm:$0xff] }
 0x23f   : > { %v4630_v55 = vpop.permute.xlu1 %1419  ;;  %v856_v61 = vsel %vm638_vm7, %v5293_v28, 0.0 }
 0x240   : > { %v720_v15 = vadd.f32 %v716_v43, %v680_v13  ;;  %v876_v50 = vmul.f32 %v5294_v8, %v856_v61 }
 0x242   : > { %v760_v58 = vadd.f32 %v756_v52, %v720_v15  ;;  %v4665_v40 = vpop.permute.xlu0 %1459  ;;  %v5295_v15 = vld [vmem:[#allocation35_spill] sm:$0xff] }
 0x243   : > { %v4640_v56 = vpop.permute.xlu1 %1423  ;;  %v916_v3 = vmul.f32 %v5295_v15, %v896_v2  ;;  %v1215_v15 = vsel %vm592_vm6, %v4554_v6, 0.0  ;;  %v1097_v6 = vsel %vm459_vm5, %v4425_v48, 0.0 }
 0x244   : > { %v800_v42 = vadd.f32 %v5292_v19, %v760_v58  ;;  %v936_v19 = vsel %vm501_vm4, %v5296_v30, 0.0 }
 0x245   : > { %v956_v28 = vmul.f32 %v5297_v16, %v936_v19 }
 0x246   : > { %v840_v43 = vadd.f32 %v836_v47, %v800_v42  ;;  %v4671_v20 = vpop.permute.xlu0 %1402  ;;  %v1016_v47 = vsel %vm592_vm6, %v4405_v14, 0.0  ;;  %v1056_v14 = vsel %vm638_vm7, %v4390_v23, 0.0  ;;  %v5298_v23 = vld [vmem:[#allocation51_spill] sm:$0xff] }
 0x247   : > { %v4646_v60 = vpop.permute.xlu1 %1192  ;;  %v1076_v16 = vmul.f32 %v5298_v23, %v1056_v14 }
 0x248   : > { %v880_v38 = vadd.f32 %v876_v50, %v840_v43  ;;  %v1036_v43 = vmul.f32 %v4284_v57, %v1016_v47  ;;  %v1096_v57 = vsel %vm459_vm5, %v4502_v10, 0.0 }
 0x249   : > { %v1116_v10 = vmul.f32 %v4296_v54, %v1096_v57  ;;  %v1295_v54 = vsel %vm459_vm5, %v4577_v5, 0.0  ;;  %v1216_v5 = vsel %vm592_vm6, %v4604_v49, 0.0  ;;  %v1256_v49 = vsel %vm638_vm7, %v4598_v17, 0.0 }
 0x24a   : > { %v920_v58 = vadd.f32 %v916_v3, %v880_v38  ;;  %v4684_v2 = vpop.permute.xlu0 %1467  ;;  %v1255_v3 = vsel %vm638_vm7, %v4594_v34, 0.0  ;;  %v1235_v34 = vmul.f32 %v4448_v4, %v1215_v15  ;;  %v1315_v15 = vmul.f32 %v4540_v46, %v1295_v54 }
 0x24b   : > { %v1249_v7 = vpop.permute.xlu1 %1248  ;;  %v1275_v30 = vmul.f32 %v4493_v21, %v1255_v3  ;;  %v1136_v21 = vsel %vm501_vm4, %v4465_v37, 0.0 }
 0x24c   : > { %v960_v61 = vadd.f32 %v956_v28, %v920_v58  ;;  %v1117_v28 = vmul.f32 %v4394_v11, %v1097_v6  ;;  %v1156_v37 = vmul.f32 %v4428_v31, %v1136_v21 }
 0x24e   : > { %v1000_v50 = vadd.f32 %v4374_v22, %v960_v61  ;;  %v1137_v22 = vsel %vm501_vm4, %v4548_v26, 0.0  ;;  %v1389_v58 = vpop.permute.xlu0 %1388  ;;  %v1239_v26 = vadd.f32 %v1235_v34, %v4590_v18  ;;  %v1217_v18 = vsel %vm592_vm6, %v4565_v51, 0.0 }
 0x24f   : > { %v1325_v35 = vpop.permute.xlu1 %1324  ;;  %v1157_v47 = vmul.f32 %v4354_v33, %v1137_v22  ;;  %v1237_v51 = vmul.f32 %v4434_v9, %v1217_v18 }
 0x250   : > { %v1040_v38 = vadd.f32 %v1036_v43, %v1000_v50  ;;  %v1121_v43 = vadd.f32 %v1117_v28, %v4477_v25  ;;  %v1335_v48 = vsel %vm501_vm4, %v1325_v35, 0.0  ;;  %v1279_v4 = vadd.f32 %v1275_v30, %v1239_v26 }
 0x251   : > { %v1257_v35 = vsel %vm638_vm7, %v1249_v7, 0.0  ;;  %v1355_v3 = vmul.f32 %v4550_v44, %v1335_v48  ;;  %v1236_v44 = vmul.f32 %v4515_v39, %v1216_v5 }
 0x252   : > { %v1080_v61 = vadd.f32 %v1076_v16, %v1040_v38  ;;  %v1161_v33 = vadd.f32 %v1157_v47, %v1121_v43  ;;  %v1445_v25 = vpop.permute.xlu0 %1444  ;;  %v1319_v57 = vadd.f32 %v1315_v15, %v1279_v4  ;;  %v1277_v46 = vmul.f32 %v4569_v63, %v1257_v35 }
 0x253   : > { %v4667_v13 = vpop.permute.xlu1 %1463  ;;  %v1297_v16 = vsel %vm459_vm5, %v4642_v27, 0.0 }
 0x254   : > { %v1120_v11 = vadd.f32 %v1116_v10, %v1080_v61  ;;  %v1201_v14 = vadd.f32 %v4646_v60, %v1161_v33  ;;  %v1359_v6 = vadd.f32 %v1355_v3, %v1319_v57  ;;  %v1317_v10 = vmul.f32 %v4596_v45, %v1297_v16 }
 0x256   : > { %v1160_v38 = vadd.f32 %v1156_v37, %v1120_v11  ;;  %v1241_v31 = vadd.f32 %v1237_v51, %v1201_v14  ;;  %v1409_v34 = vpop.permute.xlu0 %1408  ;;  %v1399_v39 = vadd.f32 %v1389_v58, %v1359_v6 }
 0x257   : > { %v4673_v52 = vpop.permute.xlu1 %1286  ;;  %v1417_v11 = vsel %vm592_vm6, %v1409_v34, 0.0  ;;  %v3436_v34 = vld [vmem:[%s5170_s1 + $0x28] sm:$0xff]  }
 0x258   : > { %v1200_v9 = vadd.f32 %v4592_v1, %v1160_v38  ;;  %v1281_v23 = vadd.f32 %v1277_v46, %v1241_v31  ;;  %v1296_v1 = vsel %vm459_vm5, %v4673_v52, 0.0  ;;  %v3435_v31 = vld [vmem:[%s5170_s1 + $0x20] sm:$0xff]  }
 0x259   : > { %3165 = vmatprep.mubr.msk.bf16.mxu0 %vm301_vm2, %v3435_v31 }
 0x25a   : > { %v1240_v17 = vadd.f32 %v1236_v44, %v1200_v9  ;;  %v1393_v52 = vpop.permute.xlu0 %1392  ;;  %3166 = vmatmul.mubr.msk.bf16.gmra.mrb[8].mxu0 %vm301_vm2, %v3436_v34 }
 0x25b   : > { %v4682_v42 = vpop.permute.xlu1 %1427 }
 0x25e   : > { %v1449_v33 = vpop.permute.xlu0 %1448 }
 0x25f   : > { %v4687_v8 = vpop.permute.xlu1 %1326  ;;  %v1457_v15 = vsel %vm638_vm7, %v1449_v33, 0.0 }
 0x260   : > { %v1336_v45 = vsel %vm501_vm4, %v4687_v8, 0.0 }
 0x261   : > { %v1356_v48 = vmul.f32 %v4618_v36, %v1336_v45  ;;  %v1437_v36 = vmul.f32 %v4654_v59, %v1417_v11  ;;  %v1586_v59 = vpack.c.bf16 %v1585_v53, %v1585_v53 }
 0x263   : > { %v1329_v19 = vpop.permute.xlu1 %1328  ;;  %v1622_v12 = vsel %vm1620_vm8, %v1586_v59, 0 }
 0x264   : > { %v1337_v63 = vsel %vm501_vm4, %v1329_v19, 0.0  ;;  %v1276_v19 = vmul.f32 %v4500_v29, %v1256_v49 }
 0x265   : > { %v1357_v27 = vmul.f32 %v4588_v32, %v1337_v63 }
 0x266   : > { %v1280_v43 = vadd.f32 %v1276_v19, %v1240_v17 }
 0x267   : > { %v1405_v50 = vpop.permute.xlu1 %1404 }
 0x268   : > { %v1415_v7 = vsel %vm592_vm6, %v1405_v50, 0.0 }
 0x269   : > { %v1435_v60 = vmul.f32 %v4640_v56, %v1415_v7  ;;  %v1414_v56 = vsel %vm592_vm6, %v4671_v20, 0.0  ;;  %v1321_v20 = vadd.f32 %v1317_v10, %v1281_v23 }
 0x26a   : > { %v1434_v47 = vmul.f32 %v4630_v55, %v1414_v56  ;;  %v1316_v55 = vmul.f32 %v4536_v0, %v1296_v1 }
 0x26b   : > { %v1472_v22 = vpop.permute.xlu1 %1471  ;;  %v1439_v58 = vadd.f32 %v1435_v60, %v1399_v39  ;;  %v1361_v4 = vadd.f32 %v1357_v27, %v1321_v20 }
 0x26c   : > { %v1320_v8 = vadd.f32 %v1316_v55, %v1280_v43  ;;  %v1477_v3 = vmul.f32 %v1472_v22, %v1457_v15  ;;  %v3434_v22 = vld [vmem:[%s5173_s4 + $0x8] sm:$0xff]  }
 0x26d   : > { %v1401_v18 = vadd.f32 %v1393_v52, %v1361_v4 }
 0x26f   : > { %v1387_v30 = vpop.permute.xlu1 %1386  ;;  %v1441_v35 = vadd.f32 %v1437_v36, %v1401_v18 }
 0x270   : > { %v1398_v28 = vadd.f32 %v1387_v30, %v4621_v24  ;;  %v1455_v24 = vsel %vm638_vm7, %v1445_v25, 0.0  ;;  %v1360_v25 = vadd.f32 %v1356_v48, %v1320_v8 }
 0x271   : > { %v1475_v29 = vmul.f32 %v4667_v13, %v1455_v24  ;;  %v1481_v38 = vadd.f32 %v1477_v3, %v1441_v35 }
 0x272   : > { %v1438_v61 = vadd.f32 %v1434_v47, %v1398_v28 }
 0x273   : > { %v1443_v26 = vpop.permute.xlu1 %1442  ;;  %v1479_v62 = vadd.f32 %v1475_v29, %v1439_v58 }
 0x274   : > { %v1454_v41 = vsel %vm638_vm7, %v1443_v26, 0.0 }
 0x275   : > { %v1474_v32 = vmul.f32 %v4665_v40, %v1454_v41 }
 0x277   : > { %v1407_v50 = vpop.permute.xlu1 %1406  ;;  %v1478_v21 = vadd.f32 %v1474_v32, %v1438_v61 }
 0x278   : > { %v1416_v0 = vsel %vm592_vm6, %v1407_v50, 0.0 }
 0x279   : > { %v1486_v54 = vpack.c.bf16 %v1479_v62, %v1478_v21  ;;  %v1436_v37 = vmul.f32 %v4682_v42, %v1416_v0 }
 0x27b   : > { %v1391_v13 = vpop.permute.xlu1 %1390  ;;  %3169 = vmatprep.subr.bf16.mxu1 %v1486_v54 }
 0x27c   : > { %3170 = vmatpush3.bf16.msra.mxu1 %v1486_v54  ;;  %v1400_v40 = vadd.f32 %v1391_v13, %v1360_v25 }
 0x27e   : > { %v1440_v57 = vadd.f32 %v1436_v37, %v1400_v40 }
 0x27f   : > { %v1447_v14 = vpop.permute.xlu1 %1446 }
 0x280   : > { %v1456_v5 = vsel %vm638_vm7, %v1447_v14, 0.0 }
 0x281   : > { %v1476_v51 = vmul.f32 %v4684_v2, %v1456_v5 }
 0x283   : > { %v1480_v46 = vadd.f32 %v1476_v51, %v1440_v57 }
 0x285   : > { %v1487_v7 = vpack.c.bf16 %v1481_v38, %v1480_v46 }
 0x287   : > { %3171 = vmatprep.subr.bf16.mxu1 %v1487_v7 }
 0x288   : > { %3172 = vmatpush3.bf16.msra.mxu1 %v1487_v7 }
 0x289   : > { %v1599_v42 = vpop.trf.xlu1  ;;  %3289 = vmatprep.subr.msk.bf16.mxu1 %vm1620_vm8, %v1586_v59 }
 0x28b   : > { %3174 = vmatmul.mubr.msk.bf16.vlgmr.msra.gmra.mrb[0].mxu1 %vm301_vm2, %v3434_v22 }
 0x28c   : > { %3178 = vmatpush3.bf16.msra.mxu1 %v1622_v12  ;;  %3179 = vmatprep.mubr.msk.bf16.mxu1 %vm1607_vm9, %v1599_v42 }
 0x28d   : > { %v1600_v2 = vpop.trf.xlu1 }
 0x291   : > { %v1601_v6 = vpop.trf.xlu1 }
 0x293   : > { %3180 = vmatmul.mubr.msk.bf16.vlgmr.msra.gmra.mrb[4].mxu1 %vm1607_vm9, %v1600_v2 }
 0x294   : > { %3183 = vmatprep.mubr.msk.bf16.mxu1 %vm1607_vm9, %v1601_v6 }
 0x295   : > { %v1602_v44 = vpop.trf.xlu1 }
 0x29b   : > { %3184 = vmatmul.mubr.msk.bf16.gmra.mrb[8].mxu1 %vm1607_vm9, %v1602_v44 }
 0x32d   : > { %v3167_v6 = vpop.f32.mrb[8].mxu0 }
 0x32e   : > { %412 = vst.msk [vmem:[#allocation2 + $0x50] sm:$0xff] %vm401_vm3, %v3167_v6  ;;  %v386_v44 = vpop.f32.mrb[9].mxu0 }
 0x32f   : > { %410 = vst.msk [vmem:[#allocation2 + $0x40] sm:$0xff] %vm401_vm3, %v386_v44  ;;  %v3168_v31 = vpop.f32.mrb[10].mxu0 }
 0x330   : > { %413 = vst.msk [vmem:[#allocation2 + $0x58] sm:$0xff] %vm401_vm3, %v3168_v31  ;;  %v389_v34 = vpop.f32.mrb[11].mxu0 }
 0x331   : > { %411 = vst.msk [vmem:[#allocation2 + $0x48] sm:$0xff] %vm401_vm3, %v389_v34 }
 0x35e   : > { %v4802_v60 = vpop.f32.mrb[0].mxu1 }
 0x35f   : > { %v4804_v30 = vpop.f32.mrb[1].mxu1 }
 0x360   : > { %v4806_v49 = vpop.f32.mrb[2].mxu1 }
 0x361   : > { %v4808_v9 = vpop.f32.mrb[3].mxu1 }
 0x366   : > { %v3181_v23 = vpop.f32.mrb[4].mxu1 }
 0x367   : > { %v1658_v63 = vpop.f32.mrb[5].mxu1  ;;  %v1695_v16 = vsel %vm401_vm3, %v3181_v23, -inf }
 0x368   : > { %1696 = vmax.xlane.f32.xlu1 %v1695_v16  ;;  %v3182_v39 = vpop.f32.mrb[6].mxu1  ;;  %v1689_v28 = vsel %vm401_vm3, %v1658_v63, -inf }
 0x369   : > { %1690 = vmax.xlane.f32.xlu0 %v1689_v28  ;;  %v1661_v56 = vpop.f32.mrb[7].mxu1  ;;  %v1698_v19 = vsel %vm401_vm3, %v3182_v39, -inf }
 0x36a   : > { %v1692_v10 = vsel %vm401_vm3, %v1661_v56, -inf }
 0x36d   : > { %1693 = vmax.xlane.f32.xlu0 %v1692_v10 }
 0x36e   : > { %v3185_v17 = vpop.f32.mrb[8].mxu1 }
 0x36f   : > { %v1674_v1 = vpop.f32.mrb[9].mxu1  ;;  %v1707_v24 = vsel %vm401_vm3, %v3185_v17, -inf }
 0x370   : > { %v3186_v47 = vpop.f32.mrb[10].mxu1  ;;  %v1701_v58 = vsel %vm401_vm3, %v1674_v1, -inf }
 0x371   : > { %1699 = vmax.xlane.f32.xlu0 %v1698_v19  ;;  %v1677_v27 = vpop.f32.mrb[11].mxu1  ;;  %v1710_v45 = vsel %vm401_vm3, %v3186_v47, -inf }
 0x372   : > { %v1704_v26 = vsel %vm401_vm3, %v1677_v27, -inf }
 0x375   : > { %1702 = vmax.xlane.f32.xlu0 %v1701_v58 }
 0x379   : > { %1705 = vmax.xlane.f32.xlu0 %v1704_v26 }
 0x37d   : > { %1708 = vmax.xlane.f32.xlu0 %v1707_v24 }
 0x381   : > { %1711 = vmax.xlane.f32.xlu0 %v1710_v45 }
 0x3f5   : > { %v1697_v20 = vpop.xlane.xlu1 %1696 }
 0x3f6   : > { %v1715_v41 = vsub.f32 %v3181_v23, %v1697_v20  ;;  %v1691_v52 = vpop.xlane.xlu0 %1690  ;;  %v5299_v23 = vmov 0.0  }
 0x3f7   : > { %v1713_v29 = vsub.f32 %v1658_v63, %v1691_v52  ;;  %3195 = vmatprep.mubr.msk.bf16.mxu0 %vm3637_vm10, %v5299_v23  ;;  %v1922_v63 = vld [vmem:[#allocation2 + $0x8] sm:$0xff] }
 0x3f8   : > { %v1725_v55 = vmul.f32 1.442695, %v1715_v41  ;;  %v1923_v16 = vpack.c.bf16 %v1922_v63, %v1922_v63 }
 0x3f9   : > { %v1721_v61 = vmul.f32 1.442695, %v1713_v29 }
 0x3fa   : > { %v1694_v32 = vpop.xlane.xlu0 %1693 }
 0x3fb   : > { %3445 = vpow2.f32 %v1721_v61  ;;  %v1714_v43 = vsub.f32 %v1661_v56, %v1694_v32 }
 0x3fc   : > { %3447 = vpow2.f32 %v1725_v55 }
 0x3fd   : > { %v1723_v48 = vmul.f32 1.442695, %v1714_v43 }
 0x3fe   : > { %v1700_v4 = vpop.xlane.xlu0 %1699 }
 0x3ff   : > { %3449 = vpow2.f32 %v1723_v48  ;;  %v1716_v50 = vsub.f32 %v3182_v39, %v1700_v4 }
 0x401   : > { %v1727_v21 = vmul.f32 1.442695, %v1716_v50 }
 0x402   : > { %v1703_v62 = vpop.xlane.xlu0 %1702 }
 0x403   : > { %3451 = vpow2.f32 %v1727_v21  ;;  %v1717_v8 = vsub.f32 %v1674_v1, %v1703_v62 }
 0x405   : > { %v4818_v54 = vpop.eup %3445  ;;  %v1729_v11 = vmul.f32 1.442695, %v1717_v8 }
 0x406   : > { %v1706_v33 = vpop.xlane.xlu0 %1705  ;;  %v1737_v18 = vsel %vm401_vm3, %v4818_v54, 0.0  ;;  %v4822_v13 = vpop.eup %3447 }
 0x407   : > { %3453 = vpow2.f32 %v1729_v11  ;;  %v1718_v25 = vsub.f32 %v1677_v27, %v1706_v33  ;;  %1738 = vadd.xlane.f32.xlu0 %v1737_v18  ;;  %v1743_v35 = vsel %vm401_vm3, %v4822_v13, 0.0 }
 0x409   : > { %v3450_v0 = vpop.eup %3449  ;;  %v1731_v36 = vmul.f32 1.442695, %v1718_v25  ;;  %v1589_v25 = vld [vmem:[#allocation2 + $0x40] sm:$0xff] }
 0x40a   : > { %v1709_v40 = vpop.xlane.xlu0 %1708  ;;  %v1740_v15 = vsel %vm401_vm3, %v3450_v0, 0.0 }
 0x40b   : > { %3455 = vpow2.f32 %v1731_v36  ;;  %v1719_v3 = vsub.f32 %v3185_v17, %v1709_v40  ;;  %1741 = vadd.xlane.f32.xlu1 %v1740_v15  ;;  %1744 = vadd.xlane.f32.xlu0 %v1743_v35  ;;  %v3437_v36 = vld [vmem:[%s5172_s3] sm:$0xff]   ;;  %v1926_v15 = vld [vmem:[#allocation2 + $0x28] sm:$0xff] }
 0x40c   : > { %3201 = vmatprep.mubr.msk.bf16.mxu1 %vm1607_vm9, %v3437_v36 }
 0x40d   : > { %v3452_v37 = vpop.eup %3451  ;;  %v1733_v14 = vmul.f32 1.442695, %v1719_v3 }
 0x40e   : > { %v1712_v5 = vpop.xlane.xlu0 %1711  ;;  %v1746_v57 = vsel %vm401_vm3, %v3452_v37, 0.0 }
 0x40f   : > { %3457 = vpow2.f32 %v1733_v14  ;;  %v1720_v51 = vsub.f32 %v3186_v47, %v1712_v5  ;;  %1747 = vadd.xlane.f32.xlu1 %v1746_v57  ;;  %v1927_v57 = vpack.c.bf16 %v1926_v15, %v1926_v15 }
 0x411   : > { %v3454_v53 = vpop.eup %3453  ;;  %v1735_v38 = vmul.f32 1.442695, %v1720_v51  ;;  %v3438_v51 = vld [vmem:[%s5172_s3 + $0x8] sm:$0xff]  }
 0x412   : > { %v1749_v46 = vsel %vm401_vm3, %v3454_v53, 0.0 }
 0x413   : > { %3459 = vpow2.f32 %v1735_v38  ;;  %1750 = vadd.xlane.f32.xlu0 %v1749_v46  ;;  %v1961_v38 = vsel %vm1620_vm8, %v1927_v57, 0 }
 0x415   : > { %v3456_v7 = vpop.eup %3455 }
 0x416   : > { %v1752_v59 = vsel %vm401_vm3, %v3456_v7, 0.0 }
 0x417   : > { %1753 = vadd.xlane.f32.xlu1 %v1752_v59 }
 0x419   : > { %v3458_v22 = vpop.eup %3457 }
 0x41a   : > { %v1755_v42 = vsel %vm401_vm3, %v3458_v22, 0.0 }
 0x41b   : > { %1756 = vadd.xlane.f32.xlu0 %v1755_v42 }
 0x41d   : > { %v3460_v12 = vpop.eup %3459 }
 0x41e   : > { %v1758_v2 = vsel %vm401_vm3, %v3460_v12, 0.0 }
 0x41f   : > { %1759 = vadd.xlane.f32.xlu1 %v1758_v2 }
 0x448   : > { %1932 = vxpose.xlu0.c.b16.start.end [1/1] (short) (narrow) %v1923_v16, 64 }
 0x494   : > { %v1739_v39 = vpop.xlane.xlu0 %1738 }
 0x495   : > { %3461 = vrcp.f32 %v1739_v39 }
 0x498   : > { %v1742_v28 = vpop.xlane.xlu1 %1741  ;;  %v1745_v56 = vpop.xlane.xlu0 %1744 }
 0x499   : > { %3463 = vrcp.f32 %v1742_v28 }
 0x49a   : > { %3465 = vrcp.f32 %v1745_v56 }
 0x49c   : > { %v1748_v10 = vpop.xlane.xlu1 %1747 }
 0x49d   : > { %3467 = vrcp.f32 %v1748_v10 }
 0x49f   : > { %v3462_v17 = vpop.eup %3461 }
 0x4a0   : > { %v1751_v1 = vpop.xlane.xlu0 %1750  ;;  %v1769_v27 = vmul.f32 %v3462_v17, %v4818_v54 }
 0x4a1   : > { %3469 = vrcp.f32 %v1751_v1 }
 0x4a3   : > { %v3464_v19 = vpop.eup %3463 }
 0x4a4   : > { %v1754_v47 = vpop.xlane.xlu1 %1753  ;;  %v1770_v58 = vmul.f32 %v3464_v19, %v3450_v0  ;;  %v3466_v26 = vpop.eup %3465  ;;  %v1590_v0 = vpack.c.bf16 %v1589_v25, %v1589_v25 }
 0x4a5   : > { %3471 = vrcp.f32 %v1754_v47  ;;  %v1771_v29 = vmul.f32 %v3466_v26, %v4822_v13 }
 0x4a6   : > { %v1777_v24 = vpack.c.bf16 %v1770_v58, %v1769_v27 }
 0x4a7   : > { %v3468_v45 = vpop.eup %3467 }
 0x4a8   : > { %v1785_v20 = vsel %vm401_vm3, %v1777_v24, 0  ;;  %v1772_v41 = vmul.f32 %v3468_v45, %v3452_v37  ;;  %v1757_v52 = vpop.xlane.xlu0 %1756 }
 0x4a9   : > { %3188 = vmatpush3.bf16.xpose.msra.mxu0 %v1785_v20  ;;  %3473 = vrcp.f32 %v1757_v52 }
 0x4aa   : > { %3189 = vmatprep.subr.bf16.mxu0 %v5299_v23  ;;  %v1778_v61 = vpack.c.bf16 %v1772_v41, %v1771_v29 }
 0x4ab   : > { %v3470_v32 = vpop.eup %3469 }
 0x4ac   : > { %v1760_v55 = vpop.xlane.xlu1 %1759  ;;  %v1788_v48 = vsel %vm401_vm3, %v1778_v61, 0  ;;  %v1773_v50 = vmul.f32 %v3470_v32, %v3454_v53 }
 0x4ad   : > { %3475 = vrcp.f32 %v1760_v55 }
 0x4ae   : > { %v1940_v53 = vpop.trf.xlu0 }
 0x4af   : > { %v3472_v43 = vpop.eup %3471 }
 0x4b0   : > { %v1774_v4 = vmul.f32 %v3472_v43, %v3456_v7 }
 0x4b1   : > { %3190 = vmatpush3.bf16.xpose.msra.mxu0 %v1788_v48 }
 0x4b2   : > { %3191 = vmatprep.subr.bf16.mxu0 %v5299_v23  ;;  %v1779_v21 = vpack.c.bf16 %v1774_v4, %v1773_v50  ;;  %v1941_v46 = vpop.trf.xlu0 }
 0x4b3   : > { %v3474_v62 = vpop.eup %3473 }
 0x4b4   : > { %v1791_v54 = vsel %vm401_vm3, %v1779_v21, 0  ;;  %v1775_v33 = vmul.f32 %v3474_v62, %v3458_v22 }
 0x4b6   : > { %v1942_v7 = vpop.trf.xlu0 }
 0x4b7   : > { %v3476_v8 = vpop.eup %3475 }
 0x4b8   : > { %v1776_v11 = vmul.f32 %v3476_v8, %v3460_v12 }
 0x4b9   : > { %3192 = vmatpush3.bf16.xpose.msra.mxu0 %v1791_v54 }
 0x4ba   : > { %3193 = vmatprep.subr.bf16.mxu0 %v5299_v23  ;;  %v1780_v18 = vpack.c.bf16 %v1776_v11, %v1775_v33  ;;  %v1943_v59 = vpop.trf.xlu0 }
 0x4bc   : > { %v1794_v13 = vsel %vm401_vm3, %v1780_v18, 0 }
 0x4c1   : > { %3194 = vmatpush3.bf16.xpose.msra.mxu0 %v1794_v13 }
 0x4c2   : > { %3215 = vmatprep.subr.bf16.mxu0 %v5299_v23 }
 0x4c8   : > { %3196 = vmatmul.mubr.msk.bf16.vlgmr.msra.gmra.mrb[12].mxu0 %vm401_vm3, %v1590_v0 }
 0x4c9   : > { %3223 = vmatprep.mubr.msk.bf16.mxu0 %vm3637_vm10, %v5299_v23 }
 0x59b   : > { %v1830_v40 = vpop.f32.mrb[12].mxu0 }
 0x59c   : > { %v1844_v35 = vpack.c.bf16 %v1830_v40, %v1830_v40  ;;  %v3197_v3 = vpop.f32.mrb[13].mxu0 }
 0x59d   : > { %v1833_v37 = vpop.f32.mrb[14].mxu0 }
 0x59e   : > { %v1862_v14 = vsel %vm1620_vm8, %v1844_v35, 0  ;;  %v3198_v5 = vpop.f32.mrb[15].mxu0  ;;  %3290 = vmatprep.subr.msk.bf16.mxu1 %vm1620_vm8, %v1844_v35 }
 0x59f   : > { %3200 = vmatpush3.bf16.msra.mxu1 %v1862_v14 }
 0x5a0   : > { %3291 = vmatprep.subr.msk.bf16.mxu1 %vm1620_vm8, %v1927_v57 }
 0x5a2   : > { %3202 = vmatmul.mubr.msk.bf16.vlgmr.msra.gmra.mrb[12].mxu1 %vm1607_vm9, %v3438_v51 }
 0x5a3   : > { %3206 = vmatpush3.bf16.msra.mxu1 %v1961_v38  ;;  %3207 = vmatprep.mubr.msk.bf16.mxu1 %vm1607_vm9, %v1940_v53 }
 0x5aa   : > { %3208 = vmatmul.mubr.msk.bf16.vlgmr.msra.gmra.mrb[16].mxu1 %vm1607_vm9, %v1941_v46 }
 0x5ab   : > { %3211 = vmatprep.mubr.msk.bf16.mxu1 %vm1607_vm9, %v1942_v7 }
 0x5b2   : > { %3212 = vmatmul.mubr.msk.bf16.gmra.mrb[20].mxu1 %vm1607_vm9, %v1943_v59 }
 0x675   : > { %v4867_v22 = vpop.f32.mrb[12].mxu1 }
 0x676   : > { %v4869_v42 = vpop.f32.mrb[13].mxu1 }
 0x677   : > { %v4871_v12 = vpop.f32.mrb[14].mxu1 }
 0x678   : > { %v4873_v2 = vpop.f32.mrb[15].mxu1 }
 0x67d   : > { %v3209_v6 = vpop.f32.mrb[16].mxu1 }
 0x67e   : > { %v1997_v44 = vpop.f32.mrb[17].mxu1  ;;  %v2034_v56 = vsel %vm401_vm3, %v3209_v6, -inf }
 0x67f   : > { %v3210_v31 = vpop.f32.mrb[18].mxu1  ;;  %v2028_v34 = vsel %vm401_vm3, %v1997_v44, -inf }
 0x680   : > { %2029 = vmax.xlane.f32.xlu1 %v2028_v34  ;;  %v2000_v63 = vpop.f32.mrb[19].mxu1  ;;  %v2037_v1 = vsel %vm401_vm3, %v3210_v31, -inf  ;;  %v5300_v34 = vmov 0  }
 0x681   : > { %v2031_v16 = vsel %vm401_vm3, %v2000_v63, -inf }
 0x684   : > { %2032 = vmax.xlane.f32.xlu1 %v2031_v16 }
 0x685   : > { %v3213_v39 = vpop.f32.mrb[20].mxu1 }
 0x686   : > { %v2013_v28 = vpop.f32.mrb[21].mxu1  ;;  %v2046_v27 = vsel %vm401_vm3, %v3213_v39, -inf }
 0x687   : > { %v3214_v10 = vpop.f32.mrb[22].mxu1  ;;  %v2040_v19 = vsel %vm401_vm3, %v2013_v28, -inf }
 0x688   : > { %2035 = vmax.xlane.f32.xlu1 %v2034_v56  ;;  %v2016_v17 = vpop.f32.mrb[23].mxu1  ;;  %v2049_v58 = vsel %vm401_vm3, %v3214_v10, -inf }
 0x689   : > { %v2043_v47 = vsel %vm401_vm3, %v2016_v17, -inf }
 0x68c   : > { %2038 = vmax.xlane.f32.xlu1 %v2037_v1 }
 0x690   : > { %2041 = vmax.xlane.f32.xlu1 %v2040_v19 }
 0x694   : > { %2044 = vmax.xlane.f32.xlu1 %v2043_v47 }
 0x698   : > { %2047 = vmax.xlane.f32.xlu1 %v2046_v27 }
 0x69c   : > { %2050 = vmax.xlane.f32.xlu1 %v2049_v58 }
 0x70d   : > { %v2030_v26 = vpop.xlane.xlu1 %2029 }
 0x70e   : > { %v2052_v24 = vsub.f32 %v1997_v44, %v2030_v26  ;;  %v2602_v44 = vld [vmem:[#allocation2 + $0x18] sm:$0xff] }
 0x710   : > { %v2060_v45 = vmul.f32 1.442695, %v2052_v24 }
 0x711   : > { %v2033_v20 = vpop.xlane.xlu1 %2032 }
 0x712   : > { %3477 = vpow2.f32 %v2060_v45  ;;  %v2053_v41 = vsub.f32 %v2000_v63, %v2033_v20  ;;  %v2262_v63 = vld [vmem:[#allocation2 + $0x10] sm:$0xff] }
 0x713   : > { %v2263_v16 = vpack.c.bf16 %v2262_v63, %v2262_v63 }
 0x714   : > { %v2062_v52 = vmul.f32 1.442695, %v2053_v41 }
 0x715   : > { %v2036_v29 = vpop.xlane.xlu1 %2035 }
 0x716   : > { %3479 = vpow2.f32 %v2062_v52  ;;  %v2054_v55 = vsub.f32 %v3209_v6, %v2036_v29 }
 0x718   : > { %v2064_v61 = vmul.f32 1.442695, %v2054_v55 }
 0x719   : > { %v2039_v32 = vpop.xlane.xlu1 %2038 }
 0x71a   : > { %3481 = vpow2.f32 %v2064_v61  ;;  %v2055_v43 = vsub.f32 %v3210_v31, %v2039_v32  ;;  %v2603_v31 = vpack.c.bf16 %v2602_v44, %v2602_v44 }
 0x71c   : > { %v3478_v48 = vpop.eup %3477  ;;  %v2066_v4 = vmul.f32 1.442695, %v2055_v43 }
 0x71d   : > { %v2042_v50 = vpop.xlane.xlu1 %2041  ;;  %v2076_v21 = vsel %vm401_vm3, %v3478_v48, 0.0 }
 0x71e   : > { %3483 = vpow2.f32 %v2066_v4  ;;  %v2056_v62 = vsub.f32 %v2013_v28, %v2042_v50  ;;  %2077 = vadd.xlane.f32.xlu1 %v2076_v21 }
 0x720   : > { %v3480_v8 = vpop.eup %3479  ;;  %v2068_v54 = vmul.f32 1.442695, %v2056_v62 }
 0x721   : > { %v2045_v11 = vpop.xlane.xlu1 %2044  ;;  %v2079_v33 = vsel %vm401_vm3, %v3480_v8, 0.0 }
 0x722   : > { %3485 = vpow2.f32 %v2068_v54  ;;  %v2057_v18 = vsub.f32 %v2016_v17, %v2045_v11  ;;  %2080 = vadd.xlane.f32.xlu1 %v2079_v33 }
 0x724   : > { %v3482_v13 = vpop.eup %3481  ;;  %v2070_v25 = vmul.f32 1.442695, %v2057_v18  ;;  %v2606_v18 = vld [vmem:[#allocation2 + $0x38] sm:$0xff] }
 0x725   : > { %v2048_v0 = vpop.xlane.xlu1 %2047  ;;  %v2082_v36 = vsel %vm401_vm3, %v3482_v13, 0.0 }
 0x726   : > { %3487 = vpow2.f32 %v2070_v25  ;;  %v2058_v40 = vsub.f32 %v3213_v39, %v2048_v0  ;;  %2083 = vadd.xlane.f32.xlu1 %v2082_v36  ;;  %v2607_v0 = vpack.c.bf16 %v2606_v18, %v2606_v18  ;;  %v1930_v36 = vld [vmem:[#allocation2 + $0x48] sm:$0xff] }
 0x728   : > { %v3484_v15 = vpop.eup %3483  ;;  %v2072_v35 = vmul.f32 1.442695, %v2058_v40  ;;  %v1931_v40 = vpack.c.bf16 %v1930_v36, %v1930_v36 }
 0x729   : > { %v2051_v3 = vpop.xlane.xlu1 %2050  ;;  %v2085_v37 = vsel %vm401_vm3, %v3484_v15, 0.0 }
 0x72a   : > { %3489 = vpow2.f32 %v2072_v35  ;;  %v2059_v14 = vsub.f32 %v3214_v10, %v2051_v3  ;;  %2086 = vadd.xlane.f32.xlu0 %v2085_v37  ;;  %v3439_v35 = vld [vmem:[%s5172_s3 + $0x10] sm:$0xff]  }
 0x72b   : > { %3229 = vmatprep.mubr.msk.bf16.mxu1 %vm1607_vm9, %v3439_v35 }
 0x72c   : > { %v3486_v5 = vpop.eup %3485  ;;  %v2074_v57 = vmul.f32 1.442695, %v2059_v14 }
 0x72d   : > { %v2088_v51 = vsel %vm401_vm3, %v3486_v5, 0.0 }
 0x72e   : > { %3491 = vpow2.f32 %v2074_v57  ;;  %2089 = vadd.xlane.f32.xlu1 %v2088_v51  ;;  %v2266_v51 = vld [vmem:[#allocation2 + $0x30] sm:$0xff] }
 0x72f   : > { %v2267_v44 = vpack.c.bf16 %v2266_v51, %v2266_v51 }
 0x730   : > { %v3488_v53 = vpop.eup %3487 }
 0x731   : > { %v2091_v38 = vsel %vm401_vm3, %v3488_v53, 0.0 }
 0x732   : > { %2092 = vadd.xlane.f32.xlu1 %v2091_v38 }
 0x734   : > { %v3490_v46 = vpop.eup %3489 }
 0x735   : > { %v2094_v7 = vsel %vm401_vm3, %v3490_v46, 0.0 }
 0x736   : > { %2095 = vadd.xlane.f32.xlu1 %v2094_v7 }
 0x738   : > { %v3492_v59 = vpop.eup %3491 }
 0x739   : > { %v2097_v6 = vsel %vm401_vm3, %v3492_v59, 0.0 }
 0x73a   : > { %2098 = vadd.xlane.f32.xlu1 %v2097_v6 }
 0x757   : > { %2612 = vxpose.xlu0.c.b16.start.end [1/1] (short) (narrow) %v2603_v31, 64  ;;  %v3440_v31 = vld [vmem:[%s5172_s3 + $0x18] sm:$0xff]  }
 0x760   : > { %3428 = vset.pattern.permute.xlu0 %v5300_v34 }
 0x767   : > { %2272 = vxpose.xlu1.c.b16.start.end [1/1] (short) (narrow) %v2263_v16, 64 }
 0x76b   : > { %3427 = vset.pattern.permute.xlu1 %v5300_v34  ;;  %v2301_v34 = vsel %vm1620_vm8, %v2267_v44, 0 }
 0x7ab   : > { %v2078_v39 = vpop.xlane.xlu1 %2077 }
 0x7ac   : > { %3493 = vrcp.f32 %v2078_v39 }
 0x7af   : > { %v2081_v28 = vpop.xlane.xlu1 %2080 }
 0x7b0   : > { %3495 = vrcp.f32 %v2081_v28 }
 0x7b3   : > { %v2084_v56 = vpop.xlane.xlu1 %2083 }
 0x7b4   : > { %3497 = vrcp.f32 %v2084_v56 }
 0x7b6   : > { %v3494_v17 = vpop.eup %3493 }
 0x7b7   : > { %v2087_v10 = vpop.xlane.xlu0 %2086  ;;  %v2108_v47 = vmul.f32 %v3494_v17, %v3478_v48 }
 0x7b8   : > { %3499 = vrcp.f32 %v2087_v10 }
 0x7ba   : > { %v3496_v1 = vpop.eup %3495 }
 0x7bb   : > { %v2090_v19 = vpop.xlane.xlu1 %2089  ;;  %v2109_v27 = vmul.f32 %v3496_v1, %v3480_v8 }
 0x7bc   : > { %3501 = vrcp.f32 %v2090_v19 }
 0x7bd   : > { %v2116_v58 = vpack.c.bf16 %v2109_v27, %v2108_v47  ;;  %v2620_v3 = vpop.trf.xlu0 }
 0x7be   : > { %v3498_v45 = vpop.eup %3497 }
 0x7bf   : > { %v2093_v26 = vpop.xlane.xlu1 %2092  ;;  %v2124_v24 = vsel %vm401_vm3, %v2116_v58, 0  ;;  %v2110_v52 = vmul.f32 %v3498_v45, %v3482_v13 }
 0x7c0   : > { %3503 = vrcp.f32 %v2093_v26  ;;  %3216 = vmatpush3.bf16.xpose.msra.mxu0 %v2124_v24 }
 0x7c1   : > { %3217 = vmatprep.subr.bf16.mxu0 %v5299_v23  ;;  %v2621_v37 = vpop.trf.xlu0 }
 0x7c2   : > { %v3500_v20 = vpop.eup %3499 }
 0x7c3   : > { %v2096_v41 = vpop.xlane.xlu1 %2095  ;;  %v2111_v29 = vmul.f32 %v3500_v20, %v3484_v15  ;;  %v2641_v15 = vsel %vm1620_vm8, %v2607_v0, 0 }
 0x7c4   : > { %3505 = vrcp.f32 %v2096_v41 }
 0x7c5   : > { %v2117_v55 = vpack.c.bf16 %v2111_v29, %v2110_v52  ;;  %v2622_v14 = vpop.trf.xlu0 }
 0x7c6   : > { %v3502_v43 = vpop.eup %3501 }
 0x7c7   : > { %v2099_v61 = vpop.xlane.xlu1 %2098  ;;  %v2127_v32 = vsel %vm401_vm3, %v2117_v55, 0  ;;  %v2112_v4 = vmul.f32 %v3502_v43, %v3486_v5 }
 0x7c8   : > { %3507 = vrcp.f32 %v2099_v61  ;;  %3218 = vmatpush3.bf16.xpose.msra.mxu0 %v2127_v32 }
 0x7c9   : > { %3219 = vmatprep.subr.bf16.mxu0 %v5299_v23  ;;  %v2623_v5 = vpop.trf.xlu0 }
 0x7ca   : > { %v3504_v48 = vpop.eup %3503 }
 0x7cb   : > { %v2113_v50 = vmul.f32 %v3504_v48, %v3488_v53 }
 0x7cd   : > { %v2118_v21 = vpack.c.bf16 %v2113_v50, %v2112_v4  ;;  %v2280_v7 = vpop.trf.xlu1 }
 0x7ce   : > { %v3506_v8 = vpop.eup %3505 }
 0x7cf   : > { %v2130_v62 = vsel %vm401_vm3, %v2118_v21, 0  ;;  %v2114_v11 = vmul.f32 %v3506_v8, %v3490_v46 }
 0x7d0   : > { %3220 = vmatpush3.bf16.xpose.msra.mxu0 %v2130_v62 }
 0x7d1   : > { %3221 = vmatprep.subr.bf16.mxu0 %v5299_v23  ;;  %v2281_v63 = vpop.trf.xlu1 }
 0x7d2   : > { %v3508_v54 = vpop.eup %3507 }
 0x7d3   : > { %v2115_v33 = vmul.f32 %v3508_v54, %v3492_v59 }
 0x7d5   : > { %v2119_v13 = vpack.c.bf16 %v2115_v33, %v2114_v11  ;;  %v2282_v16 = vpop.trf.xlu1 }
 0x7d7   : > { %v2133_v25 = vsel %vm401_vm3, %v2119_v13, 0 }
 0x7d8   : > { %3222 = vmatpush3.bf16.xpose.msra.mxu0 %v2133_v25 }
 0x7d9   : > { %3295 = vmatprep.subr.msk.bf16.mxu0 %vm1620_vm8, %v2607_v0  ;;  %v2283_v39 = vpop.trf.xlu1 }
 0x7df   : > { %3224 = vmatmul.mubr.msk.bf16.vlgmr.msra.gmra.mrb[16].mxu0 %vm401_vm3, %v1931_v40 }
 0x7e0   : > { %3262 = vmatpush3.bf16.msra.mxu0 %v2641_v15  ;;  %3263 = vmatprep.mubr.msk.bf16.mxu0 %vm1607_vm9, %v2620_v3 }
 0x7e1   : > { %3271 = vmatprep.subr.bf16.mxu0 %v5299_v23 }
 0x7e7   : > { %3264 = vmatmul.mubr.msk.bf16.vlgmr.msra.gmra.mrb[20].mxu0 %vm1607_vm9, %v2621_v37 }
 0x7e8   : > { %3267 = vmatprep.mubr.msk.bf16.mxu0 %vm1607_vm9, %v2622_v14 }
 0x7ef   : > { %3268 = vmatmul.mubr.msk.bf16.gmra.mrb[24].mxu0 %vm1607_vm9, %v2623_v5 }
 0x7f0   : > { %3279 = vmatprep.mubr.msk.bf16.mxu0 %vm3637_vm10, %v5299_v23 }
 0x8b2   : > { %v2169_v57 = vpop.f32.mrb[16].mxu0 }
 0x8b3   : > { %v2184_v53 = vpack.c.bf16 %v2169_v57, %v2169_v57  ;;  %v3225_v38 = vpop.f32.mrb[17].mxu0 }
 0x8b4   : > { %v2172_v46 = vpop.f32.mrb[18].mxu0 }
 0x8b5   : > { %v2202_v59 = vsel %vm1620_vm8, %v2184_v53, 0  ;;  %v3226_v6 = vpop.f32.mrb[19].mxu0  ;;  %3292 = vmatprep.subr.msk.bf16.mxu1 %vm1620_vm8, %v2184_v53 }
 0x8b6   : > { %3228 = vmatpush3.bf16.msra.mxu1 %v2202_v59 }
 0x8b7   : > { %3293 = vmatprep.subr.msk.bf16.mxu1 %vm1620_vm8, %v2267_v44 }
 0x8b9   : > { %3230 = vmatmul.mubr.msk.bf16.vlgmr.msra.gmra.mrb[24].mxu1 %vm1607_vm9, %v3440_v31 }
 0x8ba   : > { %3234 = vmatpush3.bf16.msra.mxu1 %v2301_v34  ;;  %3235 = vmatprep.mubr.msk.bf16.mxu1 %vm1607_vm9, %v2280_v7  ;;  %v4929_v28 = vpop.f32.mrb[20].mxu0 }
 0x8bb   : > { %3243 = vmatprep.subr.bf16.mxu1 %v5299_v23  ;;  %v4931_v56 = vpop.f32.mrb[21].mxu0  ;;  %v2714_v13 = vsel %vm401_vm3, %v4929_v28, -inf }
 0x8bc   : > { %v4933_v10 = vpop.f32.mrb[22].mxu0  ;;  %v2708_v54 = vsel %vm401_vm3, %v4931_v56, -inf }
 0x8bd   : > { %v4935_v17 = vpop.f32.mrb[23].mxu0  ;;  %v2717_v11 = vsel %vm401_vm3, %v4933_v10, -inf }
 0x8be   : > { %v2711_v43 = vsel %vm401_vm3, %v4935_v17, -inf }
 0x8c1   : > { %3236 = vmatmul.mubr.msk.bf16.vlgmr.msra.gmra.mrb[28].mxu1 %vm1607_vm9, %v2281_v63 }
 0x8c2   : > { %3239 = vmatprep.mubr.msk.bf16.mxu1 %vm1607_vm9, %v2282_v16  ;;  %v4937_v1 = vpop.f32.mrb[24].mxu0 }
 0x8c3   : > { %v4939_v19 = vpop.f32.mrb[25].mxu0  ;;  %v2726_v15 = vsel %vm401_vm3, %v4937_v1, -inf }
 0x8c4   : > { %v4941_v47 = vpop.f32.mrb[26].mxu0  ;;  %v2720_v40 = vsel %vm401_vm3, %v4939_v19, -inf }
 0x8c5   : > { %v4943_v27 = vpop.f32.mrb[27].mxu0  ;;  %v2729_v36 = vsel %vm401_vm3, %v4941_v47, -inf }
 0x8c6   : > { %v2723_v25 = vsel %vm401_vm3, %v4943_v27, -inf }
 0x8c9   : > { %3240 = vmatmul.mubr.msk.bf16.gmra.mrb[32].mxu1 %vm1607_vm9, %v2283_v39 }
 0x8ca   : > { %3251 = vmatprep.mubr.msk.bf16.mxu1 %vm3637_vm10, %v5299_v23 }
 0x98c   : > { %v4945_v58 = vpop.f32.mrb[24].mxu1 }
 0x98d   : > { %v4947_v26 = vpop.f32.mrb[25].mxu1 }
 0x98e   : > { %v4949_v24 = vpop.f32.mrb[26].mxu1 }
 0x98f   : > { %v4951_v45 = vpop.f32.mrb[27].mxu1 }
 0x994   : > { %v3237_v20 = vpop.f32.mrb[28].mxu1 }
 0x995   : > { %v2337_v41 = vpop.f32.mrb[29].mxu1  ;;  %v2374_v32 = vsel %vm401_vm3, %v3237_v20, -inf }
 0x996   : > { %v3238_v52 = vpop.f32.mrb[30].mxu1  ;;  %v2368_v29 = vsel %vm401_vm3, %v2337_v41, -inf }
 0x997   : > { %2369 = vmax.xlane.f32.xlu1 %v2368_v29  ;;  %v2340_v55 = vpop.f32.mrb[31].mxu1  ;;  %v2377_v21 = vsel %vm401_vm3, %v3238_v52, -inf }
 0x998   : > { %v2371_v61 = vsel %vm401_vm3, %v2340_v55, -inf }
 0x999   : > { %2372 = vmax.xlane.f32.xlu0 %v2371_v61 }
 0x99b   : > { %2375 = vmax.xlane.f32.xlu1 %v2374_v32 }
 0x99c   : > { %v4958_v48 = vpop.f32.mrb[32].mxu1 }
 0x99d   : > { %v4960_v4 = vpop.f32.mrb[33].mxu1  ;;  %2712 = vmax.xlane.f32.xlu0 %v2711_v43  ;;  %v2386_v0 = vsel %vm401_vm3, %v4958_v48, -inf }
 0x99e   : > { %v4962_v50 = vpop.f32.mrb[34].mxu1  ;;  %v2380_v33 = vsel %vm401_vm3, %v4960_v4, -inf }
 0x99f   : > { %2378 = vmax.xlane.f32.xlu1 %v2377_v21  ;;  %v2356_v62 = vpop.f32.mrb[35].mxu1  ;;  %v2389_v18 = vsel %vm401_vm3, %v4962_v50, -inf }
 0x9a0   : > { %v2383_v8 = vsel %vm401_vm3, %v2356_v62, -inf }
 0x9a1   : > { %2384 = vmax.xlane.f32.xlu0 %v2383_v8 }
 0x9a3   : > { %2709 = vmax.xlane.f32.xlu1 %v2708_v54 }
 0x9a5   : > { %2718 = vmax.xlane.f32.xlu0 %v2717_v11 }
 0x9a7   : > { %2381 = vmax.xlane.f32.xlu1 %v2380_v33 }
 0x9a9   : > { %2390 = vmax.xlane.f32.xlu0 %v2389_v18 }
 0x9ab   : > { %2715 = vmax.xlane.f32.xlu1 %v2714_v13 }
 0x9ad   : > { %2724 = vmax.xlane.f32.xlu0 %v2723_v25 }
 0x9af   : > { %2387 = vmax.xlane.f32.xlu1 %v2386_v0 }
 0x9b1   : > { %2730 = vmax.xlane.f32.xlu0 %v2729_v36 }
 0x9b3   : > { %2721 = vmax.xlane.f32.xlu1 %v2720_v40 }
 0x9b7   : > { %2727 = vmax.xlane.f32.xlu1 %v2726_v15 }
 0xa24   : > { %v2370_v35 = vpop.xlane.xlu1 %2369 }
 0xa25   : > { %v2392_v3 = vsub.f32 %v2337_v41, %v2370_v35 }
 0xa26   : > { %v2373_v37 = vpop.xlane.xlu0 %2372 }
 0xa27   : > { %v2400_v14 = vmul.f32 1.442695, %v2392_v3  ;;  %v2393_v5 = vsub.f32 %v2340_v55, %v2373_v37 }
 0xa28   : > { %v2376_v57 = vpop.xlane.xlu1 %2375 }
 0xa29   : > { %3509 = vpow2.f32 %v2400_v14  ;;  %v2402_v51 = vmul.f32 1.442695, %v2393_v5  ;;  %v2394_v53 = vsub.f32 %v3237_v20, %v2376_v57 }
 0xa2a   : > { %v2713_v38 = vpop.xlane.xlu0 %2712 }
 0xa2b   : > { %3511 = vpow2.f32 %v2402_v51  ;;  %v2404_v46 = vmul.f32 1.442695, %v2394_v53  ;;  %v2733_v7 = vsub.f32 %v4935_v17, %v2713_v38 }
 0xa2c   : > { %v2379_v59 = vpop.xlane.xlu1 %2378 }
 0xa2d   : > { %3513 = vpow2.f32 %v2404_v46  ;;  %v2395_v6 = vsub.f32 %v3238_v52, %v2379_v59  ;;  %v2742_v31 = vmul.f32 1.442695, %v2733_v7 }
 0xa2e   : > { %v2385_v44 = vpop.xlane.xlu0 %2384 }
 0xa2f   : > { %v2406_v34 = vmul.f32 1.442695, %v2395_v6  ;;  %v2397_v63 = vsub.f32 %v2356_v62, %v2385_v44 }
 0xa30   : > { %v2710_v16 = vpop.xlane.xlu1 %2709 }
 0xa31   : > { %3515 = vpow2.f32 %v2406_v34  ;;  %v2732_v39 = vsub.f32 %v4931_v56, %v2710_v16  ;;  %v2410_v20 = vmul.f32 1.442695, %v2397_v63 }
 0xa32   : > { %v2719_v41 = vpop.xlane.xlu0 %2718  ;;  %3517 = vpow2.f32 %v2742_v31 }
 0xa33   : > { %v4988_v29 = vpop.eup %3509  ;;  %v2740_v55 = vmul.f32 1.442695, %v2732_v39  ;;  %v2735_v61 = vsub.f32 %v4933_v10, %v2719_v41 }
 0xa34   : > { %v2382_v17 = vpop.xlane.xlu1 %2381  ;;  %v2416_v52 = vsel %vm401_vm3, %v4988_v29, 0.0 }
 0xa35   : > { %v4993_v32 = vpop.eup %3511  ;;  %3519 = vpow2.f32 %v2740_v55  ;;  %v2396_v43 = vsub.f32 %v4960_v4, %v2382_v17  ;;  %2417 = vadd.xlane.f32.xlu1 %v2416_v52  ;;  %v2746_v8 = vmul.f32 1.442695, %v2735_v61 }
 0xa36   : > { %v2391_v21 = vpop.xlane.xlu0 %2390  ;;  %v2419_v56 = vsel %vm401_vm3, %v4993_v32, 0.0  ;;  %3521 = vpow2.f32 %v2410_v20 }
 0xa37   : > { %v4998_v62 = vpop.eup %3513  ;;  %v2408_v54 = vmul.f32 1.442695, %v2396_v43  ;;  %v2399_v10 = vsub.f32 %v4962_v50, %v2391_v21  ;;  %2420 = vadd.xlane.f32.xlu0 %v2419_v56 }
 0xa38   : > { %v2716_v11 = vpop.xlane.xlu1 %2715  ;;  %v2422_v33 = vsel %vm401_vm3, %v4998_v62, 0.0 }
 0xa39   : > { %3523 = vpow2.f32 %v2408_v54  ;;  %v2734_v4 = vsub.f32 %v4929_v28, %v2716_v11  ;;  %2423 = vadd.xlane.f32.xlu1 %v2422_v33  ;;  %v2414_v25 = vmul.f32 1.442695, %v2399_v10  ;;  %v1488_v54 = vld [vmem:[%s5174_s5] sm:$0xff]  ;;  %v1490_v10 = vld [vmem:[%s5174_s5 + $0x10] sm:$0xff]  ;;  %v1489_v11 = vld [vmem:[%s5174_s5 + $0x8] sm:$0xff] }
 0xa3a   : > { %v2725_v18 = vpop.xlane.xlu0 %2724  ;;  %3525 = vpow2.f32 %v2746_v8  ;;  %v1491_v33 = vld [vmem:[%s5174_s5 + $0x18] sm:$0xff] }
 0xa3b   : > { %v5004_v13 = vpop.eup %3515  ;;  %v2744_v0 = vmul.f32 1.442695, %v2734_v4  ;;  %v2737_v36 = vsub.f32 %v4943_v27, %v2725_v18 }
 0xa3c   : > { %v2388_v40 = vpop.xlane.xlu1 %2387  ;;  %v2425_v50 = vsel %vm401_vm3, %v5004_v13, 0.0  ;;  %v5009_v15 = vpop.eup %3517 }
 0xa3d   : > { %3527 = vpow2.f32 %v2744_v0  ;;  %v2398_v35 = vsub.f32 %v4958_v48, %v2388_v40  ;;  %2426 = vadd.xlane.f32.xlu0 %v2425_v50  ;;  %v2750_v37 = vmul.f32 1.442695, %v2737_v36  ;;  %v2759_v51 = vsel %vm401_vm3, %v5009_v15, 0.0 }
 0xa3e   : > { %v2731_v28 = vpop.xlane.xlu0 %2730  ;;  %3529 = vpow2.f32 %v2414_v25 }
 0xa3f   : > { %v5012_v3 = vpop.eup %3519  ;;  %v2412_v14 = vmul.f32 1.442695, %v2398_v35  ;;  %v2739_v5 = vsub.f32 %v4941_v47, %v2731_v28 }
 0xa40   : > { %v2722_v57 = vpop.xlane.xlu1 %2721  ;;  %v2756_v27 = vsel %vm401_vm3, %v5012_v3, 0.0  ;;  %v5019_v53 = vpop.eup %3521 }
 0xa41   : > { %3531 = vpow2.f32 %v2412_v14  ;;  %v2736_v48 = vsub.f32 %v4939_v19, %v2722_v57  ;;  %2757 = vadd.xlane.f32.xlu1 %v2756_v27  ;;  %2760 = vadd.xlane.f32.xlu0 %v2759_v51  ;;  %v2754_v46 = vmul.f32 1.442695, %v2739_v5  ;;  %v2431_v6 = vsel %vm401_vm3, %v5019_v53, 0.0 }
 0xa42   : > { %3533 = vpow2.f32 %v2750_v37 }
 0xa43   : > { %v5022_v38 = vpop.eup %3523  ;;  %v2748_v7 = vmul.f32 1.442695, %v2736_v48 }
 0xa44   : > { %v2728_v47 = vpop.xlane.xlu1 %2727  ;;  %v2428_v59 = vsel %vm401_vm3, %v5022_v38, 0.0  ;;  %v5028_v44 = vpop.eup %3525 }
 0xa45   : > { %3535 = vpow2.f32 %v2748_v7  ;;  %v2738_v31 = vsub.f32 %v4937_v1, %v2728_v47  ;;  %2429 = vadd.xlane.f32.xlu1 %v2428_v59  ;;  %2432 = vadd.xlane.f32.xlu0 %v2431_v6  ;;  %v2765_v16 = vsel %vm401_vm3, %v5028_v44, 0.0 }
 0xa46   : > { %3537 = vpow2.f32 %v2754_v46 }
 0xa47   : > { %v5031_v19 = vpop.eup %3527  ;;  %v2752_v34 = vmul.f32 1.442695, %v2738_v31 }
 0xa48   : > { %v2762_v63 = vsel %vm401_vm3, %v5031_v19, 0.0  ;;  %v5037_v39 = vpop.eup %3529 }
 0xa49   : > { %3539 = vpow2.f32 %v2752_v34  ;;  %2763 = vadd.xlane.f32.xlu1 %v2762_v63  ;;  %2766 = vadd.xlane.f32.xlu0 %v2765_v16  ;;  %v2437_v20 = vsel %vm401_vm3, %v5037_v39, 0.0 }
 0xa4b   : > { %v5039_v41 = vpop.eup %3531 }
 0xa4c   : > { %v2434_v1 = vsel %vm401_vm3, %v5039_v41, 0.0  ;;  %v5045_v55 = vpop.eup %3533 }
 0xa4d   : > { %2435 = vadd.xlane.f32.xlu1 %v2434_v1  ;;  %2438 = vadd.xlane.f32.xlu0 %v2437_v20  ;;  %v2771_v52 = vsel %vm401_vm3, %v5045_v55, 0.0 }
 0xa4f   : > { %v5047_v61 = vpop.eup %3535 }
 0xa50   : > { %v2768_v17 = vsel %vm401_vm3, %v5047_v61, 0.0  ;;  %v5053_v43 = vpop.eup %3537 }
 0xa51   : > { %2769 = vadd.xlane.f32.xlu1 %v2768_v17  ;;  %2772 = vadd.xlane.f32.xlu0 %v2771_v52  ;;  %v2777_v8 = vsel %vm401_vm3, %v5053_v43, 0.0 }
 0xa53   : > { %v5055_v21 = vpop.eup %3539 }
 0xa54   : > { %v2774_v56 = vsel %vm401_vm3, %v5055_v21, 0.0 }
 0xa55   : > { %2775 = vadd.xlane.f32.xlu1 %v2774_v56  ;;  %2778 = vadd.xlane.f32.xlu0 %v2777_v8 }
 0xa66   : > { %1494 = vperm.xlu1 %3427, %v1488_v54  }
 0xa6a   : > { %1504 = vperm.xlu1 %3427, %v1490_v10  }
 0xa6b   : > { %1499 = vperm.xlu0 %3428, %v1489_v11  }
 0xa6e   : > { %1509 = vperm.xlu1 %3427, %v1491_v33  }
 0xac2   : > { %v2418_v4 = vpop.xlane.xlu1 %2417 }
 0xac3   : > { %3541 = vrcp.f32 %v2418_v4 }
 0xac4   : > { %v2421_v18 = vpop.xlane.xlu0 %2420 }
 0xac5   : > { %3543 = vrcp.f32 %v2421_v18 }
 0xac6   : > { %v2424_v25 = vpop.xlane.xlu1 %2423 }
 0xac7   : > { %3545 = vrcp.f32 %v2424_v25 }
 0xaca   : > { %v2427_v0 = vpop.xlane.xlu0 %2426 }
 0xacb   : > { %3547 = vrcp.f32 %v2427_v0 }
 0xacd   : > { %v3542_v36 = vpop.eup %3541 }
 0xace   : > { %v2758_v40 = vpop.xlane.xlu1 %2757  ;;  %v2761_v50 = vpop.xlane.xlu0 %2760  ;;  %v2448_v28 = vmul.f32 %v3542_v36, %v4988_v29 }
 0xacf   : > { %v3544_v35 = vpop.eup %3543  ;;  %3549 = vrcp.f32 %v2758_v40 }
 0xad0   : > { %3551 = vrcp.f32 %v2761_v50  ;;  %v2449_v37 = vmul.f32 %v3544_v35, %v4993_v32 }
 0xad1   : > { %v3546_v27 = vpop.eup %3545 }
 0xad2   : > { %v2430_v14 = vpop.xlane.xlu1 %2429  ;;  %v2433_v5 = vpop.xlane.xlu0 %2432  ;;  %v2456_v57 = vpack.c.bf16 %v2449_v37, %v2448_v28  ;;  %v2450_v47 = vmul.f32 %v3546_v27, %v4998_v62 }
 0xad3   : > { %3553 = vrcp.f32 %v2430_v14 }
 0xad4   : > { %3555 = vrcp.f32 %v2433_v5  ;;  %v2464_v51 = vsel %vm401_vm3, %v2456_v57, 0 }
 0xad5   : > { %v3548_v48 = vpop.eup %3547  ;;  %3244 = vmatpush3.bf16.xpose.msra.mxu1 %v2464_v51 }
 0xad6   : > { %v2764_v46 = vpop.xlane.xlu1 %2763  ;;  %v2767_v7 = vpop.xlane.xlu0 %2766  ;;  %3245 = vmatprep.subr.bf16.mxu1 %v5299_v23  ;;  %v2451_v29 = vmul.f32 %v3548_v48, %v5004_v13 }
 0xad7   : > { %3557 = vrcp.f32 %v2764_v46 }
 0xad8   : > { %3559 = vrcp.f32 %v2767_v7  ;;  %v2457_v32 = vpack.c.bf16 %v2451_v29, %v2450_v47 }
 0xad9   : > { %v3550_v59 = vpop.eup %3549 }
 0xada   : > { %v3552_v6 = vpop.eup %3551  ;;  %v2436_v31 = vpop.xlane.xlu1 %2435  ;;  %v2788_v63 = vmul.f32 %v3550_v59, %v5012_v3  ;;  %v2467_v1 = vsel %vm401_vm3, %v2457_v32, 0 }
 0xadb   : > { %v2439_v34 = vpop.xlane.xlu0 %2438  ;;  %3561 = vrcp.f32 %v2436_v31  ;;  %v2789_v16 = vmul.f32 %v3552_v6, %v5009_v15 }
 0xadc   : > { %3563 = vrcp.f32 %v2439_v34 }
 0xadd   : > { %v3554_v20 = vpop.eup %3553  ;;  %3246 = vmatpush3.bf16.xpose.msra.mxu1 %v2467_v1  ;;  %v2796_v62 = vpack.c.bf16 %v2789_v16, %v2788_v63  ;;  %v2610_v63 = vld [vmem:[#allocation2 + $0x58] sm:$0xff] }
 0xade   : > { %v3556_v17 = vpop.eup %3555  ;;  %v2770_v13 = vpop.xlane.xlu1 %2769  ;;  %3247 = vmatprep.subr.bf16.mxu1 %v5299_v23  ;;  %v2452_v56 = vmul.f32 %v3554_v20, %v5022_v38  ;;  %v2611_v20 = vpack.c.bf16 %v2610_v63, %v2610_v63 }
 0xadf   : > { %v2773_v52 = vpop.xlane.xlu0 %2772  ;;  %3565 = vrcp.f32 %v2770_v13  ;;  %v2804_v8 = vsel %vm401_vm3, %v2796_v62, 0  ;;  %v2453_v3 = vmul.f32 %v3556_v17, %v5019_v53 }
 0xae0   : > { %3567 = vrcp.f32 %v2773_v52  ;;  %3272 = vmatpush3.bf16.xpose.msra.mxu0 %v2804_v8 }
 0xae1   : > { %v3558_v15 = vpop.eup %3557  ;;  %v2458_v54 = vpack.c.bf16 %v2453_v3, %v2452_v56  ;;  %3273 = vmatprep.subr.bf16.mxu0 %v5299_v23 }
 0xae2   : > { %v3560_v10 = vpop.eup %3559  ;;  %v2776_v11 = vpop.xlane.xlu1 %2775  ;;  %v2790_v4 = vmul.f32 %v3558_v15, %v5031_v19  ;;  %v3443_v15 = vld [vmem:[%s5172_s3 + $0x30] sm:$0xff]  }
 0xae3   : > { %v2779_v33 = vpop.xlane.xlu0 %2778  ;;  %3569 = vrcp.f32 %v2776_v11  ;;  %v2791_v18 = vmul.f32 %v3560_v10, %v5028_v44  ;;  %v2470_v38 = vsel %vm401_vm3, %v2458_v54, 0 }
 0xae4   : > { %3571 = vrcp.f32 %v2779_v33 }
 0xae5   : > { %v3562_v25 = vpop.eup %3561  ;;  %3248 = vmatpush3.bf16.xpose.msra.mxu1 %v2470_v38  ;;  %v2797_v53 = vpack.c.bf16 %v2791_v18, %v2790_v4  ;;  %v3444_v38 = vld [vmem:[%s5172_s3 + $0x38] sm:$0xff]  }
 0xae6   : > { %v3564_v0 = vpop.eup %3563  ;;  %v1495_v36 = vpop.permute.xlu1 %1494  ;;  %3249 = vmatprep.subr.bf16.mxu1 %v5299_v23  ;;  %v2454_v40 = vmul.f32 %v3562_v25, %v5039_v41 }
 0xae7   : > { %v1563_v50 = vadd.f32 %v4804_v30, %v1495_v36  ;;  %v2807_v35 = vsel %vm401_vm3, %v2797_v53, 0  ;;  %v2455_v19 = vmul.f32 %v3564_v0, %v5037_v39 }
 0xae8   : > { %3274 = vmatpush3.bf16.xpose.msra.mxu0 %v2807_v35 }
 0xae9   : > { %v3566_v44 = vpop.eup %3565  ;;  %1577 = vst.msk [vmem:[#allocation3] sm:$0xff] %vm401_vm3, %v1563_v50  ;;  %v2459_v28 = vpack.c.bf16 %v2455_v19, %v2454_v40  ;;  %3275 = vmatprep.subr.bf16.mxu0 %v5299_v23 }
 0xaea   : > { %v3568_v37 = vpop.eup %3567  ;;  %v1505_v14 = vpop.permute.xlu1 %1504  ;;  %v2792_v57 = vmul.f32 %v3566_v44, %v5047_v61 }
 0xaeb   : > { %v1500_v5 = vpop.permute.xlu0 %1499  ;;  %v1571_v41 = vadd.f32 %v4802_v60, %v1505_v14  ;;  %v2793_v27 = vmul.f32 %v3568_v37, %v5045_v55  ;;  %v2473_v39 = vsel %vm401_vm3, %v2459_v28, 0  ;;  %v2270_v60 = vld [vmem:[#allocation2 + $0x50] sm:$0xff] }
 0xaec   : > { %v1566_v30 = vadd.f32 %v4808_v9, %v1500_v5  ;;  %v2271_v59 = vpack.c.bf16 %v2270_v60, %v2270_v60 }
 0xaed   : > { %v3570_v51 = vpop.eup %3569  ;;  %1579 = vst.msk [vmem:[#allocation3 + $0x10] sm:$0xff] %vm401_vm3, %v1571_v41  ;;  %3250 = vmatpush3.bf16.xpose.msra.mxu1 %v2473_v39  ;;  %v2798_v48 = vpack.c.bf16 %v2793_v27, %v2792_v57 }
 0xaee   : > { %1578 = vst.msk [vmem:[#allocation3 + $0x8] sm:$0xff] %vm401_vm3, %v1566_v30  ;;  %v3572_v46 = vpop.eup %3571  ;;  %v1510_v7 = vpop.permute.xlu1 %1509  ;;  %v2794_v9 = vmul.f32 %v3570_v51, %v5055_v21 }
 0xaef   : > { %v1574_v47 = vadd.f32 %v4806_v49, %v1510_v7  ;;  %v2810_v61 = vsel %vm401_vm3, %v2798_v48, 0  ;;  %v2795_v55 = vmul.f32 %v3572_v46, %v5053_v43 }
 0xaf0   : > { %v1836_v29 = vld [vmem:[#allocation3] sm:$0xff]  ;;  %3276 = vmatpush3.bf16.xpose.msra.mxu0 %v2810_v61 }
 0xaf1   : > { %v1913_v32 = vadd.f32 %v4869_v42, %v1836_v29  ;;  %1580 = vst.msk [vmem:[#allocation3 + $0x18] sm:$0xff] %vm401_vm3, %v1574_v47  ;;  %3277 = vmatprep.subr.bf16.mxu0 %v5299_v23  ;;  %v2799_v6 = vpack.c.bf16 %v2795_v55, %v2794_v9 }
 0xaf3   : > { %1917 = vst.msk [vmem:[#allocation3] sm:$0xff] %vm401_vm3, %v1913_v32  ;;  %v2813_v42 = vsel %vm401_vm3, %v2799_v6, 0 }
 0xaf4   : > { %v1838_v49 = vld [vmem:[#allocation3 + $0x10] sm:$0xff]  ;;  %3252 = vmatmul.mubr.msk.bf16.vlgmr.msra.gmra.mrb[36].mxu1 %vm401_vm3, %v2271_v59 }
 0xaf5   : > { %v1837_v31 = vld [vmem:[#allocation3 + $0x8] sm:$0xff]  ;;  %v1915_v21 = vadd.f32 %v4867_v22, %v1838_v49 }
 0xaf6   : > { %v1914_v43 = vadd.f32 %v4873_v2, %v1837_v31 }
 0xaf7   : > { %1919 = vst.msk [vmem:[#allocation3 + $0x10] sm:$0xff] %vm401_vm3, %v1915_v21 }
 0xaf8   : > { %1918 = vst.msk [vmem:[#allocation3 + $0x8] sm:$0xff] %vm401_vm3, %v1914_v43  ;;  %v1839_v34 = vld [vmem:[#allocation3 + $0x18] sm:$0xff]  ;;  %3278 = vmatpush3.bf16.xpose.msra.mxu0 %v2813_v42 }
 0xaf9   : > { %v1916_v23 = vadd.f32 %v4871_v12, %v1839_v34 }
 0xafa   : > { %v2175_v16 = vld [vmem:[#allocation3] sm:$0xff] }
 0xafb   : > { %1920 = vst.msk [vmem:[#allocation3 + $0x18] sm:$0xff] %vm401_vm3, %v1916_v23  ;;  %v2253_v1 = vadd.f32 %v4947_v26, %v2175_v16  ;;  %v3441_v26 = vld [vmem:[%s5172_s3 + $0x20] sm:$0xff]  }
 0xafc   : > { %3257 = vmatprep.mubr.msk.bf16.mxu1 %vm1607_vm9, %v3441_v26 }
 0xafd   : > { %2257 = vst.msk [vmem:[#allocation3] sm:$0xff] %vm401_vm3, %v2253_v1 }
 0xafe   : > { %v2177_v22 = vld [vmem:[#allocation3 + $0x10] sm:$0xff] }
 0xaff   : > { %v2176_v2 = vld [vmem:[#allocation3 + $0x8] sm:$0xff]  ;;  %3280 = vmatmul.mubr.msk.bf16.vlgmr.msra.gmra.mrb[28].mxu0 %vm401_vm3, %v2611_v20  ;;  %v2255_v62 = vadd.f32 %v4945_v58, %v2177_v22 }
 0xb00   : > { %v2254_v17 = vadd.f32 %v4951_v45, %v2176_v2 }
 0xb01   : > { %2259 = vst.msk [vmem:[#allocation3 + $0x10] sm:$0xff] %vm401_vm3, %v2255_v62 }
 0xb02   : > { %2258 = vst.msk [vmem:[#allocation3 + $0x8] sm:$0xff] %vm401_vm3, %v2254_v17  ;;  %v2178_v12 = vld [vmem:[#allocation3 + $0x18] sm:$0xff] }
 0xb03   : > { %v2256_v13 = vadd.f32 %v4949_v24, %v2178_v12  ;;  %v3442_v24 = vld [vmem:[%s5172_s3 + $0x28] sm:$0xff]  }
 0xb04   : > { %v2515_v36 = vld [vmem:[#allocation3] sm:$0xff] }
 0xb05   : > { %2260 = vst.msk [vmem:[#allocation3 + $0x18] sm:$0xff] %vm401_vm3, %v2256_v13 }
 0xb08   : > { %v2517_v25 = vld [vmem:[#allocation3 + $0x10] sm:$0xff] }
 0xb09   : > { %v2516_v28 = vld [vmem:[#allocation3 + $0x8] sm:$0xff] }
 0xb0c   : > { %v2518_v35 = vld [vmem:[#allocation3 + $0x18] sm:$0xff] }
 0xbc7   : > { %v2509_v52 = vpop.f32.mrb[36].mxu1 }
 0xbc8   : > { %v2524_v56 = vpack.c.bf16 %v2509_v52, %v2509_v52  ;;  %v3253_v58 = vpop.f32.mrb[37].mxu1 }
 0xbc9   : > { %v2512_v8 = vpop.f32.mrb[38].mxu1 }
 0xbca   : > { %v2542_v45 = vsel %vm1620_vm8, %v2524_v56, 0  ;;  %v3254_v3 = vpop.f32.mrb[39].mxu1  ;;  %3294 = vmatprep.subr.msk.bf16.mxu1 %vm1620_vm8, %v2524_v56 }
 0xbcb   : > { %3256 = vmatpush3.bf16.msra.mxu1 %v2542_v45 }
 0xbce   : > { %3258 = vmatmul.mubr.msk.bf16.vlgmr.msra.gmra.mrb[40].mxu1 %vm1607_vm9, %v3442_v24 }
 0xbcf   : > { %3285 = vmatprep.mubr.msk.bf16.mxu1 %vm1607_vm9, %v3443_v15 }
 0xbd2   : > { %v2849_v54 = vpop.f32.mrb[28].mxu0 }
 0xbd3   : > { %v2864_v10 = vpack.c.bf16 %v2849_v54, %v2849_v54  ;;  %v3281_v11 = vpop.f32.mrb[29].mxu0 }
 0xbd4   : > { %v2852_v33 = vpop.f32.mrb[30].mxu0 }
 0xbd5   : > { %v2882_v4 = vsel %vm1620_vm8, %v2864_v10, 0  ;;  %v3282_v18 = vpop.f32.mrb[31].mxu0  ;;  %3296 = vmatprep.subr.msk.bf16.mxu1 %vm1620_vm8, %v2864_v10 }
 0xbd6   : > { %3284 = vmatpush3.bf16.msra.mxu1 %v2882_v4 }
 0xbd9   : > { %3286 = vmatmul.mubr.msk.bf16.vlgmr.msra.gmra.mrb[44].mxu1 %vm1607_vm9, %v3444_v38 }
 0xca1   : > { %v3259_v53 = vpop.f32.mrb[40].mxu1 }
 0xca2   : > { %v2595_v0 = vadd.f32 %v3259_v53, %v2517_v25  ;;  %v2578_v40 = vpop.f32.mrb[41].mxu1 }
 0xca3   : > { %v2593_v50 = vadd.f32 %v2578_v40, %v2515_v36  ;;  %v3260_v19 = vpop.f32.mrb[42].mxu1 }
 0xca4   : > { %2599 = vst.msk [vmem:[#allocation3 + $0x10] sm:$0xff] %vm401_vm3, %v2595_v0  ;;  %v2596_v44 = vadd.f32 %v3260_v19, %v2518_v35  ;;  %v2581_v37 = vpop.f32.mrb[43].mxu1 }
 0xca5   : > { %2597 = vst.msk [vmem:[#allocation3] sm:$0xff] %vm401_vm3, %v2593_v50  ;;  %v2594_v14 = vadd.f32 %v2581_v37, %v2516_v28 }
 0xca6   : > { %2600 = vst.msk [vmem:[#allocation3 + $0x18] sm:$0xff] %vm401_vm3, %v2596_v44 }
 0xca7   : > { %2598 = vst.msk [vmem:[#allocation3 + $0x8] sm:$0xff] %vm401_vm3, %v2594_v14 }
 0xcab   : > { %v2857_v5 = vld [vmem:[#allocation3 + $0x10] sm:$0xff] }
 0xcac   : > { %v3287_v57 = vpop.f32.mrb[44].mxu1  ;;  %v2855_v41 = vld [vmem:[#allocation3] sm:$0xff] }
 0xcad   : > { %v2935_v30 = vadd.f32 %v3287_v57, %v2857_v5  ;;  %v2918_v27 = vpop.f32.mrb[45].mxu1  ;;  %v2858_v39 = vld [vmem:[#allocation3 + $0x18] sm:$0xff] }
 0xcae   : > { %v2933_v51 = vadd.f32 %v2918_v27, %v2855_v41  ;;  %v3288_v48 = vpop.f32.mrb[46].mxu1  ;;  %v2856_v46 = vld [vmem:[#allocation3 + $0x8] sm:$0xff] }
 0xcaf   : > { %2939 = vst.msk [vmem:[#allocation3 + $0x10] sm:$0xff] %vm401_vm3, %v2935_v30  ;;  %v2936_v7 = vadd.f32 %v3288_v48, %v2858_v39  ;;  %v2921_v47 = vpop.f32.mrb[47].mxu1 }
 0xcb0   : > { %2937 = vst.msk [vmem:[#allocation3] sm:$0xff] %vm401_vm3, %v2933_v51  ;;  %v2934_v61 = vadd.f32 %v2921_v47, %v2856_v46 }
 0xcb1   : > { %2940 = vst.msk [vmem:[#allocation3 + $0x18] sm:$0xff] %vm401_vm3, %v2936_v7 }
 0xcb2   : > { %2938 = vst.msk [vmem:[#allocation3 + $0x8] sm:$0xff] %vm401_vm3, %v2934_v61 }
 0xcb6   : > { %v2943_v60 = vld [vmem:[#allocation3 + $0x10] sm:$0xff] }
 0xcb7   : > { %2947 = vst.msk [vmem:[%s251_s26 + $0x10] sm:$0xff] %vm401_vm3, %v2943_v60  ;;  %v2941_v9 = vld [vmem:[#allocation3] sm:$0xff] }
 0xcb8   : > { %2945 = vst.msk [vmem:[%s251_s26] sm:$0xff] %vm401_vm3, %v2941_v9  ;;  %v2944_v55 = vld [vmem:[#allocation3 + $0x18] sm:$0xff] }
 0xcb9   : > { %2948 = vst.msk [vmem:[%s251_s26 + $0x18] sm:$0xff] %vm401_vm3, %v2944_v55  ;;  %v2942_v29 = vld [vmem:[#allocation3 + $0x8] sm:$0xff] }
 0xcba   : > { %2946 = vst.msk [vmem:[%s251_s26 + $0x8] sm:$0xff] %vm401_vm3, %v2942_v29 }
 0xcbb PF: > { %s16_s21 = sadd.s32 1, %s3584_s21  }
 0xcbc   : > { %p13_p4 = scmp.ge.s32.totalorder %s16_s21, 4  }
 0xcbe   :  { %15 = sbr.rel (!%p13_p4) target bundleno = 1 (0x1), region = 88 }

</bundles_post_ra>
